<compile_context>
chip_gen: v7x
topology: tpu7x:2x2x1
jax: 0.10.0
libtpu: 0.0.40
codegen_flags: <defaults>
</compile_context>

<pallas_src>
import functools

import jax
import jax.numpy as jnp
from jax.experimental import pallas as pl
from jax.experimental.pallas import tpu as pltpu

LANES = 128


# ----------------------------- Pallas kernel ------------------------------ #
def _dw_conv_strip_kernel(xp_ref, w_ref, b_ref, o_ref, *, K, stride, TH, Wo):
    """One (TH, Wo, Cb) output row-strip of the merged depthwise conv.

    xp_ref : (1, Hp, Wp, Cb)  zero-padded input, one image, one 128-ch block
    w_ref  : (K, K, Cb)       merged (large + small, BN-fused) depthwise kernel
    b_ref  : (1, 1, Cb)       merged bias
    o_ref  : (1, TH, Wo, Cb)  output rows [h*TH, (h+1)*TH)
    """
    Cb = o_ref.shape[-1]
    h = pl.program_id(2)
    r0 = pl.multiple_of(h * (TH * stride), TH * stride)

    nrow_win = (TH - 1) * stride + K           # input rows feeding this strip

    # Fold the bias into the accumulator init (saves the epilogue add).
    acc = jnp.broadcast_to(b_ref[0, 0, :], (TH, Wo, Cb)).astype(jnp.float32)

    # Hoist the sublane-axis (W) shift out of the row-tap loop: one shifted
    # window per v; the u offsets are free outer-dim slices of that window.
    for v in range(K):
        if stride == 1:
            xv = xp_ref[0, pl.ds(r0, nrow_win), pl.ds(v, Wo), :]
        else:
            xv = xp_ref[0, pl.ds(r0, nrow_win), pl.ds(v, Wo, stride), :]
        for u in range(K):
            if stride == 1:
                patch = xv[u:u + TH]                               # (TH, Wo, Cb)
            else:
                patch = xv[u:u + (TH - 1) * stride + 1:stride]     # (TH, Wo, Cb)
            # Per-tap weight is a 1-vreg load from VMEM (keeps regalloc light).
            acc = acc + patch * w_ref[u, v, :]
    o_ref[0] = acc.astype(o_ref.dtype)


# ------------------------------- wrapper ----------------------------------- #
def merge_small_into_large(wl_kkc, bl, ws_kkc, bs):
    """RepLK reparameterization: fold the small kernel into the large one."""
    K, k = wl_kkc.shape[0], ws_kkc.shape[0]
    off = (K - k) // 2
    w_eq = wl_kkc.at[off:off + k, off:off + k, :].add(ws_kkc)
    return w_eq, bl + bs


def _pick_strip(Ho, Wo, K, want=8):
    """Largest row-strip dividing Ho that keeps acc + shifted window in vregs."""
    w_tiles = -(-Wo // 8)                      # vregs per (row, 128-ch)
    def fits(t):
        return (2 * t + (K - 1)) * w_tiles <= 48
    for t in (want, 16, 8, 4, 2, 1):
        if t <= Ho and Ho % t == 0 and fits(t):
            return t
    return 1


def reparam_large_kernel_conv(x_nchw, w_kkc, bias, *, stride=1, strip=8):
    """x_nchw: (N, C, H, W).  w_kkc: merged depthwise kernel (K, K, C).  bias: (C,)."""
    N, C, H, W = x_nchw.shape
    K = w_kkc.shape[0]
    P = K // 2
    Ho = (H + 2 * P - K) // stride + 1
    Wo = (W + 2 * P - K) // stride + 1
    Hp, Wp = H + 2 * P, W + 2 * P
    Cp = ((C + LANES - 1) // LANES) * LANES

    TH = _pick_strip(Ho, Wo, K, want=strip)

    # TODO(synk): NCHW<->NHWC transposes kept only for PyTorch API parity; an
    # NHWC end-to-end model would drop these two extra HBM round trips.
    x_nhwc = jnp.transpose(x_nchw, (0, 2, 3, 1))
    # One pad pass: spatial halo + lane-padding of C up to a multiple of 128.
    xp = jnp.pad(x_nhwc, ((0, 0), (P, P), (P, P), (0, Cp - C)))
    wpad = jnp.pad(w_kkc, ((0, 0), (0, 0), (0, Cp - C)))
    bpad = jnp.pad(bias, (0, Cp - C)).reshape(1, 1, Cp)

    kernel = functools.partial(_dw_conv_strip_kernel,
                               K=K, stride=stride, TH=TH, Wo=Wo)

    out_nhwc = pl.pallas_call(
        kernel,
        out_shape=jax.ShapeDtypeStruct((N, Ho, Wo, Cp), x_nchw.dtype),
        grid=(N, Cp // LANES, Ho // TH),
        in_specs=[
            # Input block depends only on (n, c); with the strip axis innermost
            # the pipeline fetches it once per (n, c) and reuses it across h.
            pl.BlockSpec((1, Hp, Wp, LANES), lambda n, c, h: (n, 0, 0, c)),
            pl.BlockSpec((K, K, LANES), lambda n, c, h: (0, 0, c)),
            pl.BlockSpec((1, 1, LANES), lambda n, c, h: (0, 0, c)),
        ],
        out_specs=pl.BlockSpec((1, TH, Wo, LANES), lambda n, c, h: (n, h, 0, c)),
        compiler_params=pltpu.CompilerParams(
            dimension_semantics=("parallel", "parallel", "parallel")),
    )(xp, wpad, bpad)

    return jnp.transpose(out_nhwc[..., :C], (0, 3, 1, 2))     # back to NCHW


# --------------------------- parameter plumbing ---------------------------- #
def fuse_bn(w_oihw, gamma, beta, mean, var, eps=1e-5):
    """Mirror of the PyTorch fuse_bn: returns (scaled kernel, bias)."""
    std = jnp.sqrt(var + eps)
    t = gamma / std
    w_f = w_oihw * t.reshape(-1, 1, 1, 1)
    b_f = beta - mean * t
    return w_f, b_f


def init_params(key, C, K, k):
    ks = jax.random.split(key, 4)
    # PyTorch depthwise Conv2d weight shape: (C_out, C_in/groups=1, K, K)
    wL = 0.1 * jax.random.normal(ks[0], (C, 1, K, K), jnp.float32)
    wS = 0.1 * jax.random.normal(ks[1], (C, 1, k, k), jnp.float32)

    def bn(kk):
        a, b, c, d = jax.random.split(kk, 4)
        gamma = 1.0 + 0.1 * jax.random.normal(a, (C,), jnp.float32)
        beta = 0.1 * jax.random.normal(b, (C,), jnp.float32)
        mean = 0.1 * jax.random.normal(c, (C,), jnp.float32)
        var = 1.0 + jnp.abs(jax.random.normal(d, (C,), jnp.float32))
        return gamma, beta, mean, var

    return wL, bn(ks[2]), wS, bn(ks[3])


def reference_forward(x_nchw, wL_f, bL, wS_f, bS, stride, K, k):
    """Pure-JAX reference (two lax convs), same math as the PyTorch forward."""
    C = x_nchw.shape[1]

    def conv(x, w, pad):
        return jax.lax.conv_general_dilated(
            x, w, (stride, stride), ((pad, pad), (pad, pad)),
            feature_group_count=C,
            dimension_numbers=("NCHW", "OIHW", "NCHW"))

    out = conv(x_nchw, wL_f, K // 2) + bL.reshape(1, C, 1, 1)
    out = out + conv(x_nchw, wS_f, k // 2) + bS.reshape(1, C, 1, 1)
    return out


# --------------------------------- main ------------------------------------ #
if __name__ == "__main__":
    N, C, H, W = 2, 4, 16, 16
    K, k, stride = 7, 3, 1

    key = jax.random.PRNGKey(0)
    kx, kp = jax.random.split(key)
    x = jax.random.normal(kx, (N, C, H, W), jnp.float32)

    wL, bnL, wS, bnS = init_params(kp, C, K, k)
    wL_f, bL = fuse_bn(wL, *bnL)          # (C,1,K,K), (C,)
    wS_f, bS = fuse_bn(wS, *bnS)          # (C,1,k,k), (C,)

    # (C,1,K,K) -> (K,K,C) for the NHWC kernel, then reparameterize.
    wL_kkc = jnp.transpose(wL_f[:, 0], (1, 2, 0))
    wS_kkc = jnp.transpose(wS_f[:, 0], (1, 2, 0))
    w_eq, b_eq = merge_small_into_large(wL_kkc, bL, wS_kkc, bS)

    out = reparam_large_kernel_conv(x, w_eq, b_eq, stride=stride)
    out = jax.block_until_ready(out)

    ref = reference_forward(x, wL_f, bL, wS_f, bS, stride, K, k)
    assert out.shape == ref.shape == (N, C, H, W)
    err = jnp.max(jnp.abs(out - ref))
    assert jnp.allclose(out, ref, atol=1e-4, rtol=1e-4), f"max err {err}"

    print("KERNEL_OK")
</pallas_src>

<mosaic_0001>
module attributes {stable_mosaic.version = 11 : i64} {
  func.func @_dw_conv_strip_kernel(%arg0: i32, %arg1: i32, %arg2: i32, %arg3: memref<1x22x22x128xf32, #tpu.memory_space<vmem>>, %arg4: memref<7x7x128xf32, #tpu.memory_space<vmem>>, %arg5: memref<1x1x128xf32, #tpu.memory_space<vmem>>, %arg6: memref<1x8x16x128xf32, #tpu.memory_space<vmem>>) attributes {dimension_semantics = [#tpu.dimension_semantics<parallel>, #tpu.dimension_semantics<parallel>, #tpu.dimension_semantics<parallel>], iteration_bounds = array<i64: 2, 1, 2>, scalar_prefetch = 0 : i64, scratch_operands = 0 : i64, tpu.core_type = #tpu.core_type<tc>, window_params = [{transform_indices = @transform_0, window_bounds = array<i64: 1, 22, 22, 128>}, {transform_indices = @transform_1, window_bounds = array<i64: 7, 7, 128>}, {transform_indices = @transform_2, window_bounds = array<i64: 1, 1, 128>}, {transform_indices = @transform_3, window_bounds = array<i64: 1, 8, 16, 128>}]} {
    %c8_i32 = arith.constant 8 : i32
    %0 = arith.muli %arg2, %c8_i32 : i32
    %1 = tpu.assume_multiple %0, 8 : i32
    %c0 = arith.constant 0 : index
    %c0_0 = arith.constant 0 : index
    %c0_1 = arith.constant 0 : index
    %2 = vector.load %arg5[%c0, %c0_0, %c0_1] : memref<1x1x128xf32, #tpu.memory_space<vmem>>, vector<1x1x128xf32>
    %3 = vector.shape_cast %2 : vector<1x1x128xf32> to vector<128xf32>
    %4 = vector.shape_cast %3 : vector<128xf32> to vector<1x1x128xf32>
    %5 = vector.broadcast %4 : vector<1x1x128xf32> to vector<8x16x128xf32>
    %c0_2 = arith.constant 0 : index
    %6 = arith.index_cast %1 : i32 to index
    %c0_3 = arith.constant 0 : index
    %c0_4 = arith.constant 0 : index
    %7 = vector.load %arg3[%c0_2, %6, %c0_3, %c0_4] : memref<1x22x22x128xf32, #tpu.memory_space<vmem>>, vector<1x14x16x128xf32>
    %8 = vector.shape_cast %7 : vector<1x14x16x128xf32> to vector<14x16x128xf32>
    %9 = vector.extract_strided_slice %8 {offsets = [0, 0, 0], sizes = [8, 16, 128], strides = [1, 1, 1]} : vector<14x16x128xf32> to vector<8x16x128xf32>
    %c0_5 = arith.constant 0 : index
    %c0_6 = arith.constant 0 : index
    %c0_7 = arith.constant 0 : index
    %10 = vector.load %arg4[%c0_5, %c0_6, %c0_7] : memref<7x7x128xf32, #tpu.memory_space<vmem>>, vector<1x1x128xf32>
    %11 = vector.shape_cast %10 : vector<1x1x128xf32> to vector<128xf32>
    %12 = vector.shape_cast %11 : vector<128xf32> to vector<1x1x128xf32>
    %13 = vector.broadcast %12 : vector<1x1x128xf32> to vector<8x16x128xf32>
    %14 = arith.mulf %9, %13 : vector<8x16x128xf32>
    %15 = arith.addf %5, %14 : vector<8x16x128xf32>
    %16 = vector.extract_strided_slice %8 {offsets = [1, 0, 0], sizes = [8, 16, 128], strides = [1, 1, 1]} : vector<14x16x128xf32> to vector<8x16x128xf32>
    %c1 = arith.constant 1 : index
    %c0_8 = arith.constant 0 : index
    %c0_9 = arith.constant 0 : index
    %17 = vector.load %arg4[%c1, %c0_8, %c0_9] : memref<7x7x128xf32, #tpu.memory_space<vmem>>, vector<1x1x128xf32>
    %18 = vector.shape_cast %17 : vector<1x1x128xf32> to vector<128xf32>
    %19 = vector.shape_cast %18 : vector<128xf32> to vector<1x1x128xf32>
    %20 = vector.broadcast %19 : vector<1x1x128xf32> to vector<8x16x128xf32>
    %21 = arith.mulf %16, %20 : vector<8x16x128xf32>
    %22 = arith.addf %15, %21 : vector<8x16x128xf32>
    %23 = vector.extract_strided_slice %8 {offsets = [2, 0, 0], sizes = [8, 16, 128], strides = [1, 1, 1]} : vector<14x16x128xf32> to vector<8x16x128xf32>
    %c2 = arith.constant 2 : index
    %c0_10 = arith.constant 0 : index
    %c0_11 = arith.constant 0 : index
    %24 = vector.load %arg4[%c2, %c0_10, %c0_11] : memref<7x7x128xf32, #tpu.memory_space<vmem>>, vector<1x1x128xf32>
    %25 = vector.shape_cast %24 : vector<1x1x128xf32> to vector<128xf32>
    %26 = vector.shape_cast %25 : vector<128xf32> to vector<1x1x128xf32>
    %27 = vector.broadcast %26 : vector<1x1x128xf32> to vector<8x16x128xf32>
    %28 = arith.mulf %23, %27 : vector<8x16x128xf32>
    %29 = arith.addf %22, %28 : vector<8x16x128xf32>
    %30 = vector.extract_strided_slice %8 {offsets = [3, 0, 0], sizes = [8, 16, 128], strides = [1, 1, 1]} : vector<14x16x128xf32> to vector<8x16x128xf32>
    %c3 = arith.constant 3 : index
    %c0_12 = arith.constant 0 : index
    %c0_13 = arith.constant 0 : index
    %31 = vector.load %arg4[%c3, %c0_12, %c0_13] : memref<7x7x128xf32, #tpu.memory_space<vmem>>, vector<1x1x128xf32>
    %32 = vector.shape_cast %31 : vector<1x1x128xf32> to vector<128xf32>
    %33 = vector.shape_cast %32 : vector<128xf32> to vector<1x1x128xf32>
    %34 = vector.broadcast %33 : vector<1x1x128xf32> to vector<8x16x128xf32>
    %35 = arith.mulf %30, %34 : vector<8x16x128xf32>
    %36 = arith.addf %29, %35 : vector<8x16x128xf32>
    %37 = vector.extract_strided_slice %8 {offsets = [4, 0, 0], sizes = [8, 16, 128], strides = [1, 1, 1]} : vector<14x16x128xf32> to vector<8x16x128xf32>
    %c4 = arith.constant 4 : index
    %c0_14 = arith.constant 0 : index
    %c0_15 = arith.constant 0 : index
    %38 = vector.load %arg4[%c4, %c0_14, %c0_15] : memref<7x7x128xf32, #tpu.memory_space<vmem>>, vector<1x1x128xf32>
    %39 = vector.shape_cast %38 : vector<1x1x128xf32> to vector<128xf32>
    %40 = vector.shape_cast %39 : vector<128xf32> to vector<1x1x128xf32>
    %41 = vector.broadcast %40 : vector<1x1x128xf32> to vector<8x16x128xf32>
    %42 = arith.mulf %37, %41 : vector<8x16x128xf32>
    %43 = arith.addf %36, %42 : vector<8x16x128xf32>
    %44 = vector.extract_strided_slice %8 {offsets = [5, 0, 0], sizes = [8, 16, 128], strides = [1, 1, 1]} : vector<14x16x128xf32> to vector<8x16x128xf32>
    %c5 = arith.constant 5 : index
    %c0_16 = arith.constant 0 : index
    %c0_17 = arith.constant 0 : index
    %45 = vector.load %arg4[%c5, %c0_16, %c0_17] : memref<7x7x128xf32, #tpu.memory_space<vmem>>, vector<1x1x128xf32>
    %46 = vector.shape_cast %45 : vector<1x1x128xf32> to vector<128xf32>
    %47 = vector.shape_cast %46 : vector<128xf32> to vector<1x1x128xf32>
    %48 = vector.broadcast %47 : vector<1x1x128xf32> to vector<8x16x128xf32>
    %49 = arith.mulf %44, %48 : vector<8x16x128xf32>
    %50 = arith.addf %43, %49 : vector<8x16x128xf32>
    %51 = vector.extract_strided_slice %8 {offsets = [6, 0, 0], sizes = [8, 16, 128], strides = [1, 1, 1]} : vector<14x16x128xf32> to vector<8x16x128xf32>
    %c6 = arith.constant 6 : index
    %c0_18 = arith.constant 0 : index
    %c0_19 = arith.constant 0 : index
    %52 = vector.load %arg4[%c6, %c0_18, %c0_19] : memref<7x7x128xf32, #tpu.memory_space<vmem>>, vector<1x1x128xf32>
    %53 = vector.shape_cast %52 : vector<1x1x128xf32> to vector<128xf32>
    %54 = vector.shape_cast %53 : vector<128xf32> to vector<1x1x128xf32>
    %55 = vector.broadcast %54 : vector<1x1x128xf32> to vector<8x16x128xf32>
    %56 = arith.mulf %51, %55 : vector<8x16x128xf32>
    %57 = arith.addf %50, %56 : vector<8x16x128xf32>
    %c0_20 = arith.constant 0 : index
    %58 = arith.index_cast %1 : i32 to index
    %c1_21 = arith.constant 1 : index
    %c0_22 = arith.constant 0 : index
    %59 = vector.load %arg3[%c0_20, %58, %c1_21, %c0_22] : memref<1x22x22x128xf32, #tpu.memory_space<vmem>>, vector<1x14x16x128xf32>
    %60 = vector.shape_cast %59 : vector<1x14x16x128xf32> to vector<14x16x128xf32>
    %61 = vector.extract_strided_slice %60 {offsets = [0, 0, 0], sizes = [8, 16, 128], strides = [1, 1, 1]} : vector<14x16x128xf32> to vector<8x16x128xf32>
    %c0_23 = arith.constant 0 : index
    %c1_24 = arith.constant 1 : index
    %c0_25 = arith.constant 0 : index
    %62 = vector.load %arg4[%c0_23, %c1_24, %c0_25] : memref<7x7x128xf32, #tpu.memory_space<vmem>>, vector<1x1x128xf32>
    %63 = vector.shape_cast %62 : vector<1x1x128xf32> to vector<128xf32>
    %64 = vector.shape_cast %63 : vector<128xf32> to vector<1x1x128xf32>
    %65 = vector.broadcast %64 : vector<1x1x128xf32> to vector<8x16x128xf32>
    %66 = arith.mulf %61, %65 : vector<8x16x128xf32>
    %67 = arith.addf %57, %66 : vector<8x16x128xf32>
    %68 = vector.extract_strided_slice %60 {offsets = [1, 0, 0], sizes = [8, 16, 128], strides = [1, 1, 1]} : vector<14x16x128xf32> to vector<8x16x128xf32>
    %c1_26 = arith.constant 1 : index
    %c1_27 = arith.constant 1 : index
    %c0_28 = arith.constant 0 : index
    %69 = vector.load %arg4[%c1_26, %c1_27, %c0_28] : memref<7x7x128xf32, #tpu.memory_space<vmem>>, vector<1x1x128xf32>
    %70 = vector.shape_cast %69 : vector<1x1x128xf32> to vector<128xf32>
    %71 = vector.shape_cast %70 : vector<128xf32> to vector<1x1x128xf32>
    %72 = vector.broadcast %71 : vector<1x1x128xf32> to vector<8x16x128xf32>
    %73 = arith.mulf %68, %72 : vector<8x16x128xf32>
    %74 = arith.addf %67, %73 : vector<8x16x128xf32>
    %75 = vector.extract_strided_slice %60 {offsets = [2, 0, 0], sizes = [8, 16, 128], strides = [1, 1, 1]} : vector<14x16x128xf32> to vector<8x16x128xf32>
    %c2_29 = arith.constant 2 : index
    %c1_30 = arith.constant 1 : index
    %c0_31 = arith.constant 0 : index
    %76 = vector.load %arg4[%c2_29, %c1_30, %c0_31] : memref<7x7x128xf32, #tpu.memory_space<vmem>>, vector<1x1x128xf32>
    %77 = vector.shape_cast %76 : vector<1x1x128xf32> to vector<128xf32>
    %78 = vector.shape_cast %77 : vector<128xf32> to vector<1x1x128xf32>
    %79 = vector.broadcast %78 : vector<1x1x128xf32> to vector<8x16x128xf32>
    %80 = arith.mulf %75, %79 : vector<8x16x128xf32>
    %81 = arith.addf %74, %80 : vector<8x16x128xf32>
    %82 = vector.extract_strided_slice %60 {offsets = [3, 0, 0], sizes = [8, 16, 128], strides = [1, 1, 1]} : vector<14x16x128xf32> to vector<8x16x128xf32>
    %c3_32 = arith.constant 3 : index
    %c1_33 = arith.constant 1 : index
    %c0_34 = arith.constant 0 : index
    %83 = vector.load %arg4[%c3_32, %c1_33, %c0_34] : memref<7x7x128xf32, #tpu.memory_space<vmem>>, vector<1x1x128xf32>
    %84 = vector.shape_cast %83 : vector<1x1x128xf32> to vector<128xf32>
    %85 = vector.shape_cast %84 : vector<128xf32> to vector<1x1x128xf32>
    %86 = vector.broadcast %85 : vector<1x1x128xf32> to vector<8x16x128xf32>
    %87 = arith.mulf %82, %86 : vector<8x16x128xf32>
    %88 = arith.addf %81, %87 : vector<8x16x128xf32>
    %89 = vector.extract_strided_slice %60 {offsets = [4, 0, 0], sizes = [8, 16, 128], strides = [1, 1, 1]} : vector<14x16x128xf32> to vector<8x16x128xf32>
    %c4_35 = arith.constant 4 : index
    %c1_36 = arith.constant 1 : index
    %c0_37 = arith.constant 0 : index
    %90 = vector.load %arg4[%c4_35, %c1_36, %c0_37] : memref<7x7x128xf32, #tpu.memory_space<vmem>>, vector<1x1x128xf32>
    %91 = vector.shape_cast %90 : vector<1x1x128xf32> to vector<128xf32>
    %92 = vector.shape_cast %91 : vector<128xf32> to vector<1x1x128xf32>
    %93 = vector.broadcast %92 : vector<1x1x128xf32> to vector<8x16x128xf32>
    %94 = arith.mulf %89, %93 : vector<8x16x128xf32>
    %95 = arith.addf %88, %94 : vector<8x16x128xf32>
    %96 = vector.extract_strided_slice %60 {offsets = [5, 0, 0], sizes = [8, 16, 128], strides = [1, 1, 1]} : vector<14x16x128xf32> to vector<8x16x128xf32>
    %c5_38 = arith.constant 5 : index
    %c1_39 = arith.constant 1 : index
    %c0_40 = arith.constant 0 : index
    %97 = vector.load %arg4[%c5_38, %c1_39, %c0_40] : memref<7x7x128xf32, #tpu.memory_space<vmem>>, vector<1x1x128xf32>
    %98 = vector.shape_cast %97 : vector<1x1x128xf32> to vector<128xf32>
    %99 = vector.shape_cast %98 : vector<128xf32> to vector<1x1x128xf32>
    %100 = vector.broadcast %99 : vector<1x1x128xf32> to vector<8x16x128xf32>
    %101 = arith.mulf %96, %100 : vector<8x16x128xf32>
    %102 = arith.addf %95, %101 : vector<8x16x128xf32>
    %103 = vector.extract_strided_slice %60 {offsets = [6, 0, 0], sizes = [8, 16, 128], strides = [1, 1, 1]} : vector<14x16x128xf32> to vector<8x16x128xf32>
    %c6_41 = arith.constant 6 : index
    %c1_42 = arith.constant 1 : index
    %c0_43 = arith.constant 0 : index
    %104 = vector.load %arg4[%c6_41, %c1_42, %c0_43] : memref<7x7x128xf32, #tpu.memory_space<vmem>>, vector<1x1x128xf32>
    %105 = vector.shape_cast %104 : vector<1x1x128xf32> to vector<128xf32>
    %106 = vector.shape_cast %105 : vector<128xf32> to vector<1x1x128xf32>
    %107 = vector.broadcast %106 : vector<1x1x128xf32> to vector<8x16x128xf32>
    %108 = arith.mulf %103, %107 : vector<8x16x128xf32>
    %109 = arith.addf %102, %108 : vector<8x16x128xf32>
    %c0_44 = arith.constant 0 : index
    %110 = arith.index_cast %1 : i32 to index
    %c2_45 = arith.constant 2 : index
    %c0_46 = arith.constant 0 : index
    %111 = vector.load %arg3[%c0_44, %110, %c2_45, %c0_46] : memref<1x22x22x128xf32, #tpu.memory_space<vmem>>, vector<1x14x16x128xf32>
    %112 = vector.shape_cast %111 : vector<1x14x16x128xf32> to vector<14x16x128xf32>
    %113 = vector.extract_strided_slice %112 {offsets = [0, 0, 0], sizes = [8, 16, 128], strides = [1, 1, 1]} : vector<14x16x128xf32> to vector<8x16x128xf32>
    %c0_47 = arith.constant 0 : index
    %c2_48 = arith.constant 2 : index
    %c0_49 = arith.constant 0 : index
    %114 = vector.load %arg4[%c0_47, %c2_48, %c0_49] : memref<7x7x128xf32, #tpu.memory_space<vmem>>, vector<1x1x128xf32>
    %115 = vector.shape_cast %114 : vector<1x1x128xf32> to vector<128xf32>
    %116 = vector.shape_cast %115 : vector<128xf32> to vector<1x1x128xf32>
    %117 = vector.broadcast %116 : vector<1x1x128xf32> to vector<8x16x128xf32>
    %118 = arith.mulf %113, %117 : vector<8x16x128xf32>
    %119 = arith.addf %109, %118 : vector<8x16x128xf32>
    %120 = vector.extract_strided_slice %112 {offsets = [1, 0, 0], sizes = [8, 16, 128], strides = [1, 1, 1]} : vector<14x16x128xf32> to vector<8x16x128xf32>
    %c1_50 = arith.constant 1 : index
    %c2_51 = arith.constant 2 : index
    %c0_52 = arith.constant 0 : index
    %121 = vector.load %arg4[%c1_50, %c2_51, %c0_52] : memref<7x7x128xf32, #tpu.memory_space<vmem>>, vector<1x1x128xf32>
    %122 = vector.shape_cast %121 : vector<1x1x128xf32> to vector<128xf32>
    %123 = vector.shape_cast %122 : vector<128xf32> to vector<1x1x128xf32>
    %124 = vector.broadcast %123 : vector<1x1x128xf32> to vector<8x16x128xf32>
    %125 = arith.mulf %120, %124 : vector<8x16x128xf32>
    %126 = arith.addf %119, %125 : vector<8x16x128xf32>
    %127 = vector.extract_strided_slice %112 {offsets = [2, 0, 0], sizes = [8, 16, 128], strides = [1, 1, 1]} : vector<14x16x128xf32> to vector<8x16x128xf32>
    %c2_53 = arith.constant 2 : index
    %c2_54 = arith.constant 2 : index
    %c0_55 = arith.constant 0 : index
    %128 = vector.load %arg4[%c2_53, %c2_54, %c0_55] : memref<7x7x128xf32, #tpu.memory_space<vmem>>, vector<1x1x128xf32>
    %129 = vector.shape_cast %128 : vector<1x1x128xf32> to vector<128xf32>
    %130 = vector.shape_cast %129 : vector<128xf32> to vector<1x1x128xf32>
    %131 = vector.broadcast %130 : vector<1x1x128xf32> to vector<8x16x128xf32>
    %132 = arith.mulf %127, %131 : vector<8x16x128xf32>
    %133 = arith.addf %126, %132 : vector<8x16x128xf32>
    %134 = vector.extract_strided_slice %112 {offsets = [3, 0, 0], sizes = [8, 16, 128], strides = [1, 1, 1]} : vector<14x16x128xf32> to vector<8x16x128xf32>
    %c3_56 = arith.constant 3 : index
    %c2_57 = arith.constant 2 : index
    %c0_58 = arith.constant 0 : index
    %135 = vector.load %arg4[%c3_56, %c2_57, %c0_58] : memref<7x7x128xf32, #tpu.memory_space<vmem>>, vector<1x1x128xf32>
    %136 = vector.shape_cast %135 : vector<1x1x128xf32> to vector<128xf32>
    %137 = vector.shape_cast %136 : vector<128xf32> to vector<1x1x128xf32>
    %138 = vector.broadcast %137 : vector<1x1x128xf32> to vector<8x16x128xf32>
    %139 = arith.mulf %134, %138 : vector<8x16x128xf32>
    %140 = arith.addf %133, %139 : vector<8x16x128xf32>
    %141 = vector.extract_strided_slice %112 {offsets = [4, 0, 0], sizes = [8, 16, 128], strides = [1, 1, 1]} : vector<14x16x128xf32> to vector<8x16x128xf32>
    %c4_59 = arith.constant 4 : index
    %c2_60 = arith.constant 2 : index
    %c0_61 = arith.constant 0 : index
    %142 = vector.load %arg4[%c4_59, %c2_60, %c0_61] : memref<7x7x128xf32, #tpu.memory_space<vmem>>, vector<1x1x128xf32>
    %143 = vector.shape_cast %142 : vector<1x1x128xf32> to vector<128xf32>
    %144 = vector.shape_cast %143 : vector<128xf32> to vector<1x1x128xf32>
    %145 = vector.broadcast %144 : vector<1x1x128xf32> to vector<8x16x128xf32>
    %146 = arith.mulf %141, %145 : vector<8x16x128xf32>
    %147 = arith.addf %140, %146 : vector<8x16x128xf32>
    %148 = vector.extract_strided_slice %112 {offsets = [5, 0, 0], sizes = [8, 16, 128], strides = [1, 1, 1]} : vector<14x16x128xf32> to vector<8x16x128xf32>
    %c5_62 = arith.constant 5 : index
    %c2_63 = arith.constant 2 : index
    %c0_64 = arith.constant 0 : index
    %149 = vector.load %arg4[%c5_62, %c2_63, %c0_64] : memref<7x7x128xf32, #tpu.memory_space<vmem>>, vector<1x1x128xf32>
    %150 = vector.shape_cast %149 : vector<1x1x128xf32> to vector<128xf32>
    %151 = vector.shape_cast %150 : vector<128xf32> to vector<1x1x128xf32>
    %152 = vector.broadcast %151 : vector<1x1x128xf32> to vector<8x16x128xf32>
    %153 = arith.mulf %148, %152 : vector<8x16x128xf32>
    %154 = arith.addf %147, %153 : vector<8x16x128xf32>
    %155 = vector.extract_strided_slice %112 {offsets = [6, 0, 0], sizes = [8, 16, 128], strides = [1, 1, 1]} : vector<14x16x128xf32> to vector<8x16x128xf32>
    %c6_65 = arith.constant 6 : index
    %c2_66 = arith.constant 2 : index
    %c0_67 = arith.constant 0 : index
    %156 = vector.load %arg4[%c6_65, %c2_66, %c0_67] : memref<7x7x128xf32, #tpu.memory_space<vmem>>, vector<1x1x128xf32>
    %157 = vector.shape_cast %156 : vector<1x1x128xf32> to vector<128xf32>
    %158 = vector.shape_cast %157 : vector<128xf32> to vector<1x1x128xf32>
    %159 = vector.broadcast %158 : vector<1x1x128xf32> to vector<8x16x128xf32>
    %160 = arith.mulf %155, %159 : vector<8x16x128xf32>
    %161 = arith.addf %154, %160 : vector<8x16x128xf32>
    %c0_68 = arith.constant 0 : index
    %162 = arith.index_cast %1 : i32 to index
    %c3_69 = arith.constant 3 : index
    %c0_70 = arith.constant 0 : index
    %163 = vector.load %arg3[%c0_68, %162, %c3_69, %c0_70] : memref<1x22x22x128xf32, #tpu.memory_space<vmem>>, vector<1x14x16x128xf32>
    %164 = vector.shape_cast %163 : vector<1x14x16x128xf32> to vector<14x16x128xf32>
    %165 = vector.extract_strided_slice %164 {offsets = [0, 0, 0], sizes = [8, 16, 128], strides = [1, 1, 1]} : vector<14x16x128xf32> to vector<8x16x128xf32>
    %c0_71 = arith.constant 0 : index
    %c3_72 = arith.constant 3 : index
    %c0_73 = arith.constant 0 : index
    %166 = vector.load %arg4[%c0_71, %c3_72, %c0_73] : memref<7x7x128xf32, #tpu.memory_space<vmem>>, vector<1x1x128xf32>
    %167 = vector.shape_cast %166 : vector<1x1x128xf32> to vector<128xf32>
    %168 = vector.shape_cast %167 : vector<128xf32> to vector<1x1x128xf32>
    %169 = vector.broadcast %168 : vector<1x1x128xf32> to vector<8x16x128xf32>
    %170 = arith.mulf %165, %169 : vector<8x16x128xf32>
    %171 = arith.addf %161, %170 : vector<8x16x128xf32>
    %172 = vector.extract_strided_slice %164 {offsets = [1, 0, 0], sizes = [8, 16, 128], strides = [1, 1, 1]} : vector<14x16x128xf32> to vector<8x16x128xf32>
    %c1_74 = arith.constant 1 : index
    %c3_75 = arith.constant 3 : index
    %c0_76 = arith.constant 0 : index
    %173 = vector.load %arg4[%c1_74, %c3_75, %c0_76] : memref<7x7x128xf32, #tpu.memory_space<vmem>>, vector<1x1x128xf32>
    %174 = vector.shape_cast %173 : vector<1x1x128xf32> to vector<128xf32>
    %175 = vector.shape_cast %174 : vector<128xf32> to vector<1x1x128xf32>
    %176 = vector.broadcast %175 : vector<1x1x128xf32> to vector<8x16x128xf32>
    %177 = arith.mulf %172, %176 : vector<8x16x128xf32>
    %178 = arith.addf %171, %177 : vector<8x16x128xf32>
    %179 = vector.extract_strided_slice %164 {offsets = [2, 0, 0], sizes = [8, 16, 128], strides = [1, 1, 1]} : vector<14x16x128xf32> to vector<8x16x128xf32>
    %c2_77 = arith.constant 2 : index
    %c3_78 = arith.constant 3 : index
    %c0_79 = arith.constant 0 : index
    %180 = vector.load %arg4[%c2_77, %c3_78, %c0_79] : memref<7x7x128xf32, #tpu.memory_space<vmem>>, vector<1x1x128xf32>
    %181 = vector.shape_cast %180 : vector<1x1x128xf32> to vector<128xf32>
    %182 = vector.shape_cast %181 : vector<128xf32> to vector<1x1x128xf32>
    %183 = vector.broadcast %182 : vector<1x1x128xf32> to vector<8x16x128xf32>
    %184 = arith.mulf %179, %183 : vector<8x16x128xf32>
    %185 = arith.addf %178, %184 : vector<8x16x128xf32>
    %186 = vector.extract_strided_slice %164 {offsets = [3, 0, 0], sizes = [8, 16, 128], strides = [1, 1, 1]} : vector<14x16x128xf32> to vector<8x16x128xf32>
    %c3_80 = arith.constant 3 : index
    %c3_81 = arith.constant 3 : index
    %c0_82 = arith.constant 0 : index
    %187 = vector.load %arg4[%c3_80, %c3_81, %c0_82] : memref<7x7x128xf32, #tpu.memory_space<vmem>>, vector<1x1x128xf32>
    %188 = vector.shape_cast %187 : vector<1x1x128xf32> to vector<128xf32>
    %189 = vector.shape_cast %188 : vector<128xf32> to vector<1x1x128xf32>
    %190 = vector.broadcast %189 : vector<1x1x128xf32> to vector<8x16x128xf32>
    %191 = arith.mulf %186, %190 : vector<8x16x128xf32>
    %192 = arith.addf %185, %191 : vector<8x16x128xf32>
    %193 = vector.extract_strided_slice %164 {offsets = [4, 0, 0], sizes = [8, 16, 128], strides = [1, 1, 1]} : vector<14x16x128xf32> to vector<8x16x128xf32>
    %c4_83 = arith.constant 4 : index
    %c3_84 = arith.constant 3 : index
    %c0_85 = arith.constant 0 : index
    %194 = vector.load %arg4[%c4_83, %c3_84, %c0_85] : memref<7x7x128xf32, #tpu.memory_space<vmem>>, vector<1x1x128xf32>
    %195 = vector.shape_cast %194 : vector<1x1x128xf32> to vector<128xf32>
    %196 = vector.shape_cast %195 : vector<128xf32> to vector<1x1x128xf32>
    %197 = vector.broadcast %196 : vector<1x1x128xf32> to vector<8x16x128xf32>
    %198 = arith.mulf %193, %197 : vector<8x16x128xf32>
    %199 = arith.addf %192, %198 : vector<8x16x128xf32>
    %200 = vector.extract_strided_slice %164 {offsets = [5, 0, 0], sizes = [8, 16, 128], strides = [1, 1, 1]} : vector<14x16x128xf32> to vector<8x16x128xf32>
    %c5_86 = arith.constant 5 : index
    %c3_87 = arith.constant 3 : index
    %c0_88 = arith.constant 0 : index
    %201 = vector.load %arg4[%c5_86, %c3_87, %c0_88] : memref<7x7x128xf32, #tpu.memory_space<vmem>>, vector<1x1x128xf32>
    %202 = vector.shape_cast %201 : vector<1x1x128xf32> to vector<128xf32>
    %203 = vector.shape_cast %202 : vector<128xf32> to vector<1x1x128xf32>
    %204 = vector.broadcast %203 : vector<1x1x128xf32> to vector<8x16x128xf32>
    %205 = arith.mulf %200, %204 : vector<8x16x128xf32>
    %206 = arith.addf %199, %205 : vector<8x16x128xf32>
    %207 = vector.extract_strided_slice %164 {offsets = [6, 0, 0], sizes = [8, 16, 128], strides = [1, 1, 1]} : vector<14x16x128xf32> to vector<8x16x128xf32>
    %c6_89 = arith.constant 6 : index
    %c3_90 = arith.constant 3 : index
    %c0_91 = arith.constant 0 : index
    %208 = vector.load %arg4[%c6_89, %c3_90, %c0_91] : memref<7x7x128xf32, #tpu.memory_space<vmem>>, vector<1x1x128xf32>
    %209 = vector.shape_cast %208 : vector<1x1x128xf32> to vector<128xf32>
    %210 = vector.shape_cast %209 : vector<128xf32> to vector<1x1x128xf32>
    %211 = vector.broadcast %210 : vector<1x1x128xf32> to vector<8x16x128xf32>
    %212 = arith.mulf %207, %211 : vector<8x16x128xf32>
    %213 = arith.addf %206, %212 : vector<8x16x128xf32>
    %c0_92 = arith.constant 0 : index
    %214 = arith.index_cast %1 : i32 to index
    %c4_93 = arith.constant 4 : index
    %c0_94 = arith.constant 0 : index
    %215 = vector.load %arg3[%c0_92, %214, %c4_93, %c0_94] : memref<1x22x22x128xf32, #tpu.memory_space<vmem>>, vector<1x14x16x128xf32>
    %216 = vector.shape_cast %215 : vector<1x14x16x128xf32> to vector<14x16x128xf32>
    %217 = vector.extract_strided_slice %216 {offsets = [0, 0, 0], sizes = [8, 16, 128], strides = [1, 1, 1]} : vector<14x16x128xf32> to vector<8x16x128xf32>
    %c0_95 = arith.constant 0 : index
    %c4_96 = arith.constant 4 : index
    %c0_97 = arith.constant 0 : index
    %218 = vector.load %arg4[%c0_95, %c4_96, %c0_97] : memref<7x7x128xf32, #tpu.memory_space<vmem>>, vector<1x1x128xf32>
    %219 = vector.shape_cast %218 : vector<1x1x128xf32> to vector<128xf32>
    %220 = vector.shape_cast %219 : vector<128xf32> to vector<1x1x128xf32>
    %221 = vector.broadcast %220 : vector<1x1x128xf32> to vector<8x16x128xf32>
    %222 = arith.mulf %217, %221 : vector<8x16x128xf32>
    %223 = arith.addf %213, %222 : vector<8x16x128xf32>
    %224 = vector.extract_strided_slice %216 {offsets = [1, 0, 0], sizes = [8, 16, 128], strides = [1, 1, 1]} : vector<14x16x128xf32> to vector<8x16x128xf32>
    %c1_98 = arith.constant 1 : index
    %c4_99 = arith.constant 4 : index
    %c0_100 = arith.constant 0 : index
    %225 = vector.load %arg4[%c1_98, %c4_99, %c0_100] : memref<7x7x128xf32, #tpu.memory_space<vmem>>, vector<1x1x128xf32>
    %226 = vector.shape_cast %225 : vector<1x1x128xf32> to vector<128xf32>
    %227 = vector.shape_cast %226 : vector<128xf32> to vector<1x1x128xf32>
    %228 = vector.broadcast %227 : vector<1x1x128xf32> to vector<8x16x128xf32>
    %229 = arith.mulf %224, %228 : vector<8x16x128xf32>
    %230 = arith.addf %223, %229 : vector<8x16x128xf32>
    %231 = vector.extract_strided_slice %216 {offsets = [2, 0, 0], sizes = [8, 16, 128], strides = [1, 1, 1]} : vector<14x16x128xf32> to vector<8x16x128xf32>
    %c2_101 = arith.constant 2 : index
    %c4_102 = arith.constant 4 : index
    %c0_103 = arith.constant 0 : index
    %232 = vector.load %arg4[%c2_101, %c4_102, %c0_103] : memref<7x7x128xf32, #tpu.memory_space<vmem>>, vector<1x1x128xf32>
    %233 = vector.shape_cast %232 : vector<1x1x128xf32> to vector<128xf32>
    %234 = vector.shape_cast %233 : vector<128xf32> to vector<1x1x128xf32>
    %235 = vector.broadcast %234 : vector<1x1x128xf32> to vector<8x16x128xf32>
    %236 = arith.mulf %231, %235 : vector<8x16x128xf32>
    %237 = arith.addf %230, %236 : vector<8x16x128xf32>
    %238 = vector.extract_strided_slice %216 {offsets = [3, 0, 0], sizes = [8, 16, 128], strides = [1, 1, 1]} : vector<14x16x128xf32> to vector<8x16x128xf32>
    %c3_104 = arith.constant 3 : index
    %c4_105 = arith.constant 4 : index
    %c0_106 = arith.constant 0 : index
    %239 = vector.load %arg4[%c3_104, %c4_105, %c0_106] : memref<7x7x128xf32, #tpu.memory_space<vmem>>, vector<1x1x128xf32>
    %240 = vector.shape_cast %239 : vector<1x1x128xf32> to vector<128xf32>
    %241 = vector.shape_cast %240 : vector<128xf32> to vector<1x1x128xf32>
    %242 = vector.broadcast %241 : vector<1x1x128xf32> to vector<8x16x128xf32>
    %243 = arith.mulf %238, %242 : vector<8x16x128xf32>
    %244 = arith.addf %237, %243 : vector<8x16x128xf32>
    %245 = vector.extract_strided_slice %216 {offsets = [4, 0, 0], sizes = [8, 16, 128], strides = [1, 1, 1]} : vector<14x16x128xf32> to vector<8x16x128xf32>
    %c4_107 = arith.constant 4 : index
    %c4_108 = arith.constant 4 : index
    %c0_109 = arith.constant 0 : index
    %246 = vector.load %arg4[%c4_107, %c4_108, %c0_109] : memref<7x7x128xf32, #tpu.memory_space<vmem>>, vector<1x1x128xf32>
    %247 = vector.shape_cast %246 : vector<1x1x128xf32> to vector<128xf32>
    %248 = vector.shape_cast %247 : vector<128xf32> to vector<1x1x128xf32>
    %249 = vector.broadcast %248 : vector<1x1x128xf32> to vector<8x16x128xf32>
    %250 = arith.mulf %245, %249 : vector<8x16x128xf32>
    %251 = arith.addf %244, %250 : vector<8x16x128xf32>
    %252 = vector.extract_strided_slice %216 {offsets = [5, 0, 0], sizes = [8, 16, 128], strides = [1, 1, 1]} : vector<14x16x128xf32> to vector<8x16x128xf32>
    %c5_110 = arith.constant 5 : index
    %c4_111 = arith.constant 4 : index
    %c0_112 = arith.constant 0 : index
    %253 = vector.load %arg4[%c5_110, %c4_111, %c0_112] : memref<7x7x128xf32, #tpu.memory_space<vmem>>, vector<1x1x128xf32>
    %254 = vector.shape_cast %253 : vector<1x1x128xf32> to vector<128xf32>
    %255 = vector.shape_cast %254 : vector<128xf32> to vector<1x1x128xf32>
    %256 = vector.broadcast %255 : vector<1x1x128xf32> to vector<8x16x128xf32>
    %257 = arith.mulf %252, %256 : vector<8x16x128xf32>
    %258 = arith.addf %251, %257 : vector<8x16x128xf32>
    %259 = vector.extract_strided_slice %216 {offsets = [6, 0, 0], sizes = [8, 16, 128], strides = [1, 1, 1]} : vector<14x16x128xf32> to vector<8x16x128xf32>
    %c6_113 = arith.constant 6 : index
    %c4_114 = arith.constant 4 : index
    %c0_115 = arith.constant 0 : index
    %260 = vector.load %arg4[%c6_113, %c4_114, %c0_115] : memref<7x7x128xf32, #tpu.memory_space<vmem>>, vector<1x1x128xf32>
    %261 = vector.shape_cast %260 : vector<1x1x128xf32> to vector<128xf32>
    %262 = vector.shape_cast %261 : vector<128xf32> to vector<1x1x128xf32>
    %263 = vector.broadcast %262 : vector<1x1x128xf32> to vector<8x16x128xf32>
    %264 = arith.mulf %259, %263 : vector<8x16x128xf32>
    %265 = arith.addf %258, %264 : vector<8x16x128xf32>
    %c0_116 = arith.constant 0 : index
    %266 = arith.index_cast %1 : i32 to index
    %c5_117 = arith.constant 5 : index
    %c0_118 = arith.constant 0 : index
    %267 = vector.load %arg3[%c0_116, %266, %c5_117, %c0_118] : memref<1x22x22x128xf32, #tpu.memory_space<vmem>>, vector<1x14x16x128xf32>
    %268 = vector.shape_cast %267 : vector<1x14x16x128xf32> to vector<14x16x128xf32>
    %269 = vector.extract_strided_slice %268 {offsets = [0, 0, 0], sizes = [8, 16, 128], strides = [1, 1, 1]} : vector<14x16x128xf32> to vector<8x16x128xf32>
    %c0_119 = arith.constant 0 : index
    %c5_120 = arith.constant 5 : index
    %c0_121 = arith.constant 0 : index
    %270 = vector.load %arg4[%c0_119, %c5_120, %c0_121] : memref<7x7x128xf32, #tpu.memory_space<vmem>>, vector<1x1x128xf32>
    %271 = vector.shape_cast %270 : vector<1x1x128xf32> to vector<128xf32>
    %272 = vector.shape_cast %271 : vector<128xf32> to vector<1x1x128xf32>
    %273 = vector.broadcast %272 : vector<1x1x128xf32> to vector<8x16x128xf32>
    %274 = arith.mulf %269, %273 : vector<8x16x128xf32>
    %275 = arith.addf %265, %274 : vector<8x16x128xf32>
    %276 = vector.extract_strided_slice %268 {offsets = [1, 0, 0], sizes = [8, 16, 128], strides = [1, 1, 1]} : vector<14x16x128xf32> to vector<8x16x128xf32>
    %c1_122 = arith.constant 1 : index
    %c5_123 = arith.constant 5 : index
    %c0_124 = arith.constant 0 : index
    %277 = vector.load %arg4[%c1_122, %c5_123, %c0_124] : memref<7x7x128xf32, #tpu.memory_space<vmem>>, vector<1x1x128xf32>
    %278 = vector.shape_cast %277 : vector<1x1x128xf32> to vector<128xf32>
    %279 = vector.shape_cast %278 : vector<128xf32> to vector<1x1x128xf32>
    %280 = vector.broadcast %279 : vector<1x1x128xf32> to vector<8x16x128xf32>
    %281 = arith.mulf %276, %280 : vector<8x16x128xf32>
    %282 = arith.addf %275, %281 : vector<8x16x128xf32>
    %283 = vector.extract_strided_slice %268 {offsets = [2, 0, 0], sizes = [8, 16, 128], strides = [1, 1, 1]} : vector<14x16x128xf32> to vector<8x16x128xf32>
    %c2_125 = arith.constant 2 : index
    %c5_126 = arith.constant 5 : index
    %c0_127 = arith.constant 0 : index
    %284 = vector.load %arg4[%c2_125, %c5_126, %c0_127] : memref<7x7x128xf32, #tpu.memory_space<vmem>>, vector<1x1x128xf32>
    %285 = vector.shape_cast %284 : vector<1x1x128xf32> to vector<128xf32>
    %286 = vector.shape_cast %285 : vector<128xf32> to vector<1x1x128xf32>
    %287 = vector.broadcast %286 : vector<1x1x128xf32> to vector<8x16x128xf32>
    %288 = arith.mulf %283, %287 : vector<8x16x128xf32>
    %289 = arith.addf %282, %288 : vector<8x16x128xf32>
    %290 = vector.extract_strided_slice %268 {offsets = [3, 0, 0], sizes = [8, 16, 128], strides = [1, 1, 1]} : vector<14x16x128xf32> to vector<8x16x128xf32>
    %c3_128 = arith.constant 3 : index
    %c5_129 = arith.constant 5 : index
    %c0_130 = arith.constant 0 : index
    %291 = vector.load %arg4[%c3_128, %c5_129, %c0_130] : memref<7x7x128xf32, #tpu.memory_space<vmem>>, vector<1x1x128xf32>
    %292 = vector.shape_cast %291 : vector<1x1x128xf32> to vector<128xf32>
    %293 = vector.shape_cast %292 : vector<128xf32> to vector<1x1x128xf32>
    %294 = vector.broadcast %293 : vector<1x1x128xf32> to vector<8x16x128xf32>
    %295 = arith.mulf %290, %294 : vector<8x16x128xf32>
    %296 = arith.addf %289, %295 : vector<8x16x128xf32>
    %297 = vector.extract_strided_slice %268 {offsets = [4, 0, 0], sizes = [8, 16, 128], strides = [1, 1, 1]} : vector<14x16x128xf32> to vector<8x16x128xf32>
    %c4_131 = arith.constant 4 : index
    %c5_132 = arith.constant 5 : index
    %c0_133 = arith.constant 0 : index
    %298 = vector.load %arg4[%c4_131, %c5_132, %c0_133] : memref<7x7x128xf32, #tpu.memory_space<vmem>>, vector<1x1x128xf32>
    %299 = vector.shape_cast %298 : vector<1x1x128xf32> to vector<128xf32>
    %300 = vector.shape_cast %299 : vector<128xf32> to vector<1x1x128xf32>
    %301 = vector.broadcast %300 : vector<1x1x128xf32> to vector<8x16x128xf32>
    %302 = arith.mulf %297, %301 : vector<8x16x128xf32>
    %303 = arith.addf %296, %302 : vector<8x16x128xf32>
    %304 = vector.extract_strided_slice %268 {offsets = [5, 0, 0], sizes = [8, 16, 128], strides = [1, 1, 1]} : vector<14x16x128xf32> to vector<8x16x128xf32>
    %c5_134 = arith.constant 5 : index
    %c5_135 = arith.constant 5 : index
    %c0_136 = arith.constant 0 : index
    %305 = vector.load %arg4[%c5_134, %c5_135, %c0_136] : memref<7x7x128xf32, #tpu.memory_space<vmem>>, vector<1x1x128xf32>
    %306 = vector.shape_cast %305 : vector<1x1x128xf32> to vector<128xf32>
    %307 = vector.shape_cast %306 : vector<128xf32> to vector<1x1x128xf32>
    %308 = vector.broadcast %307 : vector<1x1x128xf32> to vector<8x16x128xf32>
    %309 = arith.mulf %304, %308 : vector<8x16x128xf32>
    %310 = arith.addf %303, %309 : vector<8x16x128xf32>
    %311 = vector.extract_strided_slice %268 {offsets = [6, 0, 0], sizes = [8, 16, 128], strides = [1, 1, 1]} : vector<14x16x128xf32> to vector<8x16x128xf32>
    %c6_137 = arith.constant 6 : index
    %c5_138 = arith.constant 5 : index
    %c0_139 = arith.constant 0 : index
    %312 = vector.load %arg4[%c6_137, %c5_138, %c0_139] : memref<7x7x128xf32, #tpu.memory_space<vmem>>, vector<1x1x128xf32>
    %313 = vector.shape_cast %312 : vector<1x1x128xf32> to vector<128xf32>
    %314 = vector.shape_cast %313 : vector<128xf32> to vector<1x1x128xf32>
    %315 = vector.broadcast %314 : vector<1x1x128xf32> to vector<8x16x128xf32>
    %316 = arith.mulf %311, %315 : vector<8x16x128xf32>
    %317 = arith.addf %310, %316 : vector<8x16x128xf32>
    %c0_140 = arith.constant 0 : index
    %318 = arith.index_cast %1 : i32 to index
    %c6_141 = arith.constant 6 : index
    %c0_142 = arith.constant 0 : index
    %319 = vector.load %arg3[%c0_140, %318, %c6_141, %c0_142] : memref<1x22x22x128xf32, #tpu.memory_space<vmem>>, vector<1x14x16x128xf32>
    %320 = vector.shape_cast %319 : vector<1x14x16x128xf32> to vector<14x16x128xf32>
    %321 = vector.extract_strided_slice %320 {offsets = [0, 0, 0], sizes = [8, 16, 128], strides = [1, 1, 1]} : vector<14x16x128xf32> to vector<8x16x128xf32>
    %c0_143 = arith.constant 0 : index
    %c6_144 = arith.constant 6 : index
    %c0_145 = arith.constant 0 : index
    %322 = vector.load %arg4[%c0_143, %c6_144, %c0_145] : memref<7x7x128xf32, #tpu.memory_space<vmem>>, vector<1x1x128xf32>
    %323 = vector.shape_cast %322 : vector<1x1x128xf32> to vector<128xf32>
    %324 = vector.shape_cast %323 : vector<128xf32> to vector<1x1x128xf32>
    %325 = vector.broadcast %324 : vector<1x1x128xf32> to vector<8x16x128xf32>
    %326 = arith.mulf %321, %325 : vector<8x16x128xf32>
    %327 = arith.addf %317, %326 : vector<8x16x128xf32>
    %328 = vector.extract_strided_slice %320 {offsets = [1, 0, 0], sizes = [8, 16, 128], strides = [1, 1, 1]} : vector<14x16x128xf32> to vector<8x16x128xf32>
    %c1_146 = arith.constant 1 : index
    %c6_147 = arith.constant 6 : index
    %c0_148 = arith.constant 0 : index
    %329 = vector.load %arg4[%c1_146, %c6_147, %c0_148] : memref<7x7x128xf32, #tpu.memory_space<vmem>>, vector<1x1x128xf32>
    %330 = vector.shape_cast %329 : vector<1x1x128xf32> to vector<128xf32>
    %331 = vector.shape_cast %330 : vector<128xf32> to vector<1x1x128xf32>
    %332 = vector.broadcast %331 : vector<1x1x128xf32> to vector<8x16x128xf32>
    %333 = arith.mulf %328, %332 : vector<8x16x128xf32>
    %334 = arith.addf %327, %333 : vector<8x16x128xf32>
    %335 = vector.extract_strided_slice %320 {offsets = [2, 0, 0], sizes = [8, 16, 128], strides = [1, 1, 1]} : vector<14x16x128xf32> to vector<8x16x128xf32>
    %c2_149 = arith.constant 2 : index
    %c6_150 = arith.constant 6 : index
    %c0_151 = arith.constant 0 : index
    %336 = vector.load %arg4[%c2_149, %c6_150, %c0_151] : memref<7x7x128xf32, #tpu.memory_space<vmem>>, vector<1x1x128xf32>
    %337 = vector.shape_cast %336 : vector<1x1x128xf32> to vector<128xf32>
    %338 = vector.shape_cast %337 : vector<128xf32> to vector<1x1x128xf32>
    %339 = vector.broadcast %338 : vector<1x1x128xf32> to vector<8x16x128xf32>
    %340 = arith.mulf %335, %339 : vector<8x16x128xf32>
    %341 = arith.addf %334, %340 : vector<8x16x128xf32>
    %342 = vector.extract_strided_slice %320 {offsets = [3, 0, 0], sizes = [8, 16, 128], strides = [1, 1, 1]} : vector<14x16x128xf32> to vector<8x16x128xf32>
    %c3_152 = arith.constant 3 : index
    %c6_153 = arith.constant 6 : index
    %c0_154 = arith.constant 0 : index
    %343 = vector.load %arg4[%c3_152, %c6_153, %c0_154] : memref<7x7x128xf32, #tpu.memory_space<vmem>>, vector<1x1x128xf32>
    %344 = vector.shape_cast %343 : vector<1x1x128xf32> to vector<128xf32>
    %345 = vector.shape_cast %344 : vector<128xf32> to vector<1x1x128xf32>
    %346 = vector.broadcast %345 : vector<1x1x128xf32> to vector<8x16x128xf32>
    %347 = arith.mulf %342, %346 : vector<8x16x128xf32>
    %348 = arith.addf %341, %347 : vector<8x16x128xf32>
    %349 = vector.extract_strided_slice %320 {offsets = [4, 0, 0], sizes = [8, 16, 128], strides = [1, 1, 1]} : vector<14x16x128xf32> to vector<8x16x128xf32>
    %c4_155 = arith.constant 4 : index
    %c6_156 = arith.constant 6 : index
    %c0_157 = arith.constant 0 : index
    %350 = vector.load %arg4[%c4_155, %c6_156, %c0_157] : memref<7x7x128xf32, #tpu.memory_space<vmem>>, vector<1x1x128xf32>
    %351 = vector.shape_cast %350 : vector<1x1x128xf32> to vector<128xf32>
    %352 = vector.shape_cast %351 : vector<128xf32> to vector<1x1x128xf32>
    %353 = vector.broadcast %352 : vector<1x1x128xf32> to vector<8x16x128xf32>
    %354 = arith.mulf %349, %353 : vector<8x16x128xf32>
    %355 = arith.addf %348, %354 : vector<8x16x128xf32>
    %356 = vector.extract_strided_slice %320 {offsets = [5, 0, 0], sizes = [8, 16, 128], strides = [1, 1, 1]} : vector<14x16x128xf32> to vector<8x16x128xf32>
    %c5_158 = arith.constant 5 : index
    %c6_159 = arith.constant 6 : index
    %c0_160 = arith.constant 0 : index
    %357 = vector.load %arg4[%c5_158, %c6_159, %c0_160] : memref<7x7x128xf32, #tpu.memory_space<vmem>>, vector<1x1x128xf32>
    %358 = vector.shape_cast %357 : vector<1x1x128xf32> to vector<128xf32>
    %359 = vector.shape_cast %358 : vector<128xf32> to vector<1x1x128xf32>
    %360 = vector.broadcast %359 : vector<1x1x128xf32> to vector<8x16x128xf32>
    %361 = arith.mulf %356, %360 : vector<8x16x128xf32>
    %362 = arith.addf %355, %361 : vector<8x16x128xf32>
    %363 = vector.extract_strided_slice %320 {offsets = [6, 0, 0], sizes = [8, 16, 128], strides = [1, 1, 1]} : vector<14x16x128xf32> to vector<8x16x128xf32>
    %c6_161 = arith.constant 6 : index
    %c6_162 = arith.constant 6 : index
    %c0_163 = arith.constant 0 : index
    %364 = vector.load %arg4[%c6_161, %c6_162, %c0_163] : memref<7x7x128xf32, #tpu.memory_space<vmem>>, vector<1x1x128xf32>
    %365 = vector.shape_cast %364 : vector<1x1x128xf32> to vector<128xf32>
    %366 = vector.shape_cast %365 : vector<128xf32> to vector<1x1x128xf32>
    %367 = vector.broadcast %366 : vector<1x1x128xf32> to vector<8x16x128xf32>
    %368 = arith.mulf %363, %367 : vector<8x16x128xf32>
    %369 = arith.addf %362, %368 : vector<8x16x128xf32>
    %c0_164 = arith.constant 0 : index
    %c0_165 = arith.constant 0 : index
    %c0_166 = arith.constant 0 : index
    %c0_167 = arith.constant 0 : index
    %370 = vector.load %arg6[%c0_164, %c0_165, %c0_166, %c0_167] : memref<1x8x16x128xf32, #tpu.memory_space<vmem>>, vector<1x8x16x128xf32>
    %371 = vector.shape_cast %370 : vector<1x8x16x128xf32> to vector<8x16x128xf32>
    %372 = vector.shape_cast %369 : vector<8x16x128xf32> to vector<1x8x16x128xf32>
    tpu.vector_store %arg6[%c0_164, %c0_165, %c0_166, %c0_167], %372 {strides = array<i32>} : memref<1x8x16x128xf32, #tpu.memory_space<vmem>>, vector<1x8x16x128xf32>,
    return
  }
  func.func @transform_0(%arg0: i32, %arg1: i32, %arg2: i32) -> (i32, i32, i32, i32) {
    %c0_i32 = arith.constant 0 : i32
    %c0_i32_0 = arith.constant 0 : i32
    %c0_i32_1 = arith.constant 0 : i32
    return %arg0, %c0_i32, %c0_i32_0, %arg1 : i32, i32, i32, i32
  }
  func.func @transform_1(%arg0: i32, %arg1: i32, %arg2: i32) -> (i32, i32, i32) {
    %c0_i32 = arith.constant 0 : i32
    %c0_i32_0 = arith.constant 0 : i32
    %c0_i32_1 = arith.constant 0 : i32
    return %c0_i32, %c0_i32_0, %arg1 : i32, i32, i32
  }
  func.func @transform_2(%arg0: i32, %arg1: i32, %arg2: i32) -> (i32, i32, i32) {
    %c0_i32 = arith.constant 0 : i32
    %c0_i32_0 = arith.constant 0 : i32
    %c0_i32_1 = arith.constant 0 : i32
    return %c0_i32, %c0_i32_0, %arg1 : i32, i32, i32
  }
  func.func @transform_3(%arg0: i32, %arg1: i32, %arg2: i32) -> (i32, i32, i32, i32) {
    %c0_i32 = arith.constant 0 : i32
    %c0_i32_0 = arith.constant 0 : i32
    return %arg0, %arg2, %c0_i32, %arg1 : i32, i32, i32, i32
  }
}

</mosaic_0001>

<bundles_post_ra>
// kernel: tpu_custom_call.1
= control target key start
LH: loop header
LB: loop body
LE: loop exit
PB: predicated region body
PF: predicated region fallthrough
CT: control target
= control target key end

     0   :  { %8 = vsyncpa [#allocation3], 0  ;;  %s4227_s0 = inlined_call_operand.vmem [shape: f32[2,22,22,128], index: 0, kind: input, shape index: {}]   ;;  %s4228_s1 = inlined_call_operand.vmem [shape: f32[7,7,128], index: 1, kind: input, shape index: {}]   ;;  %s4229_s2 = inlined_call_operand.vmem [shape: f32[1,1,128], index: 2, kind: input, shape index: {}]   ;;  %s4230_s3 = inlined_call_operand.hbm [shape: f32[2,16,16,128], index: 3, kind: output, shape index: {}]  }
   0x1   :  { %10 = vsyncpa [#allocation3 + $0x1], 0  ;;  %s2713_s12 = smov 0   ;;  %s2715_s13 = smov 0  }
   0x2   :  { %s2717_s14 = smov 0   ;;  %s2719_s15 = smov 0  }
   0x3   :  { %s2721_s16 = smov 0   ;;  %s2723_s17 = smov 0  }
   0x4   :  { %s2725_s18 = smov 0   ;;  %s2727_s19 = smov 0  }
   0x5 LB: > { %s2409_s20 = sadd.s32 4294967295, %s2688_s19   ;;  %s2410_s21 = sadd.s32 4294967294, %s2688_s19   ;;  %s2688_s19 = sphi %s2727_s19, %s16_s19   ;;  %s2684_s18 = sphi %s2725_s18, %s4239_s18   ;;  %s2680_s17 = sphi %s2723_s17, %s4238_s17   ;;  %s2676_s16 = sphi %s2721_s16, %s4237_s16   ;;  %s2672_s15 = sphi %s2719_s15, %s4236_s15   ;;  %s2668_s14 = sphi %s2717_s14, %s4235_s14   ;;  %s2664_s13 = sphi %s2715_s13, %s4234_s13   ;;  %s2660_s12 = sphi %s2713_s12, %s4233_s12  }
   0x6   : > { %s28_s22 = sadd.s32 1, %s2680_s17  ;;  %s35_s23 = sadd.s32 1, %s2684_s18 }
   0x7   : > { %p29_p0 = scmp.ge.s32.totalorder %s28_s22, 2  ;;  %p136_p1 = scmp.ne.s32.totalorder %s2668_s14, %s2664_s13 }
   0x8   : > { %p137_p2 = scmp.eq.s32.totalorder %s2409_s20, 3  ;;  %p142_p5 = scmp.ne.s32.totalorder %s2664_s13, %s2660_s12 }
   0x9   : > { %s4241_s22 = smov (%p29_p0, %s28_s22), 0  ;;  %s4243_s23 = smov (!%p29_p0, %s35_s23), %s2684_s18 }
   0xa   : > { %s120_s24 = ssub.s32 %s2680_s17, %s4241_s22  ;;  %p2764_p3 = por %p137_p2, %p136_p1 }
   0xb   : > { %p37_p4 = scmp.ge.s32.totalorder %s4243_s23, 2  ;;  %p143_p6 = scmp.eq.s32.totalorder %s2410_s21, 3 }
   0xc   : > { %p2415_p7 = scmp.ge.s32.totalorder %s2688_s19, 1  ;;  %p185_p9 = scmp.lt.s32.totalorder %s2688_s19, 5 }
   0xd   : > { %s4245_s23 = smov (%p37_p4, %s4243_s23), 0  ;;  %p2773_p8 = por %p143_p6, %p142_p5 }
   0xe   : > { %s119_s27 = ssub.s32 %s2684_s18, %s4245_s23  ;;  %s126_s28 = sadd.s32 1, %s2668_s14 }
   0xf   : > { %s121_s29 = sor.u32 %s120_s24, %s119_s27  ;;  %p186_p10 = pnand %p2415_p7, %p185_p9 }
  0x10   : > { %p124_p11 = scmp.eq.s32.totalorder %s121_s29, 0  ;;  %p219_p12 = scmp.lt.s32.totalorder (!%p186_p10), %s2676_s16, 1  ;;  %v2421_v0 = vld [vmem:[%s4228_s1] ss:$0 sm:$0xff] (!%p186_p10)  ;;  %v2796_v1 = vld [vmem:[%s4228_s1 + $0x8] ss:$0 sm:$0xff] (!%p186_p10) }
  0x11   : > { %189 = sbr.rel (%p186_p10) target bundleno = 444 (0x1bc), region = 32  ;;  %v2419_v2 = vld [vmem:[%s4229_s2] ss:$0 sm:$0xff] (!%p186_p10)  ;;  %s2519_s8 = sshll.u32 (!%p186_p10), %s2672_s15, 4 }
  0x12   : > { %s2782_s30 = scalar_select %p124_p11, %s2668_s14, %s126_s28  }
  0x13   : > { %s2420_s5 = smul.u32 (!%p186_p10), 192, %s2672_s15  ;;  %s2690_s29 = smov (!%p186_p10), [#allocation2]  }
  0x18   : > { %s220_s4 = scalar_select %p219_p12, %s2676_s16, 1 }
  0x1a   : > { %s2520_s6 = smul.u32 528, %s220_s4  ;;  %s216_s4 = sand.u32 1, %s2664_s13  }
  0x1b   : > { %s4175_s24 = scalar_lea.sflag [#allocation3], %s216_s4 }
  0x1c   : > { %s226_s9 = scalar_lea.vmem %s4227_s0, %s2520_s6 }
  0x1d   : > { %s2801_s28 = scalar_lea.vmem %s226_s9, %s2420_s5  ;;  %s4122_s5 = sshll.u32 %s216_s4, 7 }
  0x1e   : > { %v245_v3 = vld [vmem:[%s2801_s28] sm:$0xff]  ;;  %v246_v4 = vld [vmem:[%s2801_s28 + $0x8] sm:$0xff]  ;;  %v247_v5 = vld [vmem:[%s2801_s28 + $0x18] sm:$0xff]  ;;  %s2515_s9 = sshll.u32 %s2676_s16, 5 }
  0x1f   : > { %v248_v6 = vld [vmem:[%s2801_s28 + $0x20] sm:$0xff]  ;;  %v2808_v7 = vld [vmem:[%s2801_s28 + $0x30] sm:$0xff]  ;;  %v2811_v8 = vld [vmem:[%s2801_s28 + $0x38] sm:$0xff]  ;;  %v278_v9 = vmul.f32 %v2421_v0, %v245_v3  ;;  %v279_v10 = vmul.f32 %v2421_v0, %v246_v4  ;;  %v280_v11 = vmul.f32 %v2421_v0, %v247_v5  ;;  %v316_v12 = vmul.f32 %v2796_v1, %v247_v5  ;;  %s4135_s15 = sadd.s32 %s2519_s8, %s2515_s9 }
  0x20   : > { %v2815_v13 = vld [vmem:[%s2801_s28 + $0x48] sm:$0xff]  ;;  %v2818_v14 = vld [vmem:[%s2801_s28 + $0x50] sm:$0xff]  ;;  %v2821_v15 = vld [vmem:[%s2801_s28 + $0x60] sm:$0xff]  ;;  %v281_v16 = vmul.f32 %v2421_v0, %v248_v6  ;;  %v282_v17 = vmul.f32 %v2421_v0, %v2808_v7  ;;  %v283_v18 = vmul.f32 %v2421_v0, %v2811_v8  ;;  %v317_v19 = vmul.f32 %v2796_v1, %v248_v6  ;;  %s2516_s16 = sshll.u32 %s4135_s15, 7 }
  0x21   : > { %v2827_v20 = vld [vmem:[%s2801_s28 + $0x68] sm:$0xff]  ;;  %v2830_v21 = vld [vmem:[%s2801_s28 + $0x78] sm:$0xff]  ;;  %v2833_v22 = vld [vmem:[%s2801_s28 + $0x80] sm:$0xff]  ;;  %v284_v23 = vmul.f32 %v2421_v0, %v2815_v13  ;;  %v285_v24 = vmul.f32 %v2421_v0, %v2818_v14  ;;  %v286_v25 = vmul.f32 %v2421_v0, %v2821_v15  ;;  %v294_v26 = vadd.f32 %v2419_v2, %v278_v9  ;;  %s4157_s21 = scalar_lea.hbm %s4230_s3, %s2516_s16 }
  0x22   : > { %v2839_v27 = vld [vmem:[%s2801_s28 + $0x90] sm:$0xff]  ;;  %v2842_v28 = vld [vmem:[%s2801_s28 + $0x98] sm:$0xff]  ;;  %v2845_v29 = vld [vmem:[%s2801_s28 + $0xa8] sm:$0xff]  ;;  %v287_v30 = vmul.f32 %v2421_v0, %v2827_v20  ;;  %v288_v31 = vmul.f32 %v2421_v0, %v2830_v21  ;;  %v289_v32 = vmul.f32 %v2421_v0, %v2833_v22  ;;  %v295_v33 = vadd.f32 %v2419_v2, %v279_v10 }
  0x23   : > { %v2851_v34 = vld [vmem:[%s2801_s28 + $0xb0] sm:$0xff]  ;;  %v290_v35 = vmul.f32 %v2421_v0, %v2839_v27  ;;  %v291_v36 = vmul.f32 %v2421_v0, %v2842_v28  ;;  %v292_v37 = vmul.f32 %v2421_v0, %v2845_v29  ;;  %v296_v38 = vadd.f32 %v2419_v2, %v280_v11  ;;  %v2858_v51 = vld [vmem:[%s2801_s28 + $0xc0] sm:$0xff]  ;;  %v2861_v52 = vld [vmem:[%s2801_s28 + $0xc8] sm:$0xff] }
  0x24   : > { %v293_v39 = vmul.f32 %v2421_v0, %v2851_v34  ;;  %v297_v40 = vadd.f32 %v2419_v2, %v281_v16  ;;  %v298_v41 = vadd.f32 %v2419_v2, %v282_v17  ;;  %v299_v42 = vadd.f32 %v2419_v2, %v283_v18 }
  0x25   : > { %v300_v43 = vadd.f32 %v2419_v2, %v284_v23  ;;  %v301_v44 = vadd.f32 %v2419_v2, %v285_v24  ;;  %v302_v45 = vadd.f32 %v2419_v2, %v286_v25  ;;  %v303_v46 = vadd.f32 %v2419_v2, %v287_v30  ;;  %v2425_v24 = vld [vmem:[%s4228_s1 + $0x10] ss:$0 sm:$0xff] }
  0x26   : > { %v304_v47 = vadd.f32 %v2419_v2, %v288_v31  ;;  %v305_v48 = vadd.f32 %v2419_v2, %v289_v32  ;;  %v306_v49 = vadd.f32 %v2419_v2, %v290_v35  ;;  %v307_v50 = vadd.f32 %v2419_v2, %v291_v36 }
  0x27   : > { %v308_v53 = vadd.f32 %v2419_v2, %v292_v37  ;;  %v309_v54 = vadd.f32 %v2419_v2, %v293_v39  ;;  %v318_v55 = vmul.f32 %v2796_v1, %v2808_v7  ;;  %v319_v56 = vmul.f32 %v2796_v1, %v2811_v8 }
  0x28   : > { %v320_v57 = vmul.f32 %v2796_v1, %v2815_v13  ;;  %v321_v58 = vmul.f32 %v2796_v1, %v2818_v14  ;;  %v322_v59 = vmul.f32 %v2796_v1, %v2821_v15  ;;  %v323_v60 = vmul.f32 %v2796_v1, %v2827_v20 }
  0x29   : > { %v324_v61 = vmul.f32 %v2796_v1, %v2830_v21  ;;  %v325_v62 = vmul.f32 %v2796_v1, %v2833_v22  ;;  %v326_v63 = vmul.f32 %v2796_v1, %v2839_v27  ;;  %v327_v0 = vmul.f32 %v2796_v1, %v2842_v28 }
  0x2a   : > { %v328_v2 = vmul.f32 %v2796_v1, %v2845_v29  ;;  %v329_v3 = vmul.f32 %v2796_v1, %v2851_v34  ;;  %v330_v4 = vmul.f32 %v2796_v1, %v2858_v51  ;;  %v331_v5 = vmul.f32 %v2796_v1, %v2861_v52 }
  0x2b   : > { %v332_v6 = vadd.f32 %v316_v12, %v294_v26  ;;  %v333_v9 = vadd.f32 %v317_v19, %v295_v33  ;;  %v334_v10 = vadd.f32 %v318_v55, %v296_v38  ;;  %v335_v11 = vadd.f32 %v319_v56, %v297_v40  ;;  %v2895_v26 = vld [vmem:[%s2801_s28 + $0xd8] sm:$0xff]  ;;  %v2898_v33 = vld [vmem:[%s2801_s28 + $0xe0] sm:$0xff] }
  0x2c   : > { %v336_v16 = vadd.f32 %v320_v57, %v298_v41  ;;  %v337_v17 = vadd.f32 %v321_v58, %v299_v42  ;;  %v338_v18 = vadd.f32 %v322_v59, %v300_v43  ;;  %v339_v23 = vadd.f32 %v323_v60, %v301_v44  ;;  %v2427_v60 = vld [vmem:[%s4228_s1 + $0x18] ss:$0 sm:$0xff] }
  0x2d   : > { %v340_v25 = vadd.f32 %v324_v61, %v302_v45  ;;  %v341_v30 = vadd.f32 %v325_v62, %v303_v46  ;;  %v342_v31 = vadd.f32 %v326_v63, %v304_v47  ;;  %v343_v32 = vadd.f32 %v327_v0, %v305_v48 }
  0x2e   : > { %v344_v35 = vadd.f32 %v328_v2, %v306_v49  ;;  %v345_v1 = vadd.f32 %v329_v3, %v307_v50  ;;  %v346_v12 = vadd.f32 %v330_v4, %v308_v53  ;;  %v347_v19 = vadd.f32 %v331_v5, %v309_v54 }
  0x2f   : > { %v354_v36 = vmul.f32 %v2425_v24, %v2808_v7  ;;  %v355_v37 = vmul.f32 %v2425_v24, %v2811_v8  ;;  %v356_v38 = vmul.f32 %v2425_v24, %v2815_v13  ;;  %v357_v39 = vmul.f32 %v2425_v24, %v2818_v14 }
  0x30   : > { %v358_v40 = vmul.f32 %v2425_v24, %v2821_v15  ;;  %v359_v41 = vmul.f32 %v2425_v24, %v2827_v20  ;;  %v360_v42 = vmul.f32 %v2425_v24, %v2830_v21  ;;  %v361_v43 = vmul.f32 %v2425_v24, %v2833_v22 }
  0x31   : > { %v362_v44 = vmul.f32 %v2425_v24, %v2839_v27  ;;  %v363_v45 = vmul.f32 %v2425_v24, %v2842_v28  ;;  %v364_v7 = vmul.f32 %v2425_v24, %v2845_v29  ;;  %v365_v8 = vmul.f32 %v2425_v24, %v2851_v34 }
  0x32   : > { %v366_v46 = vmul.f32 %v2425_v24, %v2858_v51  ;;  %v367_v47 = vmul.f32 %v2425_v24, %v2861_v52  ;;  %v368_v48 = vmul.f32 %v2425_v24, %v2895_v26  ;;  %v369_v49 = vmul.f32 %v2425_v24, %v2898_v33 }
  0x33   : > { %v370_v50 = vadd.f32 %v354_v36, %v332_v6  ;;  %v371_v53 = vadd.f32 %v355_v37, %v333_v9  ;;  %v372_v54 = vadd.f32 %v356_v38, %v334_v10  ;;  %v373_v55 = vadd.f32 %v357_v39, %v335_v11  ;;  %v2920_v6 = vld [vmem:[%s2801_s28 + $0xf0] sm:$0xff]  ;;  %v2923_v9 = vld [vmem:[%s2801_s28 + $0xf8] sm:$0xff] }
  0x34   : > { %v374_v56 = vadd.f32 %v358_v40, %v336_v16  ;;  %v375_v57 = vadd.f32 %v359_v41, %v337_v17  ;;  %v376_v58 = vadd.f32 %v360_v42, %v338_v18  ;;  %v377_v59 = vadd.f32 %v361_v43, %v339_v23  ;;  %v2429_v43 = vld [vmem:[%s4228_s1 + $0x20] ss:$0 sm:$0xff] }
  0x35   : > { %v378_v61 = vadd.f32 %v362_v44, %v340_v25  ;;  %v379_v62 = vadd.f32 %v363_v45, %v341_v30  ;;  %v380_v63 = vadd.f32 %v364_v7, %v342_v31  ;;  %v381_v0 = vadd.f32 %v365_v8, %v343_v32 }
  0x36   : > { %v382_v2 = vadd.f32 %v366_v46, %v344_v35  ;;  %v383_v3 = vadd.f32 %v367_v47, %v345_v1  ;;  %v384_v4 = vadd.f32 %v368_v48, %v346_v12  ;;  %v385_v5 = vadd.f32 %v369_v49, %v347_v19 }
  0x37   : > { %v392_v10 = vmul.f32 %v2427_v60, %v2815_v13  ;;  %v393_v11 = vmul.f32 %v2427_v60, %v2818_v14  ;;  %v394_v16 = vmul.f32 %v2427_v60, %v2821_v15  ;;  %v395_v17 = vmul.f32 %v2427_v60, %v2827_v20 }
  0x38   : > { %v396_v18 = vmul.f32 %v2427_v60, %v2830_v21  ;;  %v397_v23 = vmul.f32 %v2427_v60, %v2833_v22  ;;  %v398_v24 = vmul.f32 %v2427_v60, %v2839_v27  ;;  %v399_v25 = vmul.f32 %v2427_v60, %v2842_v28 }
  0x39   : > { %v400_v30 = vmul.f32 %v2427_v60, %v2845_v29  ;;  %v401_v31 = vmul.f32 %v2427_v60, %v2851_v34  ;;  %v402_v13 = vmul.f32 %v2427_v60, %v2858_v51  ;;  %v403_v14 = vmul.f32 %v2427_v60, %v2861_v52 }
  0x3a   : > { %v404_v32 = vmul.f32 %v2427_v60, %v2895_v26  ;;  %v405_v35 = vmul.f32 %v2427_v60, %v2898_v33  ;;  %v406_v1 = vmul.f32 %v2427_v60, %v2920_v6  ;;  %v407_v12 = vmul.f32 %v2427_v60, %v2923_v9 }
  0x3b   : > { %v408_v19 = vadd.f32 %v392_v10, %v370_v50  ;;  %v409_v36 = vadd.f32 %v393_v11, %v371_v53  ;;  %v410_v37 = vadd.f32 %v394_v16, %v372_v54  ;;  %v411_v38 = vadd.f32 %v395_v17, %v373_v55  ;;  %v2945_v50 = vld [vmem:[%s2801_s28 + $0x108] sm:$0xff]  ;;  %v2948_v53 = vld [vmem:[%s2801_s28 + $0x110] sm:$0xff] }
  0x3c   : > { %v412_v39 = vadd.f32 %v396_v18, %v374_v56  ;;  %v413_v40 = vadd.f32 %v397_v23, %v375_v57  ;;  %v414_v41 = vadd.f32 %v398_v24, %v376_v58  ;;  %v415_v42 = vadd.f32 %v399_v25, %v377_v59  ;;  %v2431_v25 = vld [vmem:[%s4228_s1 + $0x28] ss:$0 sm:$0xff] }
  0x3d   : > { %v416_v44 = vadd.f32 %v400_v30, %v378_v61  ;;  %v417_v45 = vadd.f32 %v401_v31, %v379_v62  ;;  %v418_v7 = vadd.f32 %v402_v13, %v380_v63  ;;  %v419_v8 = vadd.f32 %v403_v14, %v381_v0 }
  0x3e   : > { %v420_v46 = vadd.f32 %v404_v32, %v382_v2  ;;  %v421_v47 = vadd.f32 %v405_v35, %v383_v3  ;;  %v422_v48 = vadd.f32 %v406_v1, %v384_v4  ;;  %v423_v49 = vadd.f32 %v407_v12, %v385_v5 }
  0x3f   : > { %v430_v54 = vmul.f32 %v2429_v43, %v2821_v15  ;;  %v431_v55 = vmul.f32 %v2429_v43, %v2827_v20  ;;  %v432_v56 = vmul.f32 %v2429_v43, %v2830_v21  ;;  %v433_v57 = vmul.f32 %v2429_v43, %v2833_v22 }
  0x40   : > { %v434_v58 = vmul.f32 %v2429_v43, %v2839_v27  ;;  %v435_v59 = vmul.f32 %v2429_v43, %v2842_v28  ;;  %v436_v60 = vmul.f32 %v2429_v43, %v2845_v29  ;;  %v437_v61 = vmul.f32 %v2429_v43, %v2851_v34 }
  0x41   : > { %v438_v62 = vmul.f32 %v2429_v43, %v2858_v51  ;;  %v439_v63 = vmul.f32 %v2429_v43, %v2861_v52  ;;  %v440_v15 = vmul.f32 %v2429_v43, %v2895_v26  ;;  %v441_v20 = vmul.f32 %v2429_v43, %v2898_v33 }
  0x42   : > { %v442_v0 = vmul.f32 %v2429_v43, %v2920_v6  ;;  %v443_v2 = vmul.f32 %v2429_v43, %v2923_v9  ;;  %v444_v3 = vmul.f32 %v2429_v43, %v2945_v50  ;;  %v445_v4 = vmul.f32 %v2429_v43, %v2948_v53 }
  0x43   : > { %v446_v5 = vadd.f32 %v430_v54, %v408_v19  ;;  %v447_v10 = vadd.f32 %v431_v55, %v409_v36  ;;  %v448_v11 = vadd.f32 %v432_v56, %v410_v37  ;;  %v449_v16 = vadd.f32 %v433_v57, %v411_v38  ;;  %v269_v19 = vld [vmem:[%s2801_s28 + $0x120] sm:$0xff]  ;;  %v270_v36 = vld [vmem:[%s2801_s28 + $0x128] sm:$0xff] }
  0x44   : > { %v450_v17 = vadd.f32 %v434_v58, %v412_v39  ;;  %v451_v18 = vadd.f32 %v435_v59, %v413_v40  ;;  %v452_v23 = vadd.f32 %v436_v60, %v414_v41  ;;  %v453_v24 = vadd.f32 %v437_v61, %v415_v42  ;;  %v2433_v61 = vld [vmem:[%s4228_s1 + $0x30] ss:$0 sm:$0xff] }
  0x45   : > { %v454_v30 = vadd.f32 %v438_v62, %v416_v44  ;;  %v455_v31 = vadd.f32 %v439_v63, %v417_v45  ;;  %v456_v13 = vadd.f32 %v440_v15, %v418_v7  ;;  %v457_v14 = vadd.f32 %v441_v20, %v419_v8 }
  0x46   : > { %v458_v32 = vadd.f32 %v442_v0, %v420_v46  ;;  %v459_v35 = vadd.f32 %v443_v2, %v421_v47  ;;  %v460_v1 = vadd.f32 %v444_v3, %v422_v48  ;;  %v461_v12 = vadd.f32 %v445_v4, %v423_v49 }
  0x47   : > { %v468_v37 = vmul.f32 %v2431_v25, %v2830_v21  ;;  %v469_v38 = vmul.f32 %v2431_v25, %v2833_v22  ;;  %v470_v39 = vmul.f32 %v2431_v25, %v2839_v27  ;;  %v471_v40 = vmul.f32 %v2431_v25, %v2842_v28 }
  0x48   : > { %v472_v41 = vmul.f32 %v2431_v25, %v2845_v29  ;;  %v473_v42 = vmul.f32 %v2431_v25, %v2851_v34  ;;  %v474_v43 = vmul.f32 %v2431_v25, %v2858_v51  ;;  %v475_v44 = vmul.f32 %v2431_v25, %v2861_v52 }
  0x49   : > { %v476_v45 = vmul.f32 %v2431_v25, %v2895_v26  ;;  %v477_v7 = vmul.f32 %v2431_v25, %v2898_v33  ;;  %v478_v21 = vmul.f32 %v2431_v25, %v2920_v6  ;;  %v479_v22 = vmul.f32 %v2431_v25, %v2923_v9 }
  0x4a   : > { %v480_v8 = vmul.f32 %v2431_v25, %v2945_v50  ;;  %v481_v46 = vmul.f32 %v2431_v25, %v2948_v53  ;;  %v482_v47 = vmul.f32 %v2431_v25, %v269_v19  ;;  %v483_v48 = vmul.f32 %v2431_v25, %v270_v36 }
  0x4b   : > { %v484_v49 = vadd.f32 %v468_v37, %v446_v5  ;;  %v485_v54 = vadd.f32 %v469_v38, %v447_v10  ;;  %v486_v55 = vadd.f32 %v470_v39, %v448_v11  ;;  %v487_v56 = vadd.f32 %v471_v40, %v449_v16  ;;  %v271_v5 = vld [vmem:[%s2801_s28 + $0x138] sm:$0xff]  ;;  %v272_v10 = vld [vmem:[%s2801_s28 + $0x140] sm:$0xff]  ;;  %v3016_v39 = vld [vmem:[%s2801_s28 + $0x49] sm:$0xff] }
  0x4c   : > { %v488_v57 = vadd.f32 %v472_v41, %v450_v17  ;;  %v489_v58 = vadd.f32 %v473_v42, %v451_v18  ;;  %v490_v59 = vadd.f32 %v474_v43, %v452_v23  ;;  %v491_v60 = vadd.f32 %v475_v44, %v453_v24  ;;  %v3010_v37 = vld [vmem:[%s2801_s28 + $0x31] sm:$0xff]  ;;  %v3013_v38 = vld [vmem:[%s2801_s28 + $0x39] sm:$0xff] }
  0x4d   : > { %v492_v62 = vadd.f32 %v476_v45, %v454_v30  ;;  %v493_v63 = vadd.f32 %v477_v7, %v455_v31  ;;  %v494_v15 = vadd.f32 %v478_v21, %v456_v13  ;;  %v495_v20 = vadd.f32 %v479_v22, %v457_v14  ;;  %v3019_v44 = vld [vmem:[%s2801_s28 + $0x51] sm:$0xff]  ;;  %v3022_v45 = vld [vmem:[%s2801_s28 + $0x61] sm:$0xff]  ;;  %v3025_v7 = vld [vmem:[%s2801_s28 + $0x69] sm:$0xff] }
  0x4e   : > { %v496_v0 = vadd.f32 %v480_v8, %v458_v32  ;;  %v497_v2 = vadd.f32 %v481_v46, %v459_v35  ;;  %v498_v3 = vadd.f32 %v482_v47, %v460_v1  ;;  %v499_v4 = vadd.f32 %v483_v48, %v461_v12  ;;  %v541_v35 = vld [vmem:[%s2801_s28 + $0x21] sm:$0xff]  ;;  %v3028_v47 = vld [vmem:[%s2801_s28 + $0x79] sm:$0xff] }
  0x4f   : > { %v506_v11 = vmul.f32 %v2433_v61, %v2839_v27  ;;  %v507_v16 = vmul.f32 %v2433_v61, %v2842_v28  ;;  %v508_v17 = vmul.f32 %v2433_v61, %v2845_v29  ;;  %v509_v18 = vmul.f32 %v2433_v61, %v2851_v34  ;;  %v3031_v48 = vld [vmem:[%s2801_s28 + $0x81] sm:$0xff] }
  0x50   : > { %v510_v23 = vmul.f32 %v2433_v61, %v2858_v51  ;;  %v511_v24 = vmul.f32 %v2433_v61, %v2861_v52  ;;  %v512_v25 = vmul.f32 %v2433_v61, %v2895_v26  ;;  %v513_v30 = vmul.f32 %v2433_v61, %v2898_v33  ;;  %v538_v26 = vld [vmem:[%s2801_s28 + $0x1] sm:$0xff] }
  0x51   : > { %v514_v31 = vmul.f32 %v2433_v61, %v2920_v6  ;;  %v515_v27 = vmul.f32 %v2433_v61, %v2923_v9  ;;  %v516_v28 = vmul.f32 %v2433_v61, %v2945_v50  ;;  %v517_v29 = vmul.f32 %v2433_v61, %v2948_v53  ;;  %v2434_v33 = vld [vmem:[%s4228_s1 + $0x1] ss:$0 sm:$0xff]  ;;  %v539_v50 = vld [vmem:[%s2801_s28 + $0x9] sm:$0xff]  ;;  %v540_v53 = vld [vmem:[%s2801_s28 + $0x19] sm:$0xff] }
  0x52   : > { %v518_v34 = vmul.f32 %v2433_v61, %v269_v19  ;;  %v519_v13 = vmul.f32 %v2433_v61, %v270_v36  ;;  %v520_v51 = vmul.f32 %v2433_v61, %v271_v5  ;;  %v521_v52 = vmul.f32 %v2433_v61, %v272_v10 }
  0x53   : > { %v522_v6 = vadd.f32 %v506_v11, %v484_v49  ;;  %v523_v14 = vadd.f32 %v507_v16, %v485_v54  ;;  %v524_v32 = vadd.f32 %v508_v17, %v486_v55  ;;  %v525_v9 = vadd.f32 %v509_v18, %v487_v56  ;;  %v3034_v49 = vld [vmem:[%s2801_s28 + $0x91] sm:$0xff]  ;;  %v3037_v54 = vld [vmem:[%s2801_s28 + $0x99] sm:$0xff]  ;;  %v3040_v55 = vld [vmem:[%s2801_s28 + $0xa9] sm:$0xff] }
  0x54   : > { %v526_v1 = vadd.f32 %v510_v23, %v488_v57  ;;  %v527_v12 = vadd.f32 %v511_v24, %v489_v58  ;;  %v528_v19 = vadd.f32 %v512_v25, %v490_v59  ;;  %v529_v36 = vadd.f32 %v513_v30, %v491_v60  ;;  %v3043_v56 = vld [vmem:[%s2801_s28 + $0xb1] sm:$0xff] }
  0x55   : > { %v530_v40 = vadd.f32 %v514_v31, %v492_v62  ;;  %v531_v41 = vadd.f32 %v515_v27, %v493_v63  ;;  %v532_v42 = vadd.f32 %v516_v28, %v494_v15  ;;  %v533_v43 = vadd.f32 %v517_v29, %v495_v20  ;;  %v2436_v27 = vld [vmem:[%s4228_s1 + $0x9] ss:$0 sm:$0xff] }
  0x56   : > { %v534_v21 = vadd.f32 %v518_v34, %v496_v0  ;;  %v535_v22 = vadd.f32 %v519_v13, %v497_v2  ;;  %v536_v8 = vadd.f32 %v520_v51, %v498_v3  ;;  %v537_v46 = vadd.f32 %v521_v52, %v499_v4 }
  0x57   : > { %v571_v57 = vmul.f32 %v2434_v33, %v538_v26  ;;  %v572_v58 = vmul.f32 %v2434_v33, %v539_v50  ;;  %v573_v59 = vmul.f32 %v2434_v33, %v540_v53  ;;  %v574_v60 = vmul.f32 %v2434_v33, %v541_v35 }
  0x58   : > { %v575_v61 = vmul.f32 %v2434_v33, %v3010_v37  ;;  %v576_v62 = vmul.f32 %v2434_v33, %v3013_v38  ;;  %v577_v63 = vmul.f32 %v2434_v33, %v3016_v39  ;;  %v578_v15 = vmul.f32 %v2434_v33, %v3019_v44 }
  0x59   : > { %v579_v20 = vmul.f32 %v2434_v33, %v3022_v45  ;;  %v580_v0 = vmul.f32 %v2434_v33, %v3025_v7  ;;  %v581_v2 = vmul.f32 %v2434_v33, %v3028_v47  ;;  %v582_v3 = vmul.f32 %v2434_v33, %v3031_v48 }
  0x5a   : > { %v583_v4 = vmul.f32 %v2434_v33, %v3034_v49  ;;  %v584_v5 = vmul.f32 %v2434_v33, %v3037_v54  ;;  %v585_v10 = vmul.f32 %v2434_v33, %v3040_v55  ;;  %v586_v11 = vmul.f32 %v2434_v33, %v3043_v56 }
  0x5b   : > { %v587_v16 = vadd.f32 %v571_v57, %v522_v6  ;;  %v588_v17 = vadd.f32 %v572_v58, %v523_v14  ;;  %v589_v18 = vadd.f32 %v573_v59, %v524_v32  ;;  %v590_v23 = vadd.f32 %v574_v60, %v525_v9  ;;  %v3061_v6 = vld [vmem:[%s2801_s28 + $0xc1] sm:$0xff]  ;;  %v3064_v14 = vld [vmem:[%s2801_s28 + $0xc9] sm:$0xff] }
  0x5c   : > { %v591_v24 = vadd.f32 %v575_v61, %v526_v1  ;;  %v592_v25 = vadd.f32 %v576_v62, %v527_v12  ;;  %v593_v30 = vadd.f32 %v577_v63, %v528_v19  ;;  %v594_v31 = vadd.f32 %v578_v15, %v529_v36  ;;  %v2438_v15 = vld [vmem:[%s4228_s1 + $0x11] ss:$0 sm:$0xff] }
  0x5d   : > { %v595_v28 = vadd.f32 %v579_v20, %v530_v40  ;;  %v596_v29 = vadd.f32 %v580_v0, %v531_v41  ;;  %v597_v34 = vadd.f32 %v581_v2, %v532_v42  ;;  %v598_v13 = vadd.f32 %v582_v3, %v533_v43 }
  0x5e   : > { %v599_v51 = vadd.f32 %v583_v4, %v534_v21  ;;  %v600_v52 = vadd.f32 %v584_v5, %v535_v22  ;;  %v601_v26 = vadd.f32 %v585_v10, %v536_v8  ;;  %v602_v33 = vadd.f32 %v586_v11, %v537_v46 }
  0x5f   : > { %v608_v32 = vmul.f32 %v2436_v27, %v540_v53  ;;  %v609_v9 = vmul.f32 %v2436_v27, %v541_v35  ;;  %v610_v50 = vmul.f32 %v2436_v27, %v3010_v37  ;;  %v611_v1 = vmul.f32 %v2436_v27, %v3013_v38 }
  0x60   : > { %v612_v12 = vmul.f32 %v2436_v27, %v3016_v39  ;;  %v613_v19 = vmul.f32 %v2436_v27, %v3019_v44  ;;  %v614_v36 = vmul.f32 %v2436_v27, %v3022_v45  ;;  %v615_v40 = vmul.f32 %v2436_v27, %v3025_v7 }
  0x61   : > { %v616_v41 = vmul.f32 %v2436_v27, %v3028_v47  ;;  %v617_v42 = vmul.f32 %v2436_v27, %v3031_v48  ;;  %v618_v43 = vmul.f32 %v2436_v27, %v3034_v49  ;;  %v619_v53 = vmul.f32 %v2436_v27, %v3037_v54 }
  0x62   : > { %v620_v35 = vmul.f32 %v2436_v27, %v3040_v55  ;;  %v621_v21 = vmul.f32 %v2436_v27, %v3043_v56  ;;  %v622_v22 = vmul.f32 %v2436_v27, %v3061_v6  ;;  %v623_v8 = vmul.f32 %v2436_v27, %v3064_v14 }
  0x63   : > { %v624_v46 = vadd.f32 %v608_v32, %v587_v16  ;;  %v625_v57 = vadd.f32 %v609_v9, %v588_v17  ;;  %v626_v58 = vadd.f32 %v610_v50, %v589_v18  ;;  %v627_v59 = vadd.f32 %v611_v1, %v590_v23  ;;  %v3084_v16 = vld [vmem:[%s2801_s28 + $0xd9] sm:$0xff]  ;;  %v3087_v17 = vld [vmem:[%s2801_s28 + $0xe1] sm:$0xff] }
  0x64   : > { %v628_v60 = vadd.f32 %v612_v12, %v591_v24  ;;  %v629_v61 = vadd.f32 %v613_v19, %v592_v25  ;;  %v630_v62 = vadd.f32 %v614_v36, %v593_v30  ;;  %v631_v63 = vadd.f32 %v615_v40, %v594_v31  ;;  %v2440_v40 = vld [vmem:[%s4228_s1 + $0x19] ss:$0 sm:$0xff] }
  0x65   : > { %v632_v20 = vadd.f32 %v616_v41, %v595_v28  ;;  %v633_v0 = vadd.f32 %v617_v42, %v596_v29  ;;  %v634_v2 = vadd.f32 %v618_v43, %v597_v34  ;;  %v635_v3 = vadd.f32 %v619_v53, %v598_v13 }
  0x66   : > { %v636_v4 = vadd.f32 %v620_v35, %v599_v51  ;;  %v637_v5 = vadd.f32 %v621_v21, %v600_v52  ;;  %v638_v10 = vadd.f32 %v622_v22, %v601_v26  ;;  %v639_v11 = vadd.f32 %v623_v8, %v602_v33 }
  0x67   : > { %v645_v18 = vmul.f32 %v2438_v15, %v3010_v37  ;;  %v646_v23 = vmul.f32 %v2438_v15, %v3013_v38  ;;  %v647_v24 = vmul.f32 %v2438_v15, %v3016_v39  ;;  %v648_v25 = vmul.f32 %v2438_v15, %v3019_v44 }
  0x68   : > { %v649_v30 = vmul.f32 %v2438_v15, %v3022_v45  ;;  %v650_v31 = vmul.f32 %v2438_v15, %v3025_v7  ;;  %v651_v27 = vmul.f32 %v2438_v15, %v3028_v47  ;;  %v652_v28 = vmul.f32 %v2438_v15, %v3031_v48 }
  0x69   : > { %v653_v29 = vmul.f32 %v2438_v15, %v3034_v49  ;;  %v654_v34 = vmul.f32 %v2438_v15, %v3037_v54  ;;  %v655_v37 = vmul.f32 %v2438_v15, %v3040_v55  ;;  %v656_v38 = vmul.f32 %v2438_v15, %v3043_v56 }
  0x6a   : > { %v657_v13 = vmul.f32 %v2438_v15, %v3061_v6  ;;  %v658_v51 = vmul.f32 %v2438_v15, %v3064_v14  ;;  %v659_v52 = vmul.f32 %v2438_v15, %v3084_v16  ;;  %v660_v26 = vmul.f32 %v2438_v15, %v3087_v17 }
  0x6b   : > { %v661_v33 = vadd.f32 %v645_v18, %v624_v46  ;;  %v662_v32 = vadd.f32 %v646_v23, %v625_v57  ;;  %v663_v9 = vadd.f32 %v647_v24, %v626_v58  ;;  %v664_v50 = vadd.f32 %v648_v25, %v627_v59  ;;  %v3109_v46 = vld [vmem:[%s2801_s28 + $0xf1] sm:$0xff]  ;;  %v3112_v57 = vld [vmem:[%s2801_s28 + $0xf9] sm:$0xff] }
  0x6c   : > { %v665_v1 = vadd.f32 %v649_v30, %v628_v60  ;;  %v666_v12 = vadd.f32 %v650_v31, %v629_v61  ;;  %v667_v19 = vadd.f32 %v651_v27, %v630_v62  ;;  %v668_v36 = vadd.f32 %v652_v28, %v631_v63  ;;  %v2442_v28 = vld [vmem:[%s4228_s1 + $0x21] ss:$0 sm:$0xff] }
  0x6d   : > { %v669_v41 = vadd.f32 %v653_v29, %v632_v20  ;;  %v670_v42 = vadd.f32 %v654_v34, %v633_v0  ;;  %v671_v43 = vadd.f32 %v655_v37, %v634_v2  ;;  %v672_v53 = vadd.f32 %v656_v38, %v635_v3 }
  0x6e   : > { %v673_v35 = vadd.f32 %v657_v13, %v636_v4  ;;  %v674_v21 = vadd.f32 %v658_v51, %v637_v5  ;;  %v675_v22 = vadd.f32 %v659_v52, %v638_v10  ;;  %v676_v8 = vadd.f32 %v660_v26, %v639_v11 }
  0x6f   : > { %v682_v58 = vmul.f32 %v2440_v40, %v3016_v39  ;;  %v683_v59 = vmul.f32 %v2440_v40, %v3019_v44  ;;  %v684_v60 = vmul.f32 %v2440_v40, %v3022_v45  ;;  %v685_v61 = vmul.f32 %v2440_v40, %v3025_v7 }
  0x70   : > { %v686_v62 = vmul.f32 %v2440_v40, %v3028_v47  ;;  %v687_v63 = vmul.f32 %v2440_v40, %v3031_v48  ;;  %v688_v15 = vmul.f32 %v2440_v40, %v3034_v49  ;;  %v689_v20 = vmul.f32 %v2440_v40, %v3037_v54 }
  0x71   : > { %v690_v0 = vmul.f32 %v2440_v40, %v3040_v55  ;;  %v691_v2 = vmul.f32 %v2440_v40, %v3043_v56  ;;  %v692_v39 = vmul.f32 %v2440_v40, %v3061_v6  ;;  %v693_v44 = vmul.f32 %v2440_v40, %v3064_v14 }
  0x72   : > { %v694_v3 = vmul.f32 %v2440_v40, %v3084_v16  ;;  %v695_v4 = vmul.f32 %v2440_v40, %v3087_v17  ;;  %v696_v5 = vmul.f32 %v2440_v40, %v3109_v46  ;;  %v697_v10 = vmul.f32 %v2440_v40, %v3112_v57 }
  0x73   : > { %v698_v11 = vadd.f32 %v682_v58, %v661_v33  ;;  %v699_v18 = vadd.f32 %v683_v59, %v662_v32  ;;  %v700_v23 = vadd.f32 %v684_v60, %v663_v9  ;;  %v701_v24 = vadd.f32 %v685_v61, %v664_v50  ;;  %v3134_v33 = vld [vmem:[%s2801_s28 + $0x109] sm:$0xff]  ;;  %v3137_v32 = vld [vmem:[%s2801_s28 + $0x111] sm:$0xff] }
  0x74   : > { %v702_v25 = vadd.f32 %v686_v62, %v665_v1  ;;  %v703_v30 = vadd.f32 %v687_v63, %v666_v12  ;;  %v704_v31 = vadd.f32 %v688_v15, %v667_v19  ;;  %v705_v27 = vadd.f32 %v689_v20, %v668_v36  ;;  %v2444_v20 = vld [vmem:[%s4228_s1 + $0x29] ss:$0 sm:$0xff] }
  0x75   : > { %v706_v29 = vadd.f32 %v690_v0, %v669_v41  ;;  %v707_v34 = vadd.f32 %v691_v2, %v670_v42  ;;  %v708_v37 = vadd.f32 %v692_v39, %v671_v43  ;;  %v709_v38 = vadd.f32 %v693_v44, %v672_v53 }
  0x76   : > { %v710_v13 = vadd.f32 %v694_v3, %v673_v35  ;;  %v711_v51 = vadd.f32 %v695_v4, %v674_v21  ;;  %v712_v52 = vadd.f32 %v696_v5, %v675_v22  ;;  %v713_v26 = vadd.f32 %v697_v10, %v676_v8 }
  0x77   : > { %v719_v9 = vmul.f32 %v2442_v28, %v3022_v45  ;;  %v720_v50 = vmul.f32 %v2442_v28, %v3025_v7  ;;  %v721_v1 = vmul.f32 %v2442_v28, %v3028_v47  ;;  %v722_v12 = vmul.f32 %v2442_v28, %v3031_v48 }
  0x78   : > { %v723_v19 = vmul.f32 %v2442_v28, %v3034_v49  ;;  %v724_v36 = vmul.f32 %v2442_v28, %v3037_v54  ;;  %v725_v40 = vmul.f32 %v2442_v28, %v3040_v55  ;;  %v726_v41 = vmul.f32 %v2442_v28, %v3043_v56 }
  0x79   : > { %v727_v42 = vmul.f32 %v2442_v28, %v3061_v6  ;;  %v728_v43 = vmul.f32 %v2442_v28, %v3064_v14  ;;  %v729_v45 = vmul.f32 %v2442_v28, %v3084_v16  ;;  %v730_v7 = vmul.f32 %v2442_v28, %v3087_v17 }
  0x7a   : > { %v731_v53 = vmul.f32 %v2442_v28, %v3109_v46  ;;  %v732_v35 = vmul.f32 %v2442_v28, %v3112_v57  ;;  %v733_v21 = vmul.f32 %v2442_v28, %v3134_v33  ;;  %v734_v22 = vmul.f32 %v2442_v28, %v3137_v32 }
  0x7b   : > { %v735_v8 = vadd.f32 %v719_v9, %v698_v11  ;;  %v736_v58 = vadd.f32 %v720_v50, %v699_v18  ;;  %v737_v59 = vadd.f32 %v721_v1, %v700_v23  ;;  %v738_v60 = vadd.f32 %v722_v12, %v701_v24  ;;  %v562_v11 = vld [vmem:[%s2801_s28 + $0x121] sm:$0xff]  ;;  %v563_v18 = vld [vmem:[%s2801_s28 + $0x129] sm:$0xff] }
  0x7c   : > { %v739_v61 = vadd.f32 %v723_v19, %v702_v25  ;;  %v740_v62 = vadd.f32 %v724_v36, %v703_v30  ;;  %v741_v63 = vadd.f32 %v725_v40, %v704_v31  ;;  %v742_v15 = vadd.f32 %v726_v41, %v705_v27  ;;  %v2446_v41 = vld [vmem:[%s4228_s1 + $0x31] ss:$0 sm:$0xff] }
  0x7d   : > { %v743_v0 = vadd.f32 %v727_v42, %v706_v29  ;;  %v744_v2 = vadd.f32 %v728_v43, %v707_v34  ;;  %v745_v39 = vadd.f32 %v729_v45, %v708_v37  ;;  %v746_v44 = vadd.f32 %v730_v7, %v709_v38 }
  0x7e   : > { %v747_v3 = vadd.f32 %v731_v53, %v710_v13  ;;  %v748_v4 = vadd.f32 %v732_v35, %v711_v51  ;;  %v749_v5 = vadd.f32 %v733_v21, %v712_v52  ;;  %v750_v10 = vadd.f32 %v734_v22, %v713_v26 }
  0x7f   : > { %v756_v23 = vmul.f32 %v2444_v20, %v3028_v47  ;;  %v757_v24 = vmul.f32 %v2444_v20, %v3031_v48  ;;  %v758_v25 = vmul.f32 %v2444_v20, %v3034_v49  ;;  %v759_v30 = vmul.f32 %v2444_v20, %v3037_v54 }
  0x80   : > { %v760_v31 = vmul.f32 %v2444_v20, %v3040_v55  ;;  %v761_v27 = vmul.f32 %v2444_v20, %v3043_v56  ;;  %v762_v28 = vmul.f32 %v2444_v20, %v3061_v6  ;;  %v763_v29 = vmul.f32 %v2444_v20, %v3064_v14 }
  0x81   : > { %v764_v34 = vmul.f32 %v2444_v20, %v3084_v16  ;;  %v765_v37 = vmul.f32 %v2444_v20, %v3087_v17  ;;  %v766_v47 = vmul.f32 %v2444_v20, %v3109_v46  ;;  %v767_v48 = vmul.f32 %v2444_v20, %v3112_v57 }
  0x82   : > { %v768_v38 = vmul.f32 %v2444_v20, %v3134_v33  ;;  %v769_v13 = vmul.f32 %v2444_v20, %v3137_v32  ;;  %v770_v51 = vmul.f32 %v2444_v20, %v562_v11  ;;  %v771_v52 = vmul.f32 %v2444_v20, %v563_v18 }
  0x83   : > { %v772_v26 = vadd.f32 %v756_v23, %v735_v8  ;;  %v773_v9 = vadd.f32 %v757_v24, %v736_v58  ;;  %v774_v50 = vadd.f32 %v758_v25, %v737_v59  ;;  %v775_v1 = vadd.f32 %v759_v30, %v738_v60  ;;  %v564_v8 = vld [vmem:[%s2801_s28 + $0x139] sm:$0xff]  ;;  %v565_v58 = vld [vmem:[%s2801_s28 + $0x141] sm:$0xff]  ;;  %v3205_v25 = vld [vmem:[%s2801_s28 + $0x4a] sm:$0xff] }
  0x84   : > { %v776_v12 = vadd.f32 %v760_v31, %v739_v61  ;;  %v777_v19 = vadd.f32 %v761_v27, %v740_v62  ;;  %v778_v36 = vadd.f32 %v762_v28, %v741_v63  ;;  %v779_v40 = vadd.f32 %v763_v29, %v742_v15  ;;  %v3199_v23 = vld [vmem:[%s2801_s28 + $0x32] sm:$0xff]  ;;  %v3202_v24 = vld [vmem:[%s2801_s28 + $0x3a] sm:$0xff] }
  0x85   : > { %v780_v42 = vadd.f32 %v764_v34, %v743_v0  ;;  %v781_v43 = vadd.f32 %v765_v37, %v744_v2  ;;  %v782_v45 = vadd.f32 %v766_v47, %v745_v39  ;;  %v783_v7 = vadd.f32 %v767_v48, %v746_v44  ;;  %v3208_v29 = vld [vmem:[%s2801_s28 + $0x52] sm:$0xff]  ;;  %v3211_v34 = vld [vmem:[%s2801_s28 + $0x62] sm:$0xff]  ;;  %v3214_v37 = vld [vmem:[%s2801_s28 + $0x6a] sm:$0xff] }
  0x86   : > { %v784_v53 = vadd.f32 %v768_v38, %v747_v3  ;;  %v785_v35 = vadd.f32 %v769_v13, %v748_v4  ;;  %v786_v21 = vadd.f32 %v770_v51, %v749_v5  ;;  %v787_v22 = vadd.f32 %v771_v52, %v750_v10  ;;  %v828_v4 = vld [vmem:[%s2801_s28 + $0x22] sm:$0xff]  ;;  %v3217_v51 = vld [vmem:[%s2801_s28 + $0x7a] sm:$0xff] }
  0x87   : > { %v793_v59 = vmul.f32 %v2446_v41, %v3034_v49  ;;  %v794_v60 = vmul.f32 %v2446_v41, %v3037_v54  ;;  %v795_v61 = vmul.f32 %v2446_v41, %v3040_v55  ;;  %v796_v62 = vmul.f32 %v2446_v41, %v3043_v56  ;;  %v3220_v52 = vld [vmem:[%s2801_s28 + $0x82] sm:$0xff] }
  0x88   : > { %v797_v63 = vmul.f32 %v2446_v41, %v3061_v6  ;;  %v798_v15 = vmul.f32 %v2446_v41, %v3064_v14  ;;  %v799_v20 = vmul.f32 %v2446_v41, %v3084_v16  ;;  %v800_v0 = vmul.f32 %v2446_v41, %v3087_v17  ;;  %v825_v16 = vld [vmem:[%s2801_s28 + $0x2] sm:$0xff] }
  0x89   : > { %v801_v2 = vmul.f32 %v2446_v41, %v3109_v46  ;;  %v802_v49 = vmul.f32 %v2446_v41, %v3112_v57  ;;  %v803_v54 = vmul.f32 %v2446_v41, %v3134_v33  ;;  %v804_v55 = vmul.f32 %v2446_v41, %v3137_v32  ;;  %v2447_v17 = vld [vmem:[%s4228_s1 + $0x2] ss:$0 sm:$0xff]  ;;  %v826_v33 = vld [vmem:[%s2801_s28 + $0xa] sm:$0xff]  ;;  %v827_v32 = vld [vmem:[%s2801_s28 + $0x1a] sm:$0xff] }
  0x8a   : > { %v805_v56 = vmul.f32 %v2446_v41, %v562_v11  ;;  %v806_v39 = vmul.f32 %v2446_v41, %v563_v18  ;;  %v807_v6 = vmul.f32 %v2446_v41, %v564_v8  ;;  %v808_v14 = vmul.f32 %v2446_v41, %v565_v58 }
  0x8b   : > { %v809_v46 = vadd.f32 %v793_v59, %v772_v26  ;;  %v810_v44 = vadd.f32 %v794_v60, %v773_v9  ;;  %v811_v3 = vadd.f32 %v795_v61, %v774_v50  ;;  %v812_v57 = vadd.f32 %v796_v62, %v775_v1  ;;  %v3223_v26 = vld [vmem:[%s2801_s28 + $0x92] sm:$0xff]  ;;  %v3226_v9 = vld [vmem:[%s2801_s28 + $0x9a] sm:$0xff]  ;;  %v3229_v50 = vld [vmem:[%s2801_s28 + $0xaa] sm:$0xff] }
  0x8c   : > { %v813_v5 = vadd.f32 %v797_v63, %v776_v12  ;;  %v814_v10 = vadd.f32 %v798_v15, %v777_v19  ;;  %v815_v11 = vadd.f32 %v799_v20, %v778_v36  ;;  %v816_v18 = vadd.f32 %v800_v0, %v779_v40  ;;  %v3232_v1 = vld [vmem:[%s2801_s28 + $0xb2] sm:$0xff] }
  0x8d   : > { %v817_v30 = vadd.f32 %v801_v2, %v780_v42  ;;  %v818_v31 = vadd.f32 %v802_v49, %v781_v43  ;;  %v819_v27 = vadd.f32 %v803_v54, %v782_v45  ;;  %v820_v28 = vadd.f32 %v804_v55, %v783_v7  ;;  %v2449_v49 = vld [vmem:[%s4228_s1 + $0xa] ss:$0 sm:$0xff] }
  0x8e   : > { %v821_v47 = vadd.f32 %v805_v56, %v784_v53  ;;  %v822_v48 = vadd.f32 %v806_v39, %v785_v35  ;;  %v823_v38 = vadd.f32 %v807_v6, %v786_v21  ;;  %v824_v13 = vadd.f32 %v808_v14, %v787_v22 }
  0x8f   : > { %v858_v12 = vmul.f32 %v2447_v17, %v825_v16  ;;  %v859_v19 = vmul.f32 %v2447_v17, %v826_v33  ;;  %v860_v36 = vmul.f32 %v2447_v17, %v827_v32  ;;  %v861_v40 = vmul.f32 %v2447_v17, %v828_v4 }
  0x90   : > { %v862_v41 = vmul.f32 %v2447_v17, %v3199_v23  ;;  %v863_v42 = vmul.f32 %v2447_v17, %v3202_v24  ;;  %v864_v43 = vmul.f32 %v2447_v17, %v3205_v25  ;;  %v865_v45 = vmul.f32 %v2447_v17, %v3208_v29 }
  0x91   : > { %v866_v7 = vmul.f32 %v2447_v17, %v3211_v34  ;;  %v867_v53 = vmul.f32 %v2447_v17, %v3214_v37  ;;  %v868_v35 = vmul.f32 %v2447_v17, %v3217_v51  ;;  %v869_v21 = vmul.f32 %v2447_v17, %v3220_v52 }
  0x92   : > { %v870_v22 = vmul.f32 %v2447_v17, %v3223_v26  ;;  %v871_v8 = vmul.f32 %v2447_v17, %v3226_v9  ;;  %v872_v58 = vmul.f32 %v2447_v17, %v3229_v50  ;;  %v873_v59 = vmul.f32 %v2447_v17, %v3232_v1 }
  0x93   : > { %v874_v60 = vadd.f32 %v858_v12, %v809_v46  ;;  %v875_v61 = vadd.f32 %v859_v19, %v810_v44  ;;  %v876_v62 = vadd.f32 %v860_v36, %v811_v3  ;;  %v877_v63 = vadd.f32 %v861_v40, %v812_v57  ;;  %v3250_v46 = vld [vmem:[%s2801_s28 + $0xc2] sm:$0xff]  ;;  %v3253_v44 = vld [vmem:[%s2801_s28 + $0xca] sm:$0xff] }
  0x94   : > { %v878_v15 = vadd.f32 %v862_v41, %v813_v5  ;;  %v879_v20 = vadd.f32 %v863_v42, %v814_v10  ;;  %v880_v0 = vadd.f32 %v864_v43, %v815_v11  ;;  %v881_v2 = vadd.f32 %v865_v45, %v816_v18  ;;  %v2451_v45 = vld [vmem:[%s4228_s1 + $0x12] ss:$0 sm:$0xff] }
  0x95   : > { %v882_v54 = vadd.f32 %v866_v7, %v817_v30  ;;  %v883_v55 = vadd.f32 %v867_v53, %v818_v31  ;;  %v884_v56 = vadd.f32 %v868_v35, %v819_v27  ;;  %v885_v39 = vadd.f32 %v869_v21, %v820_v28 }
  0x96   : > { %v886_v6 = vadd.f32 %v870_v22, %v821_v47  ;;  %v887_v14 = vadd.f32 %v871_v8, %v822_v48  ;;  %v888_v16 = vadd.f32 %v872_v58, %v823_v38  ;;  %v889_v17 = vadd.f32 %v873_v59, %v824_v13 }
  0x97   : > { %v895_v3 = vmul.f32 %v2449_v49, %v827_v32  ;;  %v896_v57 = vmul.f32 %v2449_v49, %v828_v4  ;;  %v897_v33 = vmul.f32 %v2449_v49, %v3199_v23  ;;  %v898_v5 = vmul.f32 %v2449_v49, %v3202_v24 }
  0x98   : > { %v899_v10 = vmul.f32 %v2449_v49, %v3205_v25  ;;  %v900_v11 = vmul.f32 %v2449_v49, %v3208_v29  ;;  %v901_v18 = vmul.f32 %v2449_v49, %v3211_v34  ;;  %v902_v30 = vmul.f32 %v2449_v49, %v3214_v37 }
  0x99   : > { %v903_v31 = vmul.f32 %v2449_v49, %v3217_v51  ;;  %v904_v27 = vmul.f32 %v2449_v49, %v3220_v52  ;;  %v905_v28 = vmul.f32 %v2449_v49, %v3223_v26  ;;  %v906_v32 = vmul.f32 %v2449_v49, %v3226_v9 }
  0x9a   : > { %v907_v4 = vmul.f32 %v2449_v49, %v3229_v50  ;;  %v908_v47 = vmul.f32 %v2449_v49, %v3232_v1  ;;  %v909_v48 = vmul.f32 %v2449_v49, %v3250_v46  ;;  %v910_v38 = vmul.f32 %v2449_v49, %v3253_v44 }
  0x9b   : > { %v911_v13 = vadd.f32 %v895_v3, %v874_v60  ;;  %v912_v12 = vadd.f32 %v896_v57, %v875_v61  ;;  %v913_v19 = vadd.f32 %v897_v33, %v876_v62  ;;  %v914_v36 = vadd.f32 %v898_v5, %v877_v63  ;;  %v3273_v60 = vld [vmem:[%s2801_s28 + $0xda] sm:$0xff]  ;;  %v3276_v61 = vld [vmem:[%s2801_s28 + $0xe2] sm:$0xff] }
  0x9c   : > { %v915_v40 = vadd.f32 %v899_v10, %v878_v15  ;;  %v916_v41 = vadd.f32 %v900_v11, %v879_v20  ;;  %v917_v42 = vadd.f32 %v901_v18, %v880_v0  ;;  %v918_v43 = vadd.f32 %v902_v30, %v881_v2  ;;  %v2453_v30 = vld [vmem:[%s4228_s1 + $0x1a] ss:$0 sm:$0xff] }
  0x9d   : > { %v919_v7 = vadd.f32 %v903_v31, %v882_v54  ;;  %v920_v53 = vadd.f32 %v904_v27, %v883_v55  ;;  %v921_v35 = vadd.f32 %v905_v28, %v884_v56  ;;  %v922_v21 = vadd.f32 %v906_v32, %v885_v39 }
  0x9e   : > { %v923_v22 = vadd.f32 %v907_v4, %v886_v6  ;;  %v924_v8 = vadd.f32 %v908_v47, %v887_v14  ;;  %v925_v58 = vadd.f32 %v909_v48, %v888_v16  ;;  %v926_v59 = vadd.f32 %v910_v38, %v889_v17 }
  0x9f   : > { %v932_v62 = vmul.f32 %v2451_v45, %v3199_v23  ;;  %v933_v63 = vmul.f32 %v2451_v45, %v3202_v24  ;;  %v934_v15 = vmul.f32 %v2451_v45, %v3205_v25  ;;  %v935_v20 = vmul.f32 %v2451_v45, %v3208_v29 }
  0xa0   : > { %v936_v0 = vmul.f32 %v2451_v45, %v3211_v34  ;;  %v937_v2 = vmul.f32 %v2451_v45, %v3214_v37  ;;  %v938_v49 = vmul.f32 %v2451_v45, %v3217_v51  ;;  %v939_v54 = vmul.f32 %v2451_v45, %v3220_v52 }
  0xa1   : > { %v940_v55 = vmul.f32 %v2451_v45, %v3223_v26  ;;  %v941_v56 = vmul.f32 %v2451_v45, %v3226_v9  ;;  %v942_v23 = vmul.f32 %v2451_v45, %v3229_v50  ;;  %v943_v24 = vmul.f32 %v2451_v45, %v3232_v1 }
  0xa2   : > { %v944_v39 = vmul.f32 %v2451_v45, %v3250_v46  ;;  %v945_v6 = vmul.f32 %v2451_v45, %v3253_v44  ;;  %v946_v14 = vmul.f32 %v2451_v45, %v3273_v60  ;;  %v947_v16 = vmul.f32 %v2451_v45, %v3276_v61 }
  0xa3   : > { %v948_v17 = vadd.f32 %v932_v62, %v911_v13  ;;  %v949_v3 = vadd.f32 %v933_v63, %v912_v12  ;;  %v950_v57 = vadd.f32 %v934_v15, %v913_v19  ;;  %v951_v33 = vadd.f32 %v935_v20, %v914_v36  ;;  %v3298_v13 = vld [vmem:[%s2801_s28 + $0xf2] sm:$0xff]  ;;  %v3301_v12 = vld [vmem:[%s2801_s28 + $0xfa] sm:$0xff] }
  0xa4   : > { %v952_v5 = vadd.f32 %v936_v0, %v915_v40  ;;  %v953_v10 = vadd.f32 %v937_v2, %v916_v41  ;;  %v954_v11 = vadd.f32 %v938_v49, %v917_v42  ;;  %v955_v18 = vadd.f32 %v939_v54, %v918_v43  ;;  %v2455_v54 = vld [vmem:[%s4228_s1 + $0x22] ss:$0 sm:$0xff] }
  0xa5   : > { %v956_v31 = vadd.f32 %v940_v55, %v919_v7  ;;  %v957_v27 = vadd.f32 %v941_v56, %v920_v53  ;;  %v958_v28 = vadd.f32 %v942_v23, %v921_v35  ;;  %v959_v32 = vadd.f32 %v943_v24, %v922_v21 }
  0xa6   : > { %v960_v4 = vadd.f32 %v944_v39, %v923_v22  ;;  %v961_v47 = vadd.f32 %v945_v6, %v924_v8  ;;  %v962_v48 = vadd.f32 %v946_v14, %v925_v58  ;;  %v963_v38 = vadd.f32 %v947_v16, %v926_v59 }
  0xa7   : > { %v969_v19 = vmul.f32 %v2453_v30, %v3205_v25  ;;  %v970_v36 = vmul.f32 %v2453_v30, %v3208_v29  ;;  %v971_v40 = vmul.f32 %v2453_v30, %v3211_v34  ;;  %v972_v41 = vmul.f32 %v2453_v30, %v3214_v37 }
  0xa8   : > { %v973_v42 = vmul.f32 %v2453_v30, %v3217_v51  ;;  %v974_v43 = vmul.f32 %v2453_v30, %v3220_v52  ;;  %v975_v45 = vmul.f32 %v2453_v30, %v3223_v26  ;;  %v976_v7 = vmul.f32 %v2453_v30, %v3226_v9 }
  0xa9   : > { %v977_v53 = vmul.f32 %v2453_v30, %v3229_v50  ;;  %v978_v35 = vmul.f32 %v2453_v30, %v3232_v1  ;;  %v979_v25 = vmul.f32 %v2453_v30, %v3250_v46  ;;  %v980_v29 = vmul.f32 %v2453_v30, %v3253_v44 }
  0xaa   : > { %v981_v21 = vmul.f32 %v2453_v30, %v3273_v60  ;;  %v982_v22 = vmul.f32 %v2453_v30, %v3276_v61  ;;  %v983_v8 = vmul.f32 %v2453_v30, %v3298_v13  ;;  %v984_v58 = vmul.f32 %v2453_v30, %v3301_v12 }
  0xab   : > { %v985_v59 = vadd.f32 %v969_v19, %v948_v17  ;;  %v986_v62 = vadd.f32 %v970_v36, %v949_v3  ;;  %v987_v63 = vadd.f32 %v971_v40, %v950_v57  ;;  %v988_v15 = vadd.f32 %v972_v41, %v951_v33  ;;  %v3323_v17 = vld [vmem:[%s2801_s28 + $0x10a] sm:$0xff]  ;;  %v3326_v3 = vld [vmem:[%s2801_s28 + $0x112] sm:$0xff] }
  0xac   : > { %v989_v20 = vadd.f32 %v973_v42, %v952_v5  ;;  %v990_v0 = vadd.f32 %v974_v43, %v953_v10  ;;  %v991_v2 = vadd.f32 %v975_v45, %v954_v11  ;;  %v992_v49 = vadd.f32 %v976_v7, %v955_v18  ;;  %v2457_v7 = vld [vmem:[%s4228_s1 + $0x2a] ss:$0 sm:$0xff] }
  0xad   : > { %v993_v55 = vadd.f32 %v977_v53, %v956_v31  ;;  %v994_v56 = vadd.f32 %v978_v35, %v957_v27  ;;  %v995_v23 = vadd.f32 %v979_v25, %v958_v28  ;;  %v996_v24 = vadd.f32 %v980_v29, %v959_v32 }
  0xae   : > { %v997_v39 = vadd.f32 %v981_v21, %v960_v4  ;;  %v998_v6 = vadd.f32 %v982_v22, %v961_v47  ;;  %v999_v14 = vadd.f32 %v983_v8, %v962_v48  ;;  %v1000_v16 = vadd.f32 %v984_v58, %v963_v38 }
  0xaf   : > { %v1006_v57 = vmul.f32 %v2455_v54, %v3211_v34  ;;  %v1007_v33 = vmul.f32 %v2455_v54, %v3214_v37  ;;  %v1008_v5 = vmul.f32 %v2455_v54, %v3217_v51  ;;  %v1009_v10 = vmul.f32 %v2455_v54, %v3220_v52 }
  0xb0   : > { %v1010_v11 = vmul.f32 %v2455_v54, %v3223_v26  ;;  %v1011_v18 = vmul.f32 %v2455_v54, %v3226_v9  ;;  %v1012_v30 = vmul.f32 %v2455_v54, %v3229_v50  ;;  %v1013_v31 = vmul.f32 %v2455_v54, %v3232_v1 }
  0xb1   : > { %v1014_v27 = vmul.f32 %v2455_v54, %v3250_v46  ;;  %v1015_v28 = vmul.f32 %v2455_v54, %v3253_v44  ;;  %v1016_v34 = vmul.f32 %v2455_v54, %v3273_v60  ;;  %v1017_v37 = vmul.f32 %v2455_v54, %v3276_v61 }
  0xb2   : > { %v1018_v32 = vmul.f32 %v2455_v54, %v3298_v13  ;;  %v1019_v4 = vmul.f32 %v2455_v54, %v3301_v12  ;;  %v1020_v47 = vmul.f32 %v2455_v54, %v3323_v17  ;;  %v1021_v48 = vmul.f32 %v2455_v54, %v3326_v3 }
  0xb3   : > { %v1022_v38 = vadd.f32 %v1006_v57, %v985_v59  ;;  %v1023_v19 = vadd.f32 %v1007_v33, %v986_v62  ;;  %v1024_v36 = vadd.f32 %v1008_v5, %v987_v63  ;;  %v1025_v40 = vadd.f32 %v1009_v10, %v988_v15  ;;  %v849_v59 = vld [vmem:[%s2801_s28 + $0x122] sm:$0xff]  ;;  %v850_v62 = vld [vmem:[%s2801_s28 + $0x12a] sm:$0xff] }
  0xb4   : > { %v1026_v41 = vadd.f32 %v1010_v11, %v989_v20  ;;  %v1027_v42 = vadd.f32 %v1011_v18, %v990_v0  ;;  %v1028_v43 = vadd.f32 %v1012_v30, %v991_v2  ;;  %v1029_v45 = vadd.f32 %v1013_v31, %v992_v49  ;;  %v2459_v31 = vld [vmem:[%s4228_s1 + $0x32] ss:$0 sm:$0xff] }
  0xb5   : > { %v1030_v53 = vadd.f32 %v1014_v27, %v993_v55  ;;  %v1031_v35 = vadd.f32 %v1015_v28, %v994_v56  ;;  %v1032_v25 = vadd.f32 %v1016_v34, %v995_v23  ;;  %v1033_v29 = vadd.f32 %v1017_v37, %v996_v24 }
  0xb6   : > { %v1034_v21 = vadd.f32 %v1018_v32, %v997_v39  ;;  %v1035_v22 = vadd.f32 %v1019_v4, %v998_v6  ;;  %v1036_v8 = vadd.f32 %v1020_v47, %v999_v14  ;;  %v1037_v58 = vadd.f32 %v1021_v48, %v1000_v16 }
  0xb7   : > { %v1043_v63 = vmul.f32 %v2457_v7, %v3217_v51  ;;  %v1044_v15 = vmul.f32 %v2457_v7, %v3220_v52  ;;  %v1045_v20 = vmul.f32 %v2457_v7, %v3223_v26  ;;  %v1046_v0 = vmul.f32 %v2457_v7, %v3226_v9 }
  0xb8   : > { %v1047_v2 = vmul.f32 %v2457_v7, %v3229_v50  ;;  %v1048_v49 = vmul.f32 %v2457_v7, %v3232_v1  ;;  %v1049_v54 = vmul.f32 %v2457_v7, %v3250_v46  ;;  %v1050_v55 = vmul.f32 %v2457_v7, %v3253_v44 }
  0xb9   : > { %v1051_v56 = vmul.f32 %v2457_v7, %v3273_v60  ;;  %v1052_v23 = vmul.f32 %v2457_v7, %v3276_v61  ;;  %v1053_v51 = vmul.f32 %v2457_v7, %v3298_v13  ;;  %v1054_v52 = vmul.f32 %v2457_v7, %v3301_v12 }
  0xba   : > { %v1055_v24 = vmul.f32 %v2457_v7, %v3323_v17  ;;  %v1056_v39 = vmul.f32 %v2457_v7, %v3326_v3  ;;  %v1057_v6 = vmul.f32 %v2457_v7, %v849_v59  ;;  %v1058_v14 = vmul.f32 %v2457_v7, %v850_v62 }
  0xbb   : > { %v1059_v16 = vadd.f32 %v1043_v63, %v1022_v38  ;;  %v1060_v57 = vadd.f32 %v1044_v15, %v1023_v19  ;;  %v1061_v33 = vadd.f32 %v1045_v20, %v1024_v36  ;;  %v1062_v5 = vadd.f32 %v1046_v0, %v1025_v40  ;;  %v851_v38 = vld [vmem:[%s2801_s28 + $0x13a] sm:$0xff]  ;;  %v852_v19 = vld [vmem:[%s2801_s28 + $0x142] sm:$0xff]  ;;  %v3391_v15 = vld [vmem:[%s2801_s28 + $0x4b] sm:$0xff] }
  0xbc   : > { %v1063_v10 = vadd.f32 %v1047_v2, %v1026_v41  ;;  %v1064_v11 = vadd.f32 %v1048_v49, %v1027_v42  ;;  %v1065_v18 = vadd.f32 %v1049_v54, %v1028_v43  ;;  %v1066_v30 = vadd.f32 %v1050_v55, %v1029_v45  ;;  %v3388_v63 = vld [vmem:[%s2801_s28 + $0x3b] sm:$0xff]  ;;  %v2460_v20 = vld [vmem:[%s4228_s1 + $0x3] ss:$0 sm:$0xff]  ;;  %v3397_v55 = vld [vmem:[%s2801_s28 + $0x53] sm:$0xff] }
  0xbd   : > { %v1067_v27 = vadd.f32 %v1051_v56, %v1030_v53  ;;  %v1068_v28 = vadd.f32 %v1052_v23, %v1031_v35  ;;  %v1069_v34 = vadd.f32 %v1053_v51, %v1032_v25  ;;  %v1070_v37 = vadd.f32 %v1054_v52, %v1033_v29  ;;  %v1113_v29 = vld [vmem:[%s2801_s28 + $0xb] sm:$0xff]  ;;  %v3400_v56 = vld [vmem:[%s2801_s28 + $0x63] sm:$0xff] }
  0xbe   : > { %v1071_v32 = vadd.f32 %v1055_v24, %v1034_v21  ;;  %v1072_v4 = vadd.f32 %v1056_v39, %v1035_v22  ;;  %v1073_v47 = vadd.f32 %v1057_v6, %v1036_v8  ;;  %v1074_v48 = vadd.f32 %v1058_v14, %v1037_v58  ;;  %v1114_v8 = vld [vmem:[%s2801_s28 + $0x1b] sm:$0xff]  ;;  %v3403_v23 = vld [vmem:[%s2801_s28 + $0x6b] sm:$0xff]  ;;  %v3409_v14 = vld [vmem:[%s2801_s28 + $0x83] sm:$0xff] }
  0xbf   : > { %v1080_v36 = vmul.f32 %v2459_v31, %v3223_v26  ;;  %v1081_v40 = vmul.f32 %v2459_v31, %v3226_v9  ;;  %v1082_v41 = vmul.f32 %v2459_v31, %v3229_v50  ;;  %v1083_v42 = vmul.f32 %v2459_v31, %v3232_v1  ;;  %v3406_v6 = vld [vmem:[%s2801_s28 + $0x7b] sm:$0xff] }
  0xc0   : > { %v1084_v43 = vmul.f32 %v2459_v31, %v3250_v46  ;;  %v1085_v45 = vmul.f32 %v2459_v31, %v3253_v44  ;;  %v1086_v7 = vmul.f32 %v2459_v31, %v3273_v60  ;;  %v1087_v53 = vmul.f32 %v2459_v31, %v3276_v61  ;;  %v1112_v60 = vld [vmem:[%s2801_s28 + $0x3] sm:$0xff] }
  0xc1   : > { %v1088_v26 = vmul.f32 %v2459_v31, %v3298_v13  ;;  %v1089_v9 = vmul.f32 %v2459_v31, %v3301_v12  ;;  %v1090_v35 = vmul.f32 %v2459_v31, %v3323_v17  ;;  %v1091_v50 = vmul.f32 %v2459_v31, %v3326_v3  ;;  %v1115_v12 = vld [vmem:[%s2801_s28 + $0x23] sm:$0xff]  ;;  %v3385_v17 = vld [vmem:[%s2801_s28 + $0x33] sm:$0xff] }
  0xc2   : > { %v1092_v1 = vmul.f32 %v2459_v31, %v849_v59  ;;  %v1093_v25 = vmul.f32 %v2459_v31, %v850_v62  ;;  %v1094_v46 = vmul.f32 %v2459_v31, %v851_v38  ;;  %v1095_v44 = vmul.f32 %v2459_v31, %v852_v19 }
  0xc3   : > { %v1096_v21 = vadd.f32 %v1080_v36, %v1059_v16  ;;  %v1097_v61 = vadd.f32 %v1081_v40, %v1060_v57  ;;  %v1098_v22 = vadd.f32 %v1082_v41, %v1061_v33  ;;  %v1099_v13 = vadd.f32 %v1083_v42, %v1062_v5  ;;  %v3412_v16 = vld [vmem:[%s2801_s28 + $0x93] sm:$0xff]  ;;  %v3415_v57 = vld [vmem:[%s2801_s28 + $0x9b] sm:$0xff]  ;;  %v3418_v33 = vld [vmem:[%s2801_s28 + $0xab] sm:$0xff] }
  0xc4   : > { %v1100_v3 = vadd.f32 %v1084_v43, %v1063_v10  ;;  %v1101_v58 = vadd.f32 %v1085_v45, %v1064_v11  ;;  %v1102_v59 = vadd.f32 %v1086_v7, %v1065_v18  ;;  %v1103_v62 = vadd.f32 %v1087_v53, %v1066_v30  ;;  %v3421_v5 = vld [vmem:[%s2801_s28 + $0xb3] sm:$0xff] }
  0xc5   : > { %v1104_v0 = vadd.f32 %v1088_v26, %v1067_v27  ;;  %v1105_v2 = vadd.f32 %v1089_v9, %v1068_v28  ;;  %v1106_v49 = vadd.f32 %v1090_v35, %v1069_v34  ;;  %v1107_v54 = vadd.f32 %v1091_v50, %v1070_v37  ;;  %v2462_v9 = vld [vmem:[%s4228_s1 + $0xb] ss:$0 sm:$0xff] }
  0xc6   : > { %v1108_v51 = vadd.f32 %v1092_v1, %v1071_v32  ;;  %v1109_v52 = vadd.f32 %v1093_v25, %v1072_v4  ;;  %v1110_v24 = vadd.f32 %v1094_v46, %v1073_v47  ;;  %v1111_v39 = vadd.f32 %v1095_v44, %v1074_v48 }
  0xc7   : > { %v1145_v10 = vmul.f32 %v2460_v20, %v1112_v60  ;;  %v1146_v11 = vmul.f32 %v2460_v20, %v1113_v29  ;;  %v1147_v18 = vmul.f32 %v2460_v20, %v1114_v8  ;;  %v1148_v30 = vmul.f32 %v2460_v20, %v1115_v12 }
  0xc8   : > { %v1149_v31 = vmul.f32 %v2460_v20, %v3385_v17  ;;  %v1150_v27 = vmul.f32 %v2460_v20, %v3388_v63  ;;  %v1151_v28 = vmul.f32 %v2460_v20, %v3391_v15  ;;  %v1152_v34 = vmul.f32 %v2460_v20, %v3397_v55 }
  0xc9   : > { %v1153_v37 = vmul.f32 %v2460_v20, %v3400_v56  ;;  %v1154_v32 = vmul.f32 %v2460_v20, %v3403_v23  ;;  %v1155_v4 = vmul.f32 %v2460_v20, %v3406_v6  ;;  %v1156_v47 = vmul.f32 %v2460_v20, %v3409_v14 }
  0xca   : > { %v1157_v48 = vmul.f32 %v2460_v20, %v3412_v16  ;;  %v1158_v38 = vmul.f32 %v2460_v20, %v3415_v57  ;;  %v1159_v19 = vmul.f32 %v2460_v20, %v3418_v33  ;;  %v1160_v36 = vmul.f32 %v2460_v20, %v3421_v5 }
  0xcb   : > { %v1161_v40 = vadd.f32 %v1145_v10, %v1096_v21  ;;  %v1162_v41 = vadd.f32 %v1146_v11, %v1097_v61  ;;  %v1163_v42 = vadd.f32 %v1147_v18, %v1098_v22  ;;  %v1164_v43 = vadd.f32 %v1148_v30, %v1099_v13  ;;  %v3439_v21 = vld [vmem:[%s2801_s28 + $0xc3] sm:$0xff]  ;;  %v3442_v61 = vld [vmem:[%s2801_s28 + $0xcb] sm:$0xff] }
  0xcc   : > { %v1165_v45 = vadd.f32 %v1149_v31, %v1100_v3  ;;  %v1166_v7 = vadd.f32 %v1150_v27, %v1101_v58  ;;  %v1167_v53 = vadd.f32 %v1151_v28, %v1102_v59  ;;  %v1168_v26 = vadd.f32 %v1152_v34, %v1103_v62  ;;  %v2464_v34 = vld [vmem:[%s4228_s1 + $0x13] ss:$0 sm:$0xff] }
  0xcd   : > { %v1169_v35 = vadd.f32 %v1153_v37, %v1104_v0  ;;  %v1170_v50 = vadd.f32 %v1154_v32, %v1105_v2  ;;  %v1171_v1 = vadd.f32 %v1155_v4, %v1106_v49  ;;  %v1172_v25 = vadd.f32 %v1156_v47, %v1107_v54 }
  0xce   : > { %v1173_v46 = vadd.f32 %v1157_v48, %v1108_v51  ;;  %v1174_v44 = vadd.f32 %v1158_v38, %v1109_v52  ;;  %v1175_v60 = vadd.f32 %v1159_v19, %v1110_v24  ;;  %v1176_v29 = vadd.f32 %v1160_v36, %v1111_v39 }
  0xcf   : > { %v1182_v22 = vmul.f32 %v2462_v9, %v1114_v8  ;;  %v1183_v13 = vmul.f32 %v2462_v9, %v1115_v12  ;;  %v1184_v3 = vmul.f32 %v2462_v9, %v3385_v17  ;;  %v1185_v58 = vmul.f32 %v2462_v9, %v3388_v63 }
  0xd0   : > { %v1186_v59 = vmul.f32 %v2462_v9, %v3391_v15  ;;  %v1187_v62 = vmul.f32 %v2462_v9, %v3397_v55  ;;  %v1188_v20 = vmul.f32 %v2462_v9, %v3400_v56  ;;  %v1189_v0 = vmul.f32 %v2462_v9, %v3403_v23 }
  0xd1   : > { %v1190_v2 = vmul.f32 %v2462_v9, %v3406_v6  ;;  %v1191_v49 = vmul.f32 %v2462_v9, %v3409_v14  ;;  %v1192_v54 = vmul.f32 %v2462_v9, %v3412_v16  ;;  %v1193_v8 = vmul.f32 %v2462_v9, %v3415_v57 }
  0xd2   : > { %v1194_v12 = vmul.f32 %v2462_v9, %v3418_v33  ;;  %v1195_v51 = vmul.f32 %v2462_v9, %v3421_v5  ;;  %v1196_v52 = vmul.f32 %v2462_v9, %v3439_v21  ;;  %v1197_v24 = vmul.f32 %v2462_v9, %v3442_v61 }
  0xd3   : > { %v1198_v39 = vadd.f32 %v1182_v22, %v1161_v40  ;;  %v1199_v10 = vadd.f32 %v1183_v13, %v1162_v41  ;;  %v1200_v11 = vadd.f32 %v1184_v3, %v1163_v42  ;;  %v1201_v18 = vadd.f32 %v1185_v58, %v1164_v43  ;;  %v3462_v40 = vld [vmem:[%s2801_s28 + $0xdb] sm:$0xff]  ;;  %v3465_v41 = vld [vmem:[%s2801_s28 + $0xe3] sm:$0xff] }
  0xd4   : > { %v1202_v30 = vadd.f32 %v1186_v59, %v1165_v45  ;;  %v1203_v31 = vadd.f32 %v1187_v62, %v1166_v7  ;;  %v1204_v27 = vadd.f32 %v1188_v20, %v1167_v53  ;;  %v1205_v28 = vadd.f32 %v1189_v0, %v1168_v26  ;;  %v2466_v0 = vld [vmem:[%s4228_s1 + $0x1b] ss:$0 sm:$0xff] }
  0xd5   : > { %v1206_v37 = vadd.f32 %v1190_v2, %v1169_v35  ;;  %v1207_v32 = vadd.f32 %v1191_v49, %v1170_v50  ;;  %v1208_v4 = vadd.f32 %v1192_v54, %v1171_v1  ;;  %v1209_v47 = vadd.f32 %v1193_v8, %v1172_v25 }
  0xd6   : > { %v1210_v48 = vadd.f32 %v1194_v12, %v1173_v46  ;;  %v1211_v38 = vadd.f32 %v1195_v51, %v1174_v44  ;;  %v1212_v19 = vadd.f32 %v1196_v52, %v1175_v60  ;;  %v1213_v36 = vadd.f32 %v1197_v24, %v1176_v29 }
  0xd7   : > { %v1219_v42 = vmul.f32 %v2464_v34, %v3385_v17  ;;  %v1220_v43 = vmul.f32 %v2464_v34, %v3388_v63  ;;  %v1221_v45 = vmul.f32 %v2464_v34, %v3391_v15  ;;  %v1222_v7 = vmul.f32 %v2464_v34, %v3397_v55 }
  0xd8   : > { %v1223_v53 = vmul.f32 %v2464_v34, %v3400_v56  ;;  %v1224_v26 = vmul.f32 %v2464_v34, %v3403_v23  ;;  %v1225_v9 = vmul.f32 %v2464_v34, %v3406_v6  ;;  %v1226_v35 = vmul.f32 %v2464_v34, %v3409_v14 }
  0xd9   : > { %v1227_v50 = vmul.f32 %v2464_v34, %v3412_v16  ;;  %v1228_v1 = vmul.f32 %v2464_v34, %v3415_v57  ;;  %v1229_v17 = vmul.f32 %v2464_v34, %v3418_v33  ;;  %v1230_v63 = vmul.f32 %v2464_v34, %v3421_v5 }
  0xda   : > { %v1231_v25 = vmul.f32 %v2464_v34, %v3439_v21  ;;  %v1232_v46 = vmul.f32 %v2464_v34, %v3442_v61  ;;  %v1233_v44 = vmul.f32 %v2464_v34, %v3462_v40  ;;  %v1234_v60 = vmul.f32 %v2464_v34, %v3465_v41 }
  0xdb   : > { %v1235_v29 = vadd.f32 %v1219_v42, %v1198_v39  ;;  %v1236_v22 = vadd.f32 %v1220_v43, %v1199_v10  ;;  %v1237_v13 = vadd.f32 %v1221_v45, %v1200_v11  ;;  %v1238_v3 = vadd.f32 %v1222_v7, %v1201_v18  ;;  %v3487_v39 = vld [vmem:[%s2801_s28 + $0xf3] sm:$0xff]  ;;  %v3490_v10 = vld [vmem:[%s2801_s28 + $0xfb] sm:$0xff] }
  0xdc   : > { %v1239_v58 = vadd.f32 %v1223_v53, %v1202_v30  ;;  %v1240_v59 = vadd.f32 %v1224_v26, %v1203_v31  ;;  %v1241_v62 = vadd.f32 %v1225_v9, %v1204_v27  ;;  %v1242_v20 = vadd.f32 %v1226_v35, %v1205_v28  ;;  %v2468_v35 = vld [vmem:[%s4228_s1 + $0x23] ss:$0 sm:$0xff] }
  0xdd   : > { %v1243_v2 = vadd.f32 %v1227_v50, %v1206_v37  ;;  %v1244_v49 = vadd.f32 %v1228_v1, %v1207_v32  ;;  %v1245_v54 = vadd.f32 %v1229_v17, %v1208_v4  ;;  %v1246_v8 = vadd.f32 %v1230_v63, %v1209_v47 }
  0xde   : > { %v1247_v12 = vadd.f32 %v1231_v25, %v1210_v48  ;;  %v1248_v51 = vadd.f32 %v1232_v46, %v1211_v38  ;;  %v1249_v52 = vadd.f32 %v1233_v44, %v1212_v19  ;;  %v1250_v24 = vadd.f32 %v1234_v60, %v1213_v36 }
  0xdf   : > { %v1256_v11 = vmul.f32 %v2466_v0, %v3391_v15  ;;  %v1257_v18 = vmul.f32 %v2466_v0, %v3397_v55  ;;  %v1258_v30 = vmul.f32 %v2466_v0, %v3400_v56  ;;  %v1259_v31 = vmul.f32 %v2466_v0, %v3403_v23 }
  0xe0   : > { %v1260_v27 = vmul.f32 %v2466_v0, %v3406_v6  ;;  %v1261_v28 = vmul.f32 %v2466_v0, %v3409_v14  ;;  %v1262_v34 = vmul.f32 %v2466_v0, %v3412_v16  ;;  %v1263_v37 = vmul.f32 %v2466_v0, %v3415_v57 }
  0xe1   : > { %v1264_v32 = vmul.f32 %v2466_v0, %v3418_v33  ;;  %v1265_v4 = vmul.f32 %v2466_v0, %v3421_v5  ;;  %v1266_v15 = vmul.f32 %v2466_v0, %v3439_v21  ;;  %v1267_v55 = vmul.f32 %v2466_v0, %v3442_v61 }
  0xe2   : > { %v1268_v47 = vmul.f32 %v2466_v0, %v3462_v40  ;;  %v1269_v48 = vmul.f32 %v2466_v0, %v3465_v41  ;;  %v1270_v38 = vmul.f32 %v2466_v0, %v3487_v39  ;;  %v1271_v19 = vmul.f32 %v2466_v0, %v3490_v10 }
  0xe3   : > { %v1272_v36 = vadd.f32 %v1256_v11, %v1235_v29  ;;  %v1273_v42 = vadd.f32 %v1257_v18, %v1236_v22  ;;  %v1274_v43 = vadd.f32 %v1258_v30, %v1237_v13  ;;  %v1275_v45 = vadd.f32 %v1259_v31, %v1238_v3  ;;  %v3512_v29 = vld [vmem:[%s2801_s28 + $0x10b] sm:$0xff]  ;;  %v3515_v22 = vld [vmem:[%s2801_s28 + $0x113] sm:$0xff] }
  0xe4   : > { %v1276_v7 = vadd.f32 %v1260_v27, %v1239_v58  ;;  %v1277_v53 = vadd.f32 %v1261_v28, %v1240_v59  ;;  %v1278_v26 = vadd.f32 %v1262_v34, %v1241_v62  ;;  %v1279_v9 = vadd.f32 %v1263_v37, %v1242_v20  ;;  %v2470_v37 = vld [vmem:[%s4228_s1 + $0x2b] ss:$0 sm:$0xff] }
  0xe5   : > { %v1280_v50 = vadd.f32 %v1264_v32, %v1243_v2  ;;  %v1281_v1 = vadd.f32 %v1265_v4, %v1244_v49  ;;  %v1282_v17 = vadd.f32 %v1266_v15, %v1245_v54  ;;  %v1283_v63 = vadd.f32 %v1267_v55, %v1246_v8 }
  0xe6   : > { %v1284_v25 = vadd.f32 %v1268_v47, %v1247_v12  ;;  %v1285_v46 = vadd.f32 %v1269_v48, %v1248_v51  ;;  %v1286_v44 = vadd.f32 %v1270_v38, %v1249_v52  ;;  %v1287_v60 = vadd.f32 %v1271_v19, %v1250_v24 }
  0xe7   : > { %v1293_v13 = vmul.f32 %v2468_v35, %v3400_v56  ;;  %v1294_v3 = vmul.f32 %v2468_v35, %v3403_v23  ;;  %v1295_v58 = vmul.f32 %v2468_v35, %v3406_v6  ;;  %v1296_v59 = vmul.f32 %v2468_v35, %v3409_v14 }
  0xe8   : > { %v1297_v62 = vmul.f32 %v2468_v35, %v3412_v16  ;;  %v1298_v20 = vmul.f32 %v2468_v35, %v3415_v57  ;;  %v1299_v0 = vmul.f32 %v2468_v35, %v3418_v33  ;;  %v1300_v2 = vmul.f32 %v2468_v35, %v3421_v5 }
  0xe9   : > { %v1301_v49 = vmul.f32 %v2468_v35, %v3439_v21  ;;  %v1302_v54 = vmul.f32 %v2468_v35, %v3442_v61  ;;  %v1303_v56 = vmul.f32 %v2468_v35, %v3462_v40  ;;  %v1304_v23 = vmul.f32 %v2468_v35, %v3465_v41 }
  0xea   : > { %v1305_v8 = vmul.f32 %v2468_v35, %v3487_v39  ;;  %v1306_v12 = vmul.f32 %v2468_v35, %v3490_v10  ;;  %v1307_v51 = vmul.f32 %v2468_v35, %v3512_v29  ;;  %v1308_v52 = vmul.f32 %v2468_v35, %v3515_v22 }
  0xeb   : > { %v1309_v24 = vadd.f32 %v1293_v13, %v1272_v36  ;;  %v1310_v11 = vadd.f32 %v1294_v3, %v1273_v42  ;;  %v1311_v18 = vadd.f32 %v1295_v58, %v1274_v43  ;;  %v1312_v30 = vadd.f32 %v1296_v59, %v1275_v45  ;;  %v1136_v36 = vld [vmem:[%s2801_s28 + $0x123] sm:$0xff]  ;;  %v1137_v42 = vld [vmem:[%s2801_s28 + $0x12b] sm:$0xff] }
  0xec   : > { %v1313_v31 = vadd.f32 %v1297_v62, %v1276_v7  ;;  %v1314_v27 = vadd.f32 %v1298_v20, %v1277_v53  ;;  %v1315_v28 = vadd.f32 %v1299_v0, %v1278_v26  ;;  %v1316_v34 = vadd.f32 %v1300_v2, %v1279_v9  ;;  %v2472_v2 = vld [vmem:[%s4228_s1 + $0x33] ss:$0 sm:$0xff] }
  0xed   : > { %v1317_v32 = vadd.f32 %v1301_v49, %v1280_v50  ;;  %v1318_v4 = vadd.f32 %v1302_v54, %v1281_v1  ;;  %v1319_v15 = vadd.f32 %v1303_v56, %v1282_v17  ;;  %v1320_v55 = vadd.f32 %v1304_v23, %v1283_v63 }
  0xee   : > { %v1321_v47 = vadd.f32 %v1305_v8, %v1284_v25  ;;  %v1322_v48 = vadd.f32 %v1306_v12, %v1285_v46  ;;  %v1323_v38 = vadd.f32 %v1307_v51, %v1286_v44  ;;  %v1324_v19 = vadd.f32 %v1308_v52, %v1287_v60 }
  0xef   : > { %v1330_v43 = vmul.f32 %v2470_v37, %v3406_v6  ;;  %v1331_v45 = vmul.f32 %v2470_v37, %v3409_v14  ;;  %v1332_v7 = vmul.f32 %v2470_v37, %v3412_v16  ;;  %v1333_v53 = vmul.f32 %v2470_v37, %v3415_v57 }
  0xf0   : > { %v1334_v26 = vmul.f32 %v2470_v37, %v3418_v33  ;;  %v1335_v9 = vmul.f32 %v2470_v37, %v3421_v5  ;;  %v1336_v35 = vmul.f32 %v2470_v37, %v3439_v21  ;;  %v1337_v50 = vmul.f32 %v2470_v37, %v3442_v61 }
  0xf1   : > { %v1338_v1 = vmul.f32 %v2470_v37, %v3462_v40  ;;  %v1339_v17 = vmul.f32 %v2470_v37, %v3465_v41  ;;  %v1340_v6 = vmul.f32 %v2470_v37, %v3487_v39  ;;  %v1341_v14 = vmul.f32 %v2470_v37, %v3490_v10 }
  0xf2   : > { %v1342_v63 = vmul.f32 %v2470_v37, %v3512_v29  ;;  %v1343_v25 = vmul.f32 %v2470_v37, %v3515_v22  ;;  %v1344_v46 = vmul.f32 %v2470_v37, %v1136_v36  ;;  %v1345_v44 = vmul.f32 %v2470_v37, %v1137_v42 }
  0xf3   : > { %v1346_v60 = vadd.f32 %v1330_v43, %v1309_v24  ;;  %v1347_v13 = vadd.f32 %v1331_v45, %v1310_v11  ;;  %v1348_v3 = vadd.f32 %v1332_v7, %v1311_v18  ;;  %v1349_v58 = vadd.f32 %v1333_v53, %v1312_v30  ;;  %v1138_v24 = vld [vmem:[%s2801_s28 + $0x13b] sm:$0xff]  ;;  %v1139_v11 = vld [vmem:[%s2801_s28 + $0x143] sm:$0xff]  ;;  %v3580_v45 = vld [vmem:[%s2801_s28 + $0x4c] sm:$0xff] }
  0xf4   : > { %v1350_v59 = vadd.f32 %v1334_v26, %v1313_v31  ;;  %v1351_v62 = vadd.f32 %v1335_v9, %v1314_v27  ;;  %v1352_v20 = vadd.f32 %v1336_v35, %v1315_v28  ;;  %v1353_v0 = vadd.f32 %v1337_v50, %v1316_v34  ;;  %v3577_v43 = vld [vmem:[%s2801_s28 + $0x3c] sm:$0xff]  ;;  %v2473_v7 = vld [vmem:[%s4228_s1 + $0x4] ss:$0 sm:$0xff]  ;;  %v3586_v50 = vld [vmem:[%s2801_s28 + $0x54] sm:$0xff] }
  0xf5   : > { %v1354_v49 = vadd.f32 %v1338_v1, %v1317_v32  ;;  %v1355_v54 = vadd.f32 %v1339_v17, %v1318_v4  ;;  %v1356_v56 = vadd.f32 %v1340_v6, %v1319_v15  ;;  %v1357_v23 = vadd.f32 %v1341_v14, %v1320_v55  ;;  %v1400_v55 = vld [vmem:[%s2801_s28 + $0xc] sm:$0xff]  ;;  %v3589_v1 = vld [vmem:[%s2801_s28 + $0x64] sm:$0xff] }
  0xf6   : > { %v1358_v8 = vadd.f32 %v1342_v63, %v1321_v47  ;;  %v1359_v12 = vadd.f32 %v1343_v25, %v1322_v48  ;;  %v1360_v51 = vadd.f32 %v1344_v46, %v1323_v38  ;;  %v1361_v52 = vadd.f32 %v1345_v44, %v1324_v19  ;;  %v1401_v38 = vld [vmem:[%s2801_s28 + $0x1c] sm:$0xff]  ;;  %v3592_v17 = vld [vmem:[%s2801_s28 + $0x6c] sm:$0xff]  ;;  %v3598_v44 = vld [vmem:[%s2801_s28 + $0x84] sm:$0xff] }
  0xf7   : > { %v1367_v18 = vmul.f32 %v2472_v2, %v3412_v16  ;;  %v1368_v30 = vmul.f32 %v2472_v2, %v3415_v57  ;;  %v1369_v31 = vmul.f32 %v2472_v2, %v3418_v33  ;;  %v1370_v27 = vmul.f32 %v2472_v2, %v3421_v5  ;;  %v3595_v46 = vld [vmem:[%s2801_s28 + $0x7c] sm:$0xff] }
  0xf8   : > { %v1371_v28 = vmul.f32 %v2472_v2, %v3439_v21  ;;  %v1372_v34 = vmul.f32 %v2472_v2, %v3442_v61  ;;  %v1373_v37 = vmul.f32 %v2472_v2, %v3462_v40  ;;  %v1374_v32 = vmul.f32 %v2472_v2, %v3465_v41  ;;  %v1399_v40 = vld [vmem:[%s2801_s28 + $0x4] sm:$0xff] }
  0xf9   : > { %v1375_v16 = vmul.f32 %v2472_v2, %v3487_v39  ;;  %v1376_v57 = vmul.f32 %v2472_v2, %v3490_v10  ;;  %v1377_v4 = vmul.f32 %v2472_v2, %v3512_v29  ;;  %v1378_v33 = vmul.f32 %v2472_v2, %v3515_v22  ;;  %v1402_v10 = vld [vmem:[%s2801_s28 + $0x24] sm:$0xff]  ;;  %v3574_v29 = vld [vmem:[%s2801_s28 + $0x34] sm:$0xff] }
  0xfa   : > { %v1379_v5 = vmul.f32 %v2472_v2, %v1136_v36  ;;  %v1380_v15 = vmul.f32 %v2472_v2, %v1137_v42  ;;  %v1381_v21 = vmul.f32 %v2472_v2, %v1138_v24  ;;  %v1382_v61 = vmul.f32 %v2472_v2, %v1139_v11 }
  0xfb   : > { %v1383_v47 = vadd.f32 %v1367_v18, %v1346_v60  ;;  %v1384_v41 = vadd.f32 %v1368_v30, %v1347_v13  ;;  %v1385_v48 = vadd.f32 %v1369_v31, %v1348_v3  ;;  %v1386_v39 = vadd.f32 %v1370_v27, %v1349_v58  ;;  %v3601_v60 = vld [vmem:[%s2801_s28 + $0x94] sm:$0xff]  ;;  %v3604_v13 = vld [vmem:[%s2801_s28 + $0x9c] sm:$0xff]  ;;  %v3607_v3 = vld [vmem:[%s2801_s28 + $0xac] sm:$0xff] }
  0xfc   : > { %v1387_v22 = vadd.f32 %v1371_v28, %v1350_v59  ;;  %v1388_v19 = vadd.f32 %v1372_v34, %v1351_v62  ;;  %v1389_v36 = vadd.f32 %v1373_v37, %v1352_v20  ;;  %v1390_v42 = vadd.f32 %v1374_v32, %v1353_v0  ;;  %v3610_v58 = vld [vmem:[%s2801_s28 + $0xb4] sm:$0xff] }
  0xfd   : > { %v1391_v53 = vadd.f32 %v1375_v16, %v1354_v49  ;;  %v1392_v26 = vadd.f32 %v1376_v57, %v1355_v54  ;;  %v1393_v9 = vadd.f32 %v1377_v4, %v1356_v56  ;;  %v1394_v35 = vadd.f32 %v1378_v33, %v1357_v23  ;;  %v2475_v57 = vld [vmem:[%s4228_s1 + $0xc] ss:$0 sm:$0xff] }
  0xfe   : > { %v1395_v6 = vadd.f32 %v1379_v5, %v1358_v8  ;;  %v1396_v14 = vadd.f32 %v1380_v15, %v1359_v12  ;;  %v1397_v63 = vadd.f32 %v1381_v21, %v1360_v51  ;;  %v1398_v25 = vadd.f32 %v1382_v61, %v1361_v52 }
  0xff   : > { %v1432_v59 = vmul.f32 %v2473_v7, %v1399_v40  ;;  %v1433_v62 = vmul.f32 %v2473_v7, %v1400_v55  ;;  %v1434_v20 = vmul.f32 %v2473_v7, %v1401_v38  ;;  %v1435_v0 = vmul.f32 %v2473_v7, %v1402_v10 }
 0x100   : > { %v1436_v2 = vmul.f32 %v2473_v7, %v3574_v29  ;;  %v1437_v49 = vmul.f32 %v2473_v7, %v3577_v43  ;;  %v1438_v54 = vmul.f32 %v2473_v7, %v3580_v45  ;;  %v1439_v56 = vmul.f32 %v2473_v7, %v3586_v50 }
 0x101   : > { %v1440_v23 = vmul.f32 %v2473_v7, %v3589_v1  ;;  %v1441_v8 = vmul.f32 %v2473_v7, %v3592_v17  ;;  %v1442_v12 = vmul.f32 %v2473_v7, %v3595_v46  ;;  %v1443_v51 = vmul.f32 %v2473_v7, %v3598_v44 }
 0x102   : > { %v1444_v52 = vmul.f32 %v2473_v7, %v3601_v60  ;;  %v1445_v24 = vmul.f32 %v2473_v7, %v3604_v13  ;;  %v1446_v11 = vmul.f32 %v2473_v7, %v3607_v3  ;;  %v1447_v18 = vmul.f32 %v2473_v7, %v3610_v58 }
 0x103   : > { %v1448_v30 = vadd.f32 %v1432_v59, %v1383_v47  ;;  %v1449_v31 = vadd.f32 %v1433_v62, %v1384_v41  ;;  %v1450_v27 = vadd.f32 %v1434_v20, %v1385_v48  ;;  %v1451_v28 = vadd.f32 %v1435_v0, %v1386_v39  ;;  %v3628_v47 = vld [vmem:[%s2801_s28 + $0xc4] sm:$0xff]  ;;  %v3631_v41 = vld [vmem:[%s2801_s28 + $0xcc] sm:$0xff] }
 0x104   : > { %v1452_v34 = vadd.f32 %v1436_v2, %v1387_v22  ;;  %v1453_v37 = vadd.f32 %v1437_v49, %v1388_v19  ;;  %v1454_v32 = vadd.f32 %v1438_v54, %v1389_v36  ;;  %v1455_v16 = vadd.f32 %v1439_v56, %v1390_v42  ;;  %v2477_v56 = vld [vmem:[%s4228_s1 + $0x14] ss:$0 sm:$0xff] }
 0x105   : > { %v1456_v4 = vadd.f32 %v1440_v23, %v1391_v53  ;;  %v1457_v33 = vadd.f32 %v1441_v8, %v1392_v26  ;;  %v1458_v5 = vadd.f32 %v1442_v12, %v1393_v9  ;;  %v1459_v15 = vadd.f32 %v1443_v51, %v1394_v35 }
 0x106   : > { %v1460_v21 = vadd.f32 %v1444_v52, %v1395_v6  ;;  %v1461_v61 = vadd.f32 %v1445_v24, %v1396_v14  ;;  %v1462_v40 = vadd.f32 %v1446_v11, %v1397_v63  ;;  %v1463_v55 = vadd.f32 %v1447_v18, %v1398_v25 }
 0x107   : > { %v1469_v48 = vmul.f32 %v2475_v57, %v1401_v38  ;;  %v1470_v39 = vmul.f32 %v2475_v57, %v1402_v10  ;;  %v1471_v22 = vmul.f32 %v2475_v57, %v3574_v29  ;;  %v1472_v19 = vmul.f32 %v2475_v57, %v3577_v43 }
 0x108   : > { %v1473_v36 = vmul.f32 %v2475_v57, %v3580_v45  ;;  %v1474_v42 = vmul.f32 %v2475_v57, %v3586_v50  ;;  %v1475_v7 = vmul.f32 %v2475_v57, %v3589_v1  ;;  %v1476_v53 = vmul.f32 %v2475_v57, %v3592_v17 }
 0x109   : > { %v1477_v26 = vmul.f32 %v2475_v57, %v3595_v46  ;;  %v1478_v9 = vmul.f32 %v2475_v57, %v3598_v44  ;;  %v1479_v35 = vmul.f32 %v2475_v57, %v3601_v60  ;;  %v1480_v38 = vmul.f32 %v2475_v57, %v3604_v13 }
 0x10a   : > { %v1481_v10 = vmul.f32 %v2475_v57, %v3607_v3  ;;  %v1482_v6 = vmul.f32 %v2475_v57, %v3610_v58  ;;  %v1483_v14 = vmul.f32 %v2475_v57, %v3628_v47  ;;  %v1484_v63 = vmul.f32 %v2475_v57, %v3631_v41 }
 0x10b   : > { %v1485_v25 = vadd.f32 %v1469_v48, %v1448_v30  ;;  %v1486_v59 = vadd.f32 %v1470_v39, %v1449_v31  ;;  %v1487_v62 = vadd.f32 %v1471_v22, %v1450_v27  ;;  %v1488_v20 = vadd.f32 %v1472_v19, %v1451_v28  ;;  %v3651_v30 = vld [vmem:[%s2801_s28 + $0xdc] sm:$0xff]  ;;  %v3654_v31 = vld [vmem:[%s2801_s28 + $0xe4] sm:$0xff] }
 0x10c   : > { %v1489_v0 = vadd.f32 %v1473_v36, %v1452_v34  ;;  %v1490_v2 = vadd.f32 %v1474_v42, %v1453_v37  ;;  %v1491_v49 = vadd.f32 %v1475_v7, %v1454_v32  ;;  %v1492_v54 = vadd.f32 %v1476_v53, %v1455_v16  ;;  %v2479_v53 = vld [vmem:[%s4228_s1 + $0x1c] ss:$0 sm:$0xff] }
 0x10d   : > { %v1493_v23 = vadd.f32 %v1477_v26, %v1456_v4  ;;  %v1494_v8 = vadd.f32 %v1478_v9, %v1457_v33  ;;  %v1495_v12 = vadd.f32 %v1479_v35, %v1458_v5  ;;  %v1496_v51 = vadd.f32 %v1480_v38, %v1459_v15 }
 0x10e   : > { %v1497_v52 = vadd.f32 %v1481_v10, %v1460_v21  ;;  %v1498_v24 = vadd.f32 %v1482_v6, %v1461_v61  ;;  %v1499_v11 = vadd.f32 %v1483_v14, %v1462_v40  ;;  %v1500_v18 = vadd.f32 %v1484_v63, %v1463_v55 }
 0x10f   : > { %v1506_v27 = vmul.f32 %v2477_v56, %v3574_v29  ;;  %v1507_v28 = vmul.f32 %v2477_v56, %v3577_v43  ;;  %v1508_v34 = vmul.f32 %v2477_v56, %v3580_v45  ;;  %v1509_v37 = vmul.f32 %v2477_v56, %v3586_v50 }
 0x110   : > { %v1510_v32 = vmul.f32 %v2477_v56, %v3589_v1  ;;  %v1511_v16 = vmul.f32 %v2477_v56, %v3592_v17  ;;  %v1512_v57 = vmul.f32 %v2477_v56, %v3595_v46  ;;  %v1513_v4 = vmul.f32 %v2477_v56, %v3598_v44 }
 0x111   : > { %v1514_v33 = vmul.f32 %v2477_v56, %v3601_v60  ;;  %v1515_v5 = vmul.f32 %v2477_v56, %v3604_v13  ;;  %v1516_v29 = vmul.f32 %v2477_v56, %v3607_v3  ;;  %v1517_v43 = vmul.f32 %v2477_v56, %v3610_v58 }
 0x112   : > { %v1518_v15 = vmul.f32 %v2477_v56, %v3628_v47  ;;  %v1519_v21 = vmul.f32 %v2477_v56, %v3631_v41  ;;  %v1520_v61 = vmul.f32 %v2477_v56, %v3651_v30  ;;  %v1521_v40 = vmul.f32 %v2477_v56, %v3654_v31 }
 0x113   : > { %v1522_v55 = vadd.f32 %v1506_v27, %v1485_v25  ;;  %v1523_v48 = vadd.f32 %v1507_v28, %v1486_v59  ;;  %v1524_v39 = vadd.f32 %v1508_v34, %v1487_v62  ;;  %v1525_v22 = vadd.f32 %v1509_v37, %v1488_v20  ;;  %v3676_v25 = vld [vmem:[%s2801_s28 + $0xf4] sm:$0xff]  ;;  %v3679_v59 = vld [vmem:[%s2801_s28 + $0xfc] sm:$0xff] }
 0x114   : > { %v1526_v19 = vadd.f32 %v1510_v32, %v1489_v0  ;;  %v1527_v36 = vadd.f32 %v1511_v16, %v1490_v2  ;;  %v1528_v42 = vadd.f32 %v1512_v57, %v1491_v49  ;;  %v1529_v7 = vadd.f32 %v1513_v4, %v1492_v54  ;;  %v2481_v4 = vld [vmem:[%s4228_s1 + $0x24] ss:$0 sm:$0xff] }
 0x115   : > { %v1530_v26 = vadd.f32 %v1514_v33, %v1493_v23  ;;  %v1531_v9 = vadd.f32 %v1515_v5, %v1494_v8  ;;  %v1532_v35 = vadd.f32 %v1516_v29, %v1495_v12  ;;  %v1533_v38 = vadd.f32 %v1517_v43, %v1496_v51 }
 0x116   : > { %v1534_v10 = vadd.f32 %v1518_v15, %v1497_v52  ;;  %v1535_v6 = vadd.f32 %v1519_v21, %v1498_v24  ;;  %v1536_v14 = vadd.f32 %v1520_v61, %v1499_v11  ;;  %v1537_v63 = vadd.f32 %v1521_v40, %v1500_v18 }
 0x117   : > { %v1543_v62 = vmul.f32 %v2479_v53, %v3580_v45  ;;  %v1544_v20 = vmul.f32 %v2479_v53, %v3586_v50  ;;  %v1545_v0 = vmul.f32 %v2479_v53, %v3589_v1  ;;  %v1546_v2 = vmul.f32 %v2479_v53, %v3592_v17 }
 0x118   : > { %v1547_v49 = vmul.f32 %v2479_v53, %v3595_v46  ;;  %v1548_v54 = vmul.f32 %v2479_v53, %v3598_v44  ;;  %v1549_v56 = vmul.f32 %v2479_v53, %v3601_v60  ;;  %v1550_v23 = vmul.f32 %v2479_v53, %v3604_v13 }
 0x119   : > { %v1551_v8 = vmul.f32 %v2479_v53, %v3607_v3  ;;  %v1552_v12 = vmul.f32 %v2479_v53, %v3610_v58  ;;  %v1553_v45 = vmul.f32 %v2479_v53, %v3628_v47  ;;  %v1554_v50 = vmul.f32 %v2479_v53, %v3631_v41 }
 0x11a   : > { %v1555_v51 = vmul.f32 %v2479_v53, %v3651_v30  ;;  %v1556_v52 = vmul.f32 %v2479_v53, %v3654_v31  ;;  %v1557_v24 = vmul.f32 %v2479_v53, %v3676_v25  ;;  %v1558_v11 = vmul.f32 %v2479_v53, %v3679_v59 }
 0x11b   : > { %v1559_v18 = vadd.f32 %v1543_v62, %v1522_v55  ;;  %v1560_v27 = vadd.f32 %v1544_v20, %v1523_v48  ;;  %v1561_v28 = vadd.f32 %v1545_v0, %v1524_v39  ;;  %v1562_v34 = vadd.f32 %v1546_v2, %v1525_v22  ;;  %v3701_v55 = vld [vmem:[%s2801_s28 + $0x10c] sm:$0xff]  ;;  %v3704_v48 = vld [vmem:[%s2801_s28 + $0x114] sm:$0xff] }
 0x11c   : > { %v1563_v37 = vadd.f32 %v1547_v49, %v1526_v19  ;;  %v1564_v32 = vadd.f32 %v1548_v54, %v1527_v36  ;;  %v1565_v16 = vadd.f32 %v1549_v56, %v1528_v42  ;;  %v1566_v57 = vadd.f32 %v1550_v23, %v1529_v7  ;;  %v2483_v23 = vld [vmem:[%s4228_s1 + $0x2c] ss:$0 sm:$0xff] }
 0x11d   : > { %v1567_v33 = vadd.f32 %v1551_v8, %v1530_v26  ;;  %v1568_v5 = vadd.f32 %v1552_v12, %v1531_v9  ;;  %v1569_v29 = vadd.f32 %v1553_v45, %v1532_v35  ;;  %v1570_v43 = vadd.f32 %v1554_v50, %v1533_v38 }
 0x11e   : > { %v1571_v15 = vadd.f32 %v1555_v51, %v1534_v10  ;;  %v1572_v21 = vadd.f32 %v1556_v52, %v1535_v6  ;;  %v1573_v61 = vadd.f32 %v1557_v24, %v1536_v14  ;;  %v1574_v40 = vadd.f32 %v1558_v11, %v1537_v63 }
 0x11f   : > { %v1580_v39 = vmul.f32 %v2481_v4, %v3589_v1  ;;  %v1581_v22 = vmul.f32 %v2481_v4, %v3592_v17  ;;  %v1582_v19 = vmul.f32 %v2481_v4, %v3595_v46  ;;  %v1583_v36 = vmul.f32 %v2481_v4, %v3598_v44 }
 0x120   : > { %v1584_v42 = vmul.f32 %v2481_v4, %v3601_v60  ;;  %v1585_v7 = vmul.f32 %v2481_v4, %v3604_v13  ;;  %v1586_v53 = vmul.f32 %v2481_v4, %v3607_v3  ;;  %v1587_v26 = vmul.f32 %v2481_v4, %v3610_v58 }
 0x121   : > { %v1588_v9 = vmul.f32 %v2481_v4, %v3628_v47  ;;  %v1589_v35 = vmul.f32 %v2481_v4, %v3631_v41  ;;  %v1590_v1 = vmul.f32 %v2481_v4, %v3651_v30  ;;  %v1591_v17 = vmul.f32 %v2481_v4, %v3654_v31 }
 0x122   : > { %v1592_v38 = vmul.f32 %v2481_v4, %v3676_v25  ;;  %v1593_v10 = vmul.f32 %v2481_v4, %v3679_v59  ;;  %v1594_v6 = vmul.f32 %v2481_v4, %v3701_v55  ;;  %v1595_v14 = vmul.f32 %v2481_v4, %v3704_v48 }
 0x123   : > { %v1596_v63 = vadd.f32 %v1580_v39, %v1559_v18  ;;  %v1597_v62 = vadd.f32 %v1581_v22, %v1560_v27  ;;  %v1598_v20 = vadd.f32 %v1582_v19, %v1561_v28  ;;  %v1599_v0 = vadd.f32 %v1583_v36, %v1562_v34  ;;  %v1423_v18 = vld [vmem:[%s2801_s28 + $0x124] sm:$0xff]  ;;  %v1424_v27 = vld [vmem:[%s2801_s28 + $0x12c] sm:$0xff] }
 0x124   : > { %v1600_v2 = vadd.f32 %v1584_v42, %v1563_v37  ;;  %v1601_v49 = vadd.f32 %v1585_v7, %v1564_v32  ;;  %v1602_v54 = vadd.f32 %v1586_v53, %v1565_v16  ;;  %v1603_v56 = vadd.f32 %v1587_v26, %v1566_v57  ;;  %v2485_v26 = vld [vmem:[%s4228_s1 + $0x34] ss:$0 sm:$0xff] }
 0x125   : > { %v1604_v8 = vadd.f32 %v1588_v9, %v1567_v33  ;;  %v1605_v12 = vadd.f32 %v1589_v35, %v1568_v5  ;;  %v1606_v45 = vadd.f32 %v1590_v1, %v1569_v29  ;;  %v1607_v50 = vadd.f32 %v1591_v17, %v1570_v43 }
 0x126   : > { %v1608_v51 = vadd.f32 %v1592_v38, %v1571_v15  ;;  %v1609_v52 = vadd.f32 %v1593_v10, %v1572_v21  ;;  %v1610_v24 = vadd.f32 %v1594_v6, %v1573_v61  ;;  %v1611_v11 = vadd.f32 %v1595_v14, %v1574_v40 }
 0x127   : > { %v1617_v28 = vmul.f32 %v2483_v23, %v3595_v46  ;;  %v1618_v34 = vmul.f32 %v2483_v23, %v3598_v44  ;;  %v1619_v37 = vmul.f32 %v2483_v23, %v3601_v60  ;;  %v1620_v32 = vmul.f32 %v2483_v23, %v3604_v13 }
 0x128   : > { %v1621_v16 = vmul.f32 %v2483_v23, %v3607_v3  ;;  %v1622_v57 = vmul.f32 %v2483_v23, %v3610_v58  ;;  %v1623_v4 = vmul.f32 %v2483_v23, %v3628_v47  ;;  %v1624_v33 = vmul.f32 %v2483_v23, %v3631_v41 }
 0x129   : > { %v1625_v5 = vmul.f32 %v2483_v23, %v3651_v30  ;;  %v1626_v29 = vmul.f32 %v2483_v23, %v3654_v31  ;;  %v1627_v46 = vmul.f32 %v2483_v23, %v3676_v25  ;;  %v1628_v44 = vmul.f32 %v2483_v23, %v3679_v59 }
 0x12a   : > { %v1629_v43 = vmul.f32 %v2483_v23, %v3701_v55  ;;  %v1630_v15 = vmul.f32 %v2483_v23, %v3704_v48  ;;  %v1631_v21 = vmul.f32 %v2483_v23, %v1423_v18  ;;  %v1632_v61 = vmul.f32 %v2483_v23, %v1424_v27 }
 0x12b   : > { %v1633_v40 = vadd.f32 %v1617_v28, %v1596_v63  ;;  %v1634_v39 = vadd.f32 %v1618_v34, %v1597_v62  ;;  %v1635_v22 = vadd.f32 %v1619_v37, %v1598_v20  ;;  %v1636_v19 = vadd.f32 %v1620_v32, %v1599_v0  ;;  %v1425_v63 = vld [vmem:[%s2801_s28 + $0x13c] sm:$0xff]  ;;  %v1426_v62 = vld [vmem:[%s2801_s28 + $0x144] sm:$0xff]  ;;  %v3769_v34 = vld [vmem:[%s2801_s28 + $0x4d] sm:$0xff] }
 0x12c   : > { %v1637_v36 = vadd.f32 %v1621_v16, %v1600_v2  ;;  %v1638_v42 = vadd.f32 %v1622_v57, %v1601_v49  ;;  %v1639_v7 = vadd.f32 %v1623_v4, %v1602_v54  ;;  %v1640_v53 = vadd.f32 %v1624_v33, %v1603_v56  ;;  %v3766_v28 = vld [vmem:[%s2801_s28 + $0x3d] sm:$0xff]  ;;  %v2486_v37 = vld [vmem:[%s4228_s1 + $0x5] ss:$0 sm:$0xff]  ;;  %v3775_v33 = vld [vmem:[%s2801_s28 + $0x55] sm:$0xff] }
 0x12d   : > { %v1641_v9 = vadd.f32 %v1625_v5, %v1604_v8  ;;  %v1642_v35 = vadd.f32 %v1626_v29, %v1605_v12  ;;  %v1643_v1 = vadd.f32 %v1627_v46, %v1606_v45  ;;  %v1644_v17 = vadd.f32 %v1628_v44, %v1607_v50  ;;  %v1687_v50 = vld [vmem:[%s2801_s28 + $0xd] sm:$0xff]  ;;  %v3778_v5 = vld [vmem:[%s2801_s28 + $0x65] sm:$0xff] }
 0x12e   : > { %v1645_v38 = vadd.f32 %v1629_v43, %v1608_v51  ;;  %v1646_v10 = vadd.f32 %v1630_v15, %v1609_v52  ;;  %v1647_v6 = vadd.f32 %v1631_v21, %v1610_v24  ;;  %v1648_v14 = vadd.f32 %v1632_v61, %v1611_v11  ;;  %v1688_v24 = vld [vmem:[%s2801_s28 + $0x1d] sm:$0xff]  ;;  %v3781_v29 = vld [vmem:[%s2801_s28 + $0x6d] sm:$0xff]  ;;  %v3787_v61 = vld [vmem:[%s2801_s28 + $0x85] sm:$0xff] }
 0x12f   : > { %v1654_v20 = vmul.f32 %v2485_v26, %v3601_v60  ;;  %v1655_v0 = vmul.f32 %v2485_v26, %v3604_v13  ;;  %v1656_v2 = vmul.f32 %v2485_v26, %v3607_v3  ;;  %v1657_v49 = vmul.f32 %v2485_v26, %v3610_v58  ;;  %v3784_v21 = vld [vmem:[%s2801_s28 + $0x7d] sm:$0xff] }
 0x130   : > { %v1658_v54 = vmul.f32 %v2485_v26, %v3628_v47  ;;  %v1659_v56 = vmul.f32 %v2485_v26, %v3631_v41  ;;  %v1660_v23 = vmul.f32 %v2485_v26, %v3651_v30  ;;  %v1661_v8 = vmul.f32 %v2485_v26, %v3654_v31  ;;  %v1686_v30 = vld [vmem:[%s2801_s28 + $0x5] sm:$0xff] }
 0x131   : > { %v1662_v60 = vmul.f32 %v2485_v26, %v3676_v25  ;;  %v1663_v13 = vmul.f32 %v2485_v26, %v3679_v59  ;;  %v1664_v12 = vmul.f32 %v2485_v26, %v3701_v55  ;;  %v1665_v3 = vmul.f32 %v2485_v26, %v3704_v48  ;;  %v1689_v59 = vld [vmem:[%s2801_s28 + $0x25] sm:$0xff]  ;;  %v3763_v55 = vld [vmem:[%s2801_s28 + $0x35] sm:$0xff] }
 0x132   : > { %v1666_v58 = vmul.f32 %v2485_v26, %v1423_v18  ;;  %v1667_v45 = vmul.f32 %v2485_v26, %v1424_v27  ;;  %v1668_v47 = vmul.f32 %v2485_v26, %v1425_v63  ;;  %v1669_v41 = vmul.f32 %v2485_v26, %v1426_v62 }
 0x133   : > { %v1670_v51 = vadd.f32 %v1654_v20, %v1633_v40  ;;  %v1671_v31 = vadd.f32 %v1655_v0, %v1634_v39  ;;  %v1672_v52 = vadd.f32 %v1656_v2, %v1635_v22  ;;  %v1673_v25 = vadd.f32 %v1657_v49, %v1636_v19  ;;  %v3790_v40 = vld [vmem:[%s2801_s28 + $0x95] sm:$0xff]  ;;  %v3793_v39 = vld [vmem:[%s2801_s28 + $0x9d] sm:$0xff]  ;;  %v3796_v22 = vld [vmem:[%s2801_s28 + $0xad] sm:$0xff] }
 0x134   : > { %v1674_v48 = vadd.f32 %v1658_v54, %v1637_v36  ;;  %v1675_v11 = vadd.f32 %v1659_v56, %v1638_v42  ;;  %v1676_v18 = vadd.f32 %v1660_v23, %v1639_v7  ;;  %v1677_v27 = vadd.f32 %v1661_v8, %v1640_v53  ;;  %v3799_v19 = vld [vmem:[%s2801_s28 + $0xb5] sm:$0xff] }
 0x135   : > { %v1678_v32 = vadd.f32 %v1662_v60, %v1641_v9  ;;  %v1679_v16 = vadd.f32 %v1663_v13, %v1642_v35  ;;  %v1680_v57 = vadd.f32 %v1664_v12, %v1643_v1  ;;  %v1681_v4 = vadd.f32 %v1665_v3, %v1644_v17  ;;  %v2488_v13 = vld [vmem:[%s4228_s1 + $0xd] ss:$0 sm:$0xff] }
 0x136   : > { %v1682_v46 = vadd.f32 %v1666_v58, %v1645_v38  ;;  %v1683_v44 = vadd.f32 %v1667_v45, %v1646_v10  ;;  %v1684_v43 = vadd.f32 %v1668_v47, %v1647_v6  ;;  %v1685_v15 = vadd.f32 %v1669_v41, %v1648_v14 }
 0x137   : > { %v1719_v36 = vmul.f32 %v2486_v37, %v1686_v30  ;;  %v1720_v42 = vmul.f32 %v2486_v37, %v1687_v50  ;;  %v1721_v7 = vmul.f32 %v2486_v37, %v1688_v24  ;;  %v1722_v53 = vmul.f32 %v2486_v37, %v1689_v59 }
 0x138   : > { %v1723_v26 = vmul.f32 %v2486_v37, %v3763_v55  ;;  %v1724_v9 = vmul.f32 %v2486_v37, %v3766_v28  ;;  %v1725_v35 = vmul.f32 %v2486_v37, %v3769_v34  ;;  %v1726_v1 = vmul.f32 %v2486_v37, %v3775_v33 }
 0x139   : > { %v1727_v17 = vmul.f32 %v2486_v37, %v3778_v5  ;;  %v1728_v38 = vmul.f32 %v2486_v37, %v3781_v29  ;;  %v1729_v10 = vmul.f32 %v2486_v37, %v3784_v21  ;;  %v1730_v6 = vmul.f32 %v2486_v37, %v3787_v61 }
 0x13a   : > { %v1731_v14 = vmul.f32 %v2486_v37, %v3790_v40  ;;  %v1732_v63 = vmul.f32 %v2486_v37, %v3793_v39  ;;  %v1733_v62 = vmul.f32 %v2486_v37, %v3796_v22  ;;  %v1734_v20 = vmul.f32 %v2486_v37, %v3799_v19 }
 0x13b   : > { %v1735_v0 = vadd.f32 %v1719_v36, %v1670_v51  ;;  %v1736_v2 = vadd.f32 %v1720_v42, %v1671_v31  ;;  %v1737_v49 = vadd.f32 %v1721_v7, %v1672_v52  ;;  %v1738_v54 = vadd.f32 %v1722_v53, %v1673_v25  ;;  %v3817_v51 = vld [vmem:[%s2801_s28 + $0xc5] sm:$0xff]  ;;  %v3820_v31 = vld [vmem:[%s2801_s28 + $0xcd] sm:$0xff] }
 0x13c   : > { %v1739_v56 = vadd.f32 %v1723_v26, %v1674_v48  ;;  %v1740_v23 = vadd.f32 %v1724_v9, %v1675_v11  ;;  %v1741_v8 = vadd.f32 %v1725_v35, %v1676_v18  ;;  %v1742_v60 = vadd.f32 %v1726_v1, %v1677_v27  ;;  %v2490_v1 = vld [vmem:[%s4228_s1 + $0x15] ss:$0 sm:$0xff] }
 0x13d   : > { %v1743_v12 = vadd.f32 %v1727_v17, %v1678_v32  ;;  %v1744_v3 = vadd.f32 %v1728_v38, %v1679_v16  ;;  %v1745_v58 = vadd.f32 %v1729_v10, %v1680_v57  ;;  %v1746_v45 = vadd.f32 %v1730_v6, %v1681_v4 }
 0x13e   : > { %v1747_v47 = vadd.f32 %v1731_v14, %v1682_v46  ;;  %v1748_v41 = vadd.f32 %v1732_v63, %v1683_v44  ;;  %v1749_v30 = vadd.f32 %v1733_v62, %v1684_v43  ;;  %v1750_v50 = vadd.f32 %v1734_v20, %v1685_v15 }
 0x13f   : > { %v1756_v52 = vmul.f32 %v2488_v13, %v1688_v24  ;;  %v1757_v25 = vmul.f32 %v2488_v13, %v1689_v59  ;;  %v1758_v48 = vmul.f32 %v2488_v13, %v3763_v55  ;;  %v1759_v11 = vmul.f32 %v2488_v13, %v3766_v28 }
 0x140   : > { %v1760_v18 = vmul.f32 %v2488_v13, %v3769_v34  ;;  %v1761_v27 = vmul.f32 %v2488_v13, %v3775_v33  ;;  %v1762_v37 = vmul.f32 %v2488_v13, %v3778_v5  ;;  %v1763_v32 = vmul.f32 %v2488_v13, %v3781_v29 }
 0x141   : > { %v1764_v16 = vmul.f32 %v2488_v13, %v3784_v21  ;;  %v1765_v57 = vmul.f32 %v2488_v13, %v3787_v61  ;;  %v1766_v4 = vmul.f32 %v2488_v13, %v3790_v40  ;;  %v1767_v24 = vmul.f32 %v2488_v13, %v3793_v39 }
 0x142   : > { %v1768_v59 = vmul.f32 %v2488_v13, %v3796_v22  ;;  %v1769_v46 = vmul.f32 %v2488_v13, %v3799_v19  ;;  %v1770_v44 = vmul.f32 %v2488_v13, %v3817_v51  ;;  %v1771_v43 = vmul.f32 %v2488_v13, %v3820_v31 }
 0x143   : > { %v1772_v15 = vadd.f32 %v1756_v52, %v1735_v0  ;;  %v1773_v36 = vadd.f32 %v1757_v25, %v1736_v2  ;;  %v1774_v42 = vadd.f32 %v1758_v48, %v1737_v49  ;;  %v1775_v7 = vadd.f32 %v1759_v11, %v1738_v54  ;;  %v3840_v0 = vld [vmem:[%s2801_s28 + $0xdd] sm:$0xff]  ;;  %v3843_v2 = vld [vmem:[%s2801_s28 + $0xe5] sm:$0xff] }
 0x144   : > { %v1776_v53 = vadd.f32 %v1760_v18, %v1739_v56  ;;  %v1777_v26 = vadd.f32 %v1761_v27, %v1740_v23  ;;  %v1778_v9 = vadd.f32 %v1762_v37, %v1741_v8  ;;  %v1779_v35 = vadd.f32 %v1763_v32, %v1742_v60  ;;  %v2492_v32 = vld [vmem:[%s4228_s1 + $0x1d] ss:$0 sm:$0xff] }
 0x145   : > { %v1780_v17 = vadd.f32 %v1764_v16, %v1743_v12  ;;  %v1781_v38 = vadd.f32 %v1765_v57, %v1744_v3  ;;  %v1782_v10 = vadd.f32 %v1766_v4, %v1745_v58  ;;  %v1783_v6 = vadd.f32 %v1767_v24, %v1746_v45 }
 0x146   : > { %v1784_v14 = vadd.f32 %v1768_v59, %v1747_v47  ;;  %v1785_v63 = vadd.f32 %v1769_v46, %v1748_v41  ;;  %v1786_v62 = vadd.f32 %v1770_v44, %v1749_v30  ;;  %v1787_v20 = vadd.f32 %v1771_v43, %v1750_v50 }
 0x147   : > { %v1793_v49 = vmul.f32 %v2490_v1, %v3763_v55  ;;  %v1794_v54 = vmul.f32 %v2490_v1, %v3766_v28  ;;  %v1795_v56 = vmul.f32 %v2490_v1, %v3769_v34  ;;  %v1796_v23 = vmul.f32 %v2490_v1, %v3775_v33 }
 0x148   : > { %v1797_v8 = vmul.f32 %v2490_v1, %v3778_v5  ;;  %v1798_v60 = vmul.f32 %v2490_v1, %v3781_v29  ;;  %v1799_v13 = vmul.f32 %v2490_v1, %v3784_v21  ;;  %v1800_v12 = vmul.f32 %v2490_v1, %v3787_v61 }
 0x149   : > { %v1801_v3 = vmul.f32 %v2490_v1, %v3790_v40  ;;  %v1802_v58 = vmul.f32 %v2490_v1, %v3793_v39  ;;  %v1803_v55 = vmul.f32 %v2490_v1, %v3796_v22  ;;  %v1804_v28 = vmul.f32 %v2490_v1, %v3799_v19 }
 0x14a   : > { %v1805_v45 = vmul.f32 %v2490_v1, %v3817_v51  ;;  %v1806_v47 = vmul.f32 %v2490_v1, %v3820_v31  ;;  %v1807_v41 = vmul.f32 %v2490_v1, %v3840_v0  ;;  %v1808_v30 = vmul.f32 %v2490_v1, %v3843_v2 }
 0x14b   : > { %v1809_v50 = vadd.f32 %v1793_v49, %v1772_v15  ;;  %v1810_v52 = vadd.f32 %v1794_v54, %v1773_v36  ;;  %v1811_v25 = vadd.f32 %v1795_v56, %v1774_v42  ;;  %v1812_v48 = vadd.f32 %v1796_v23, %v1775_v7  ;;  %v3865_v15 = vld [vmem:[%s2801_s28 + $0xf5] sm:$0xff]  ;;  %v3868_v36 = vld [vmem:[%s2801_s28 + $0xfd] sm:$0xff] }
 0x14c   : > { %v1813_v11 = vadd.f32 %v1797_v8, %v1776_v53  ;;  %v1814_v18 = vadd.f32 %v1798_v60, %v1777_v26  ;;  %v1815_v27 = vadd.f32 %v1799_v13, %v1778_v9  ;;  %v1816_v37 = vadd.f32 %v1800_v12, %v1779_v35  ;;  %v2494_v12 = vld [vmem:[%s4228_s1 + $0x25] ss:$0 sm:$0xff] }
 0x14d   : > { %v1817_v16 = vadd.f32 %v1801_v3, %v1780_v17  ;;  %v1818_v57 = vadd.f32 %v1802_v58, %v1781_v38  ;;  %v1819_v4 = vadd.f32 %v1803_v55, %v1782_v10  ;;  %v1820_v24 = vadd.f32 %v1804_v28, %v1783_v6 }
 0x14e   : > { %v1821_v59 = vadd.f32 %v1805_v45, %v1784_v14  ;;  %v1822_v46 = vadd.f32 %v1806_v47, %v1785_v63  ;;  %v1823_v44 = vadd.f32 %v1807_v41, %v1786_v62  ;;  %v1824_v43 = vadd.f32 %v1808_v30, %v1787_v20 }
 0x14f   : > { %v1830_v42 = vmul.f32 %v2492_v32, %v3769_v34  ;;  %v1831_v7 = vmul.f32 %v2492_v32, %v3775_v33  ;;  %v1832_v53 = vmul.f32 %v2492_v32, %v3778_v5  ;;  %v1833_v26 = vmul.f32 %v2492_v32, %v3781_v29 }
 0x150   : > { %v1834_v9 = vmul.f32 %v2492_v32, %v3784_v21  ;;  %v1835_v35 = vmul.f32 %v2492_v32, %v3787_v61  ;;  %v1836_v1 = vmul.f32 %v2492_v32, %v3790_v40  ;;  %v1837_v17 = vmul.f32 %v2492_v32, %v3793_v39 }
 0x151   : > { %v1838_v38 = vmul.f32 %v2492_v32, %v3796_v22  ;;  %v1839_v10 = vmul.f32 %v2492_v32, %v3799_v19  ;;  %v1840_v34 = vmul.f32 %v2492_v32, %v3817_v51  ;;  %v1841_v33 = vmul.f32 %v2492_v32, %v3820_v31 }
 0x152   : > { %v1842_v6 = vmul.f32 %v2492_v32, %v3840_v0  ;;  %v1843_v14 = vmul.f32 %v2492_v32, %v3843_v2  ;;  %v1844_v63 = vmul.f32 %v2492_v32, %v3865_v15  ;;  %v1845_v62 = vmul.f32 %v2492_v32, %v3868_v36 }
 0x153   : > { %v1846_v20 = vadd.f32 %v1830_v42, %v1809_v50  ;;  %v1847_v49 = vadd.f32 %v1831_v7, %v1810_v52  ;;  %v1848_v54 = vadd.f32 %v1832_v53, %v1811_v25  ;;  %v1849_v56 = vadd.f32 %v1833_v26, %v1812_v48  ;;  %v3890_v50 = vld [vmem:[%s2801_s28 + $0x10d] sm:$0xff]  ;;  %v3893_v52 = vld [vmem:[%s2801_s28 + $0x115] sm:$0xff] }
 0x154   : > { %v1850_v23 = vadd.f32 %v1834_v9, %v1813_v11  ;;  %v1851_v8 = vadd.f32 %v1835_v35, %v1814_v18  ;;  %v1852_v60 = vadd.f32 %v1836_v1, %v1815_v27  ;;  %v1853_v13 = vadd.f32 %v1837_v17, %v1816_v37  ;;  %v2496_v17 = vld [vmem:[%s4228_s1 + $0x2d] ss:$0 sm:$0xff] }
 0x155   : > { %v1854_v3 = vadd.f32 %v1838_v38, %v1817_v16  ;;  %v1855_v58 = vadd.f32 %v1839_v10, %v1818_v57  ;;  %v1856_v55 = vadd.f32 %v1840_v34, %v1819_v4  ;;  %v1857_v28 = vadd.f32 %v1841_v33, %v1820_v24 }
 0x156   : > { %v1858_v45 = vadd.f32 %v1842_v6, %v1821_v59  ;;  %v1859_v47 = vadd.f32 %v1843_v14, %v1822_v46  ;;  %v1860_v41 = vadd.f32 %v1844_v63, %v1823_v44  ;;  %v1861_v30 = vadd.f32 %v1845_v62, %v1824_v43 }
 0x157   : > { %v1867_v25 = vmul.f32 %v2494_v12, %v3778_v5  ;;  %v1868_v48 = vmul.f32 %v2494_v12, %v3781_v29  ;;  %v1869_v11 = vmul.f32 %v2494_v12, %v3784_v21  ;;  %v1870_v18 = vmul.f32 %v2494_v12, %v3787_v61 }
 0x158   : > { %v1871_v27 = vmul.f32 %v2494_v12, %v3790_v40  ;;  %v1872_v37 = vmul.f32 %v2494_v12, %v3793_v39  ;;  %v1873_v32 = vmul.f32 %v2494_v12, %v3796_v22  ;;  %v1874_v16 = vmul.f32 %v2494_v12, %v3799_v19 }
 0x159   : > { %v1875_v57 = vmul.f32 %v2494_v12, %v3817_v51  ;;  %v1876_v4 = vmul.f32 %v2494_v12, %v3820_v31  ;;  %v1877_v5 = vmul.f32 %v2494_v12, %v3840_v0  ;;  %v1878_v29 = vmul.f32 %v2494_v12, %v3843_v2 }
 0x15a   : > { %v1879_v24 = vmul.f32 %v2494_v12, %v3865_v15  ;;  %v1880_v59 = vmul.f32 %v2494_v12, %v3868_v36  ;;  %v1881_v46 = vmul.f32 %v2494_v12, %v3890_v50  ;;  %v1882_v44 = vmul.f32 %v2494_v12, %v3893_v52 }
 0x15b   : > { %v1883_v43 = vadd.f32 %v1867_v25, %v1846_v20  ;;  %v1884_v42 = vadd.f32 %v1868_v48, %v1847_v49  ;;  %v1885_v7 = vadd.f32 %v1869_v11, %v1848_v54  ;;  %v1886_v53 = vadd.f32 %v1870_v18, %v1849_v56  ;;  %v1710_v20 = vld [vmem:[%s2801_s28 + $0x125] sm:$0xff]  ;;  %v1711_v49 = vld [vmem:[%s2801_s28 + $0x12d] sm:$0xff] }
 0x15c   : > { %v1887_v26 = vadd.f32 %v1871_v27, %v1850_v23  ;;  %v1888_v9 = vadd.f32 %v1872_v37, %v1851_v8  ;;  %v1889_v35 = vadd.f32 %v1873_v32, %v1852_v60  ;;  %v1890_v1 = vadd.f32 %v1874_v16, %v1853_v13  ;;  %v2498_v16 = vld [vmem:[%s4228_s1 + $0x35] ss:$0 sm:$0xff] }
 0x15d   : > { %v1891_v38 = vadd.f32 %v1875_v57, %v1854_v3  ;;  %v1892_v10 = vadd.f32 %v1876_v4, %v1855_v58  ;;  %v1893_v34 = vadd.f32 %v1877_v5, %v1856_v55  ;;  %v1894_v33 = vadd.f32 %v1878_v29, %v1857_v28 }
 0x15e   : > { %v1895_v6 = vadd.f32 %v1879_v24, %v1858_v45  ;;  %v1896_v14 = vadd.f32 %v1880_v59, %v1859_v47  ;;  %v1897_v63 = vadd.f32 %v1881_v46, %v1860_v41  ;;  %v1898_v62 = vadd.f32 %v1882_v44, %v1861_v30 }
 0x15f   : > { %v1904_v54 = vmul.f32 %v2496_v17, %v3784_v21  ;;  %v1905_v56 = vmul.f32 %v2496_v17, %v3787_v61  ;;  %v1906_v23 = vmul.f32 %v2496_v17, %v3790_v40  ;;  %v1907_v8 = vmul.f32 %v2496_v17, %v3793_v39 }
 0x160   : > { %v1908_v60 = vmul.f32 %v2496_v17, %v3796_v22  ;;  %v1909_v13 = vmul.f32 %v2496_v17, %v3799_v19  ;;  %v1910_v12 = vmul.f32 %v2496_v17, %v3817_v51  ;;  %v1911_v3 = vmul.f32 %v2496_v17, %v3820_v31 }
 0x161   : > { %v1912_v58 = vmul.f32 %v2496_v17, %v3840_v0  ;;  %v1913_v55 = vmul.f32 %v2496_v17, %v3843_v2  ;;  %v1914_v21 = vmul.f32 %v2496_v17, %v3865_v15  ;;  %v1915_v61 = vmul.f32 %v2496_v17, %v3868_v36 }
 0x162   : > { %v1916_v28 = vmul.f32 %v2496_v17, %v3890_v50  ;;  %v1917_v45 = vmul.f32 %v2496_v17, %v3893_v52  ;;  %v1918_v47 = vmul.f32 %v2496_v17, %v1710_v20  ;;  %v1919_v41 = vmul.f32 %v2496_v17, %v1711_v49 }
 0x163   : > { %v1920_v30 = vadd.f32 %v1904_v54, %v1883_v43  ;;  %v1921_v25 = vadd.f32 %v1905_v56, %v1884_v42  ;;  %v1922_v48 = vadd.f32 %v1906_v23, %v1885_v7  ;;  %v1923_v11 = vadd.f32 %v1907_v8, %v1886_v53  ;;  %v1712_v43 = vld [vmem:[%s2801_s28 + $0x13d] sm:$0xff]  ;;  %v1713_v42 = vld [vmem:[%s2801_s28 + $0x145] sm:$0xff]  ;;  %v3958_v56 = vld [vmem:[%s2801_s28 + $0x4e] sm:$0xff] }
 0x164   : > { %v1924_v18 = vadd.f32 %v1908_v60, %v1887_v26  ;;  %v1925_v27 = vadd.f32 %v1909_v13, %v1888_v9  ;;  %v1926_v37 = vadd.f32 %v1910_v12, %v1889_v35  ;;  %v1927_v32 = vadd.f32 %v1911_v3, %v1890_v1  ;;  %v3955_v54 = vld [vmem:[%s2801_s28 + $0x3e] sm:$0xff]  ;;  %v2499_v23 = vld [vmem:[%s4228_s1 + $0x6] ss:$0 sm:$0xff]  ;;  %v3964_v3 = vld [vmem:[%s2801_s28 + $0x56] sm:$0xff] }
 0x165   : > { %v1928_v57 = vadd.f32 %v1912_v58, %v1891_v38  ;;  %v1929_v4 = vadd.f32 %v1913_v55, %v1892_v10  ;;  %v1930_v5 = vadd.f32 %v1914_v21, %v1893_v34  ;;  %v1931_v29 = vadd.f32 %v1915_v61, %v1894_v33  ;;  %v1974_v33 = vld [vmem:[%s2801_s28 + $0xe] sm:$0xff]  ;;  %v3967_v58 = vld [vmem:[%s2801_s28 + $0x66] sm:$0xff] }
 0x166   : > { %v1932_v24 = vadd.f32 %v1916_v28, %v1895_v6  ;;  %v1933_v59 = vadd.f32 %v1917_v45, %v1896_v14  ;;  %v1934_v46 = vadd.f32 %v1918_v47, %v1897_v63  ;;  %v1935_v44 = vadd.f32 %v1919_v41, %v1898_v62  ;;  %v1975_v63 = vld [vmem:[%s2801_s28 + $0x1e] sm:$0xff]  ;;  %v3970_v55 = vld [vmem:[%s2801_s28 + $0x6e] sm:$0xff]  ;;  %v3976_v41 = vld [vmem:[%s2801_s28 + $0x86] sm:$0xff] }
 0x167   : > { %v1941_v7 = vmul.f32 %v2498_v16, %v3790_v40  ;;  %v1942_v53 = vmul.f32 %v2498_v16, %v3793_v39  ;;  %v1943_v26 = vmul.f32 %v2498_v16, %v3796_v22  ;;  %v1944_v9 = vmul.f32 %v2498_v16, %v3799_v19  ;;  %v3973_v47 = vld [vmem:[%s2801_s28 + $0x7e] sm:$0xff] }
 0x168   : > { %v1945_v35 = vmul.f32 %v2498_v16, %v3817_v51  ;;  %v1946_v1 = vmul.f32 %v2498_v16, %v3820_v31  ;;  %v1947_v17 = vmul.f32 %v2498_v16, %v3840_v0  ;;  %v1948_v38 = vmul.f32 %v2498_v16, %v3843_v2  ;;  %v1973_v0 = vld [vmem:[%s2801_s28 + $0x6] sm:$0xff] }
 0x169   : > { %v1949_v40 = vmul.f32 %v2498_v16, %v3865_v15  ;;  %v1950_v39 = vmul.f32 %v2498_v16, %v3868_v36  ;;  %v1951_v10 = vmul.f32 %v2498_v16, %v3890_v50  ;;  %v1952_v22 = vmul.f32 %v2498_v16, %v3893_v52  ;;  %v1976_v36 = vld [vmem:[%s2801_s28 + $0x26] sm:$0xff]  ;;  %v3952_v50 = vld [vmem:[%s2801_s28 + $0x36] sm:$0xff] }
 0x16a   : > { %v1953_v19 = vmul.f32 %v2498_v16, %v1710_v20  ;;  %v1954_v34 = vmul.f32 %v2498_v16, %v1711_v49  ;;  %v1955_v51 = vmul.f32 %v2498_v16, %v1712_v43  ;;  %v1956_v31 = vmul.f32 %v2498_v16, %v1713_v42 }
 0x16b   : > { %v1957_v6 = vadd.f32 %v1941_v7, %v1920_v30  ;;  %v1958_v2 = vadd.f32 %v1942_v53, %v1921_v25  ;;  %v1959_v14 = vadd.f32 %v1943_v26, %v1922_v48  ;;  %v1960_v15 = vadd.f32 %v1944_v9, %v1923_v11  ;;  %v3979_v30 = vld [vmem:[%s2801_s28 + $0x96] sm:$0xff]  ;;  %v3982_v25 = vld [vmem:[%s2801_s28 + $0x9e] sm:$0xff]  ;;  %v3985_v48 = vld [vmem:[%s2801_s28 + $0xae] sm:$0xff] }
 0x16c   : > { %v1961_v52 = vadd.f32 %v1945_v35, %v1924_v18  ;;  %v1962_v62 = vadd.f32 %v1946_v1, %v1925_v27  ;;  %v1963_v20 = vadd.f32 %v1947_v17, %v1926_v37  ;;  %v1964_v49 = vadd.f32 %v1948_v38, %v1927_v32  ;;  %v3988_v11 = vld [vmem:[%s2801_s28 + $0xb6] sm:$0xff] }
 0x16d   : > { %v1965_v8 = vadd.f32 %v1949_v40, %v1928_v57  ;;  %v1966_v60 = vadd.f32 %v1950_v39, %v1929_v4  ;;  %v1967_v13 = vadd.f32 %v1951_v10, %v1930_v5  ;;  %v1968_v12 = vadd.f32 %v1952_v22, %v1931_v29  ;;  %v2501_v39 = vld [vmem:[%s4228_s1 + $0xe] ss:$0 sm:$0xff] }
 0x16e   : > { %v1969_v21 = vadd.f32 %v1953_v19, %v1932_v24  ;;  %v1970_v61 = vadd.f32 %v1954_v34, %v1933_v59  ;;  %v1971_v28 = vadd.f32 %v1955_v51, %v1934_v46  ;;  %v1972_v45 = vadd.f32 %v1956_v31, %v1935_v44 }
 0x16f   : > { %v2006_v18 = vmul.f32 %v2499_v23, %v1973_v0  ;;  %v2007_v27 = vmul.f32 %v2499_v23, %v1974_v33  ;;  %v2008_v37 = vmul.f32 %v2499_v23, %v1975_v63  ;;  %v2009_v32 = vmul.f32 %v2499_v23, %v1976_v36 }
 0x170   : > { %v2010_v16 = vmul.f32 %v2499_v23, %v3952_v50  ;;  %v2011_v57 = vmul.f32 %v2499_v23, %v3955_v54  ;;  %v2012_v4 = vmul.f32 %v2499_v23, %v3958_v56  ;;  %v2013_v5 = vmul.f32 %v2499_v23, %v3964_v3 }
 0x171   : > { %v2014_v29 = vmul.f32 %v2499_v23, %v3967_v58  ;;  %v2015_v24 = vmul.f32 %v2499_v23, %v3970_v55  ;;  %v2016_v59 = vmul.f32 %v2499_v23, %v3973_v47  ;;  %v2017_v46 = vmul.f32 %v2499_v23, %v3976_v41 }
 0x172   : > { %v2018_v44 = vmul.f32 %v2499_v23, %v3979_v30  ;;  %v2019_v43 = vmul.f32 %v2499_v23, %v3982_v25  ;;  %v2020_v42 = vmul.f32 %v2499_v23, %v3985_v48  ;;  %v2021_v7 = vmul.f32 %v2499_v23, %v3988_v11 }
 0x173   : > { %v2022_v53 = vadd.f32 %v2006_v18, %v1957_v6  ;;  %v2023_v26 = vadd.f32 %v2007_v27, %v1958_v2  ;;  %v2024_v9 = vadd.f32 %v2008_v37, %v1959_v14  ;;  %v2025_v35 = vadd.f32 %v2009_v32, %v1960_v15  ;;  %v4006_v6 = vld [vmem:[%s2801_s28 + $0xc6] sm:$0xff]  ;;  %v4009_v2 = vld [vmem:[%s2801_s28 + $0xce] sm:$0xff] }
 0x174   : > { %v2026_v1 = vadd.f32 %v2010_v16, %v1961_v52  ;;  %v2027_v17 = vadd.f32 %v2011_v57, %v1962_v62  ;;  %v2028_v38 = vadd.f32 %v2012_v4, %v1963_v20  ;;  %v2029_v40 = vadd.f32 %v2013_v5, %v1964_v49  ;;  %v2503_v5 = vld [vmem:[%s4228_s1 + $0x16] ss:$0 sm:$0xff] }
 0x175   : > { %v2030_v10 = vadd.f32 %v2014_v29, %v1965_v8  ;;  %v2031_v22 = vadd.f32 %v2015_v24, %v1966_v60  ;;  %v2032_v19 = vadd.f32 %v2016_v59, %v1967_v13  ;;  %v2033_v34 = vadd.f32 %v2017_v46, %v1968_v12 }
 0x176   : > { %v2034_v51 = vadd.f32 %v2018_v44, %v1969_v21  ;;  %v2035_v31 = vadd.f32 %v2019_v43, %v1970_v61  ;;  %v2036_v0 = vadd.f32 %v2020_v42, %v1971_v28  ;;  %v2037_v33 = vadd.f32 %v2021_v7, %v1972_v45 }
 0x177   : > { %v2043_v14 = vmul.f32 %v2501_v39, %v1975_v63  ;;  %v2044_v15 = vmul.f32 %v2501_v39, %v1976_v36  ;;  %v2045_v52 = vmul.f32 %v2501_v39, %v3952_v50  ;;  %v2046_v62 = vmul.f32 %v2501_v39, %v3955_v54 }
 0x178   : > { %v2047_v20 = vmul.f32 %v2501_v39, %v3958_v56  ;;  %v2048_v49 = vmul.f32 %v2501_v39, %v3964_v3  ;;  %v2049_v23 = vmul.f32 %v2501_v39, %v3967_v58  ;;  %v2050_v8 = vmul.f32 %v2501_v39, %v3970_v55 }
 0x179   : > { %v2051_v60 = vmul.f32 %v2501_v39, %v3973_v47  ;;  %v2052_v13 = vmul.f32 %v2501_v39, %v3976_v41  ;;  %v2053_v12 = vmul.f32 %v2501_v39, %v3979_v30  ;;  %v2054_v63 = vmul.f32 %v2501_v39, %v3982_v25 }
 0x17a   : > { %v2055_v36 = vmul.f32 %v2501_v39, %v3985_v48  ;;  %v2056_v21 = vmul.f32 %v2501_v39, %v3988_v11  ;;  %v2057_v61 = vmul.f32 %v2501_v39, %v4006_v6  ;;  %v2058_v28 = vmul.f32 %v2501_v39, %v4009_v2 }
 0x17b   : > { %v2059_v45 = vadd.f32 %v2043_v14, %v2022_v53  ;;  %v2060_v18 = vadd.f32 %v2044_v15, %v2023_v26  ;;  %v2061_v27 = vadd.f32 %v2045_v52, %v2024_v9  ;;  %v2062_v37 = vadd.f32 %v2046_v62, %v2025_v35  ;;  %v4029_v53 = vld [vmem:[%s2801_s28 + $0xde] sm:$0xff]  ;;  %v4032_v26 = vld [vmem:[%s2801_s28 + $0xe6] sm:$0xff] }
 0x17c   : > { %v2063_v32 = vadd.f32 %v2047_v20, %v2026_v1  ;;  %v2064_v16 = vadd.f32 %v2048_v49, %v2027_v17  ;;  %v2065_v57 = vadd.f32 %v2049_v23, %v2028_v38  ;;  %v2066_v4 = vadd.f32 %v2050_v8, %v2029_v40  ;;  %v2505_v8 = vld [vmem:[%s4228_s1 + $0x1e] ss:$0 sm:$0xff] }
 0x17d   : > { %v2067_v29 = vadd.f32 %v2051_v60, %v2030_v10  ;;  %v2068_v24 = vadd.f32 %v2052_v13, %v2031_v22  ;;  %v2069_v59 = vadd.f32 %v2053_v12, %v2032_v19  ;;  %v2070_v46 = vadd.f32 %v2054_v63, %v2033_v34 }
 0x17e   : > { %v2071_v44 = vadd.f32 %v2055_v36, %v2034_v51  ;;  %v2072_v43 = vadd.f32 %v2056_v21, %v2035_v31  ;;  %v2073_v42 = vadd.f32 %v2057_v61, %v2036_v0  ;;  %v2074_v7 = vadd.f32 %v2058_v28, %v2037_v33 }
 0x17f   : > { %v2080_v9 = vmul.f32 %v2503_v5, %v3952_v50  ;;  %v2081_v35 = vmul.f32 %v2503_v5, %v3955_v54  ;;  %v2082_v1 = vmul.f32 %v2503_v5, %v3958_v56  ;;  %v2083_v17 = vmul.f32 %v2503_v5, %v3964_v3 }
 0x180   : > { %v2084_v38 = vmul.f32 %v2503_v5, %v3967_v58  ;;  %v2085_v40 = vmul.f32 %v2503_v5, %v3970_v55  ;;  %v2086_v39 = vmul.f32 %v2503_v5, %v3973_v47  ;;  %v2087_v10 = vmul.f32 %v2503_v5, %v3976_v41 }
 0x181   : > { %v2088_v22 = vmul.f32 %v2503_v5, %v3979_v30  ;;  %v2089_v19 = vmul.f32 %v2503_v5, %v3982_v25  ;;  %v2090_v50 = vmul.f32 %v2503_v5, %v3985_v48  ;;  %v2091_v54 = vmul.f32 %v2503_v5, %v3988_v11 }
 0x182   : > { %v2092_v34 = vmul.f32 %v2503_v5, %v4006_v6  ;;  %v2093_v51 = vmul.f32 %v2503_v5, %v4009_v2  ;;  %v2094_v31 = vmul.f32 %v2503_v5, %v4029_v53  ;;  %v2095_v0 = vmul.f32 %v2503_v5, %v4032_v26 }
 0x183   : > { %v2096_v33 = vadd.f32 %v2080_v9, %v2059_v45  ;;  %v2097_v14 = vadd.f32 %v2081_v35, %v2060_v18  ;;  %v2098_v15 = vadd.f32 %v2082_v1, %v2061_v27  ;;  %v2099_v52 = vadd.f32 %v2083_v17, %v2062_v37  ;;  %v4054_v45 = vld [vmem:[%s2801_s28 + $0xf6] sm:$0xff]  ;;  %v4057_v18 = vld [vmem:[%s2801_s28 + $0xfe] sm:$0xff] }
 0x184   : > { %v2100_v62 = vadd.f32 %v2084_v38, %v2063_v32  ;;  %v2101_v20 = vadd.f32 %v2085_v40, %v2064_v16  ;;  %v2102_v49 = vadd.f32 %v2086_v39, %v2065_v57  ;;  %v2103_v23 = vadd.f32 %v2087_v10, %v2066_v4  ;;  %v2507_v10 = vld [vmem:[%s4228_s1 + $0x26] ss:$0 sm:$0xff] }
 0x185   : > { %v2104_v60 = vadd.f32 %v2088_v22, %v2067_v29  ;;  %v2105_v13 = vadd.f32 %v2089_v19, %v2068_v24  ;;  %v2106_v12 = vadd.f32 %v2090_v50, %v2069_v59  ;;  %v2107_v63 = vadd.f32 %v2091_v54, %v2070_v46 }
 0x186   : > { %v2108_v36 = vadd.f32 %v2092_v34, %v2071_v44  ;;  %v2109_v21 = vadd.f32 %v2093_v51, %v2072_v43  ;;  %v2110_v61 = vadd.f32 %v2094_v31, %v2073_v42  ;;  %v2111_v28 = vadd.f32 %v2095_v0, %v2074_v7 }
 0x187   : > { %v2117_v27 = vmul.f32 %v2505_v8, %v3958_v56  ;;  %v2118_v37 = vmul.f32 %v2505_v8, %v3964_v3  ;;  %v2119_v32 = vmul.f32 %v2505_v8, %v3967_v58  ;;  %v2120_v16 = vmul.f32 %v2505_v8, %v3970_v55 }
 0x188   : > { %v2121_v57 = vmul.f32 %v2505_v8, %v3973_v47  ;;  %v2122_v4 = vmul.f32 %v2505_v8, %v3976_v41  ;;  %v2123_v5 = vmul.f32 %v2505_v8, %v3979_v30  ;;  %v2124_v29 = vmul.f32 %v2505_v8, %v3982_v25 }
 0x189   : > { %v2125_v24 = vmul.f32 %v2505_v8, %v3985_v48  ;;  %v2126_v59 = vmul.f32 %v2505_v8, %v3988_v11  ;;  %v2127_v56 = vmul.f32 %v2505_v8, %v4006_v6  ;;  %v2128_v3 = vmul.f32 %v2505_v8, %v4009_v2 }
 0x18a   : > { %v2129_v46 = vmul.f32 %v2505_v8, %v4029_v53  ;;  %v2130_v44 = vmul.f32 %v2505_v8, %v4032_v26  ;;  %v2131_v43 = vmul.f32 %v2505_v8, %v4054_v45  ;;  %v2132_v42 = vmul.f32 %v2505_v8, %v4057_v18 }
 0x18b   : > { %v2133_v7 = vadd.f32 %v2117_v27, %v2096_v33  ;;  %v2134_v9 = vadd.f32 %v2118_v37, %v2097_v14  ;;  %v2135_v35 = vadd.f32 %v2119_v32, %v2098_v15  ;;  %v2136_v1 = vadd.f32 %v2120_v16, %v2099_v52  ;;  %v4079_v33 = vld [vmem:[%s2801_s28 + $0x10e] sm:$0xff]  ;;  %v4082_v14 = vld [vmem:[%s2801_s28 + $0x116] sm:$0xff] }
 0x18c   : > { %v2137_v17 = vadd.f32 %v2121_v57, %v2100_v62  ;;  %v2138_v38 = vadd.f32 %v2122_v4, %v2101_v20  ;;  %v2139_v40 = vadd.f32 %v2123_v5, %v2102_v49  ;;  %v2140_v39 = vadd.f32 %v2124_v29, %v2103_v23  ;;  %v2509_v29 = vld [vmem:[%s4228_s1 + $0x2e] ss:$0 sm:$0xff] }
 0x18d   : > { %v2141_v22 = vadd.f32 %v2125_v24, %v2104_v60  ;;  %v2142_v19 = vadd.f32 %v2126_v59, %v2105_v13  ;;  %v2143_v50 = vadd.f32 %v2127_v56, %v2106_v12  ;;  %v2144_v54 = vadd.f32 %v2128_v3, %v2107_v63 }
 0x18e   : > { %v2145_v34 = vadd.f32 %v2129_v46, %v2108_v36  ;;  %v2146_v51 = vadd.f32 %v2130_v44, %v2109_v21  ;;  %v2147_v31 = vadd.f32 %v2131_v43, %v2110_v61  ;;  %v2148_v0 = vadd.f32 %v2132_v42, %v2111_v28 }
 0x18f   : > { %v2154_v15 = vmul.f32 %v2507_v10, %v3967_v58  ;;  %v2155_v52 = vmul.f32 %v2507_v10, %v3970_v55  ;;  %v2156_v62 = vmul.f32 %v2507_v10, %v3973_v47  ;;  %v2157_v20 = vmul.f32 %v2507_v10, %v3976_v41 }
 0x190   : > { %v2158_v49 = vmul.f32 %v2507_v10, %v3979_v30  ;;  %v2159_v23 = vmul.f32 %v2507_v10, %v3982_v25  ;;  %v2160_v8 = vmul.f32 %v2507_v10, %v3985_v48  ;;  %v2161_v60 = vmul.f32 %v2507_v10, %v3988_v11 }
 0x191   : > { %v2162_v13 = vmul.f32 %v2507_v10, %v4006_v6  ;;  %v2163_v12 = vmul.f32 %v2507_v10, %v4009_v2  ;;  %v2164_v58 = vmul.f32 %v2507_v10, %v4029_v53  ;;  %v2165_v55 = vmul.f32 %v2507_v10, %v4032_v26 }
 0x192   : > { %v2166_v63 = vmul.f32 %v2507_v10, %v4054_v45  ;;  %v2167_v36 = vmul.f32 %v2507_v10, %v4057_v18  ;;  %v2168_v21 = vmul.f32 %v2507_v10, %v4079_v33  ;;  %v2169_v61 = vmul.f32 %v2507_v10, %v4082_v14 }
 0x193   : > { %v2170_v28 = vadd.f32 %v2154_v15, %v2133_v7  ;;  %v2171_v27 = vadd.f32 %v2155_v52, %v2134_v9  ;;  %v2172_v37 = vadd.f32 %v2156_v62, %v2135_v35  ;;  %v2173_v32 = vadd.f32 %v2157_v20, %v2136_v1  ;;  %v1997_v7 = vld [vmem:[%s2801_s28 + $0x126] sm:$0xff]  ;;  %v1998_v9 = vld [vmem:[%s2801_s28 + $0x12e] sm:$0xff] }
 0x194   : > { %v2174_v16 = vadd.f32 %v2158_v49, %v2137_v17  ;;  %v2175_v57 = vadd.f32 %v2159_v23, %v2138_v38  ;;  %v2176_v4 = vadd.f32 %v2160_v8, %v2139_v40  ;;  %v2177_v5 = vadd.f32 %v2161_v60, %v2140_v39  ;;  %v2511_v60 = vld [vmem:[%s4228_s1 + $0x36] ss:$0 sm:$0xff] }
 0x195   : > { %v2178_v24 = vadd.f32 %v2162_v13, %v2141_v22  ;;  %v2179_v59 = vadd.f32 %v2163_v12, %v2142_v19  ;;  %v2180_v56 = vadd.f32 %v2164_v58, %v2143_v50  ;;  %v2181_v3 = vadd.f32 %v2165_v55, %v2144_v54 }
 0x196   : > { %v2182_v46 = vadd.f32 %v2166_v63, %v2145_v34  ;;  %v2183_v44 = vadd.f32 %v2167_v36, %v2146_v51  ;;  %v2184_v43 = vadd.f32 %v2168_v21, %v2147_v31  ;;  %v2185_v42 = vadd.f32 %v2169_v61, %v2148_v0 }
 0x197   : > { %v2191_v35 = vmul.f32 %v2509_v29, %v3973_v47  ;;  %v2192_v1 = vmul.f32 %v2509_v29, %v3976_v41  ;;  %v2193_v17 = vmul.f32 %v2509_v29, %v3979_v30  ;;  %v2194_v38 = vmul.f32 %v2509_v29, %v3982_v25 }
 0x198   : > { %v2195_v40 = vmul.f32 %v2509_v29, %v3985_v48  ;;  %v2196_v39 = vmul.f32 %v2509_v29, %v3988_v11  ;;  %v2197_v10 = vmul.f32 %v2509_v29, %v4006_v6  ;;  %v2198_v22 = vmul.f32 %v2509_v29, %v4009_v2 }
 0x199   : > { %v2199_v19 = vmul.f32 %v2509_v29, %v4029_v53  ;;  %v2200_v47 = vmul.f32 %v2509_v29, %v4032_v26  ;;  %v2201_v41 = vmul.f32 %v2509_v29, %v4054_v45  ;;  %v2202_v50 = vmul.f32 %v2509_v29, %v4057_v18 }
 0x19a   : > { %v2203_v54 = vmul.f32 %v2509_v29, %v4079_v33  ;;  %v2204_v34 = vmul.f32 %v2509_v29, %v4082_v14  ;;  %v2205_v51 = vmul.f32 %v2509_v29, %v1997_v7  ;;  %v2206_v31 = vmul.f32 %v2509_v29, %v1998_v9 }
 0x19b   : > { %v2207_v0 = vadd.f32 %v2191_v35, %v2170_v28  ;;  %v2208_v15 = vadd.f32 %v2192_v1, %v2171_v27  ;;  %v2209_v52 = vadd.f32 %v2193_v17, %v2172_v37  ;;  %v2210_v62 = vadd.f32 %v2194_v38, %v2173_v32  ;;  %v1999_v28 = vld [vmem:[%s2801_s28 + $0x13e] sm:$0xff]  ;;  %v2000_v27 = vld [vmem:[%s2801_s28 + $0x146] sm:$0xff]  ;;  %s4147_s28 = scalar_lea.vmem [#allocation2], %s4122_s5  ;;  %s2598_s5 = sshll.u32 %s2690_s29, 4  ;;  %s2599_s5 = int_to_ptr.vmem [resolvable:$false] %s2598_s5 }
 0x19c   : > { %v2211_v20 = vadd.f32 %v2195_v40, %v2174_v16  ;;  %v2212_v49 = vadd.f32 %v2196_v39, %v2175_v57  ;;  %v2213_v23 = vadd.f32 %v2197_v10, %v2176_v4  ;;  %v2214_v8 = vadd.f32 %v2198_v22, %v2177_v5  ;;  %s2294_s10 = sshll.u32 %s4147_s28, 4  ;;  %s2600_s6 = scalar_lea.vmem %s2599_s5, 4096  ;;  %s4159_s10 = int_to_ptr.vmem [resolvable:$true] %s2294_s10 }
 0x19d   : > { %v2215_v13 = vadd.f32 %v2199_v19, %v2178_v24  ;;  %v2216_v12 = vadd.f32 %v2200_v47, %v2179_v59  ;;  %v2217_v58 = vadd.f32 %v2201_v41, %v2180_v56  ;;  %v2218_v55 = vadd.f32 %v2202_v50, %v2181_v3  ;;  %s2594_s27 = scalar_lea.vmem %s4159_s10, 2048  ;;  %p2601_p2 = scmp.lt.s32.totalorder %s4159_s10, %s2599_s5 }
 0x19e   : > { %v2219_v63 = vadd.f32 %v2203_v54, %v2182_v46  ;;  %v2220_v36 = vadd.f32 %v2204_v34, %v2183_v44  ;;  %v2221_v21 = vadd.f32 %v2205_v51, %v2184_v43  ;;  %v2222_v61 = vadd.f32 %v2206_v31, %v2185_v42  ;;  %p2595_p13 = scmp.ne.s32.totalorder %s4159_s10, %s2594_s27  ;;  %p2602_p4 = scmp.lt.s32.totalorder %s2600_s6, %s2594_s27 }
 0x19f   : > { %v2228_v37 = vmul.f32 %v2511_v60, %v3979_v30  ;;  %v2229_v32 = vmul.f32 %v2511_v60, %v3982_v25  ;;  %v2230_v16 = vmul.f32 %v2511_v60, %v3985_v48  ;;  %v2231_v57 = vmul.f32 %v2511_v60, %v3988_v11 }
 0x1a0   : > { %v2232_v4 = vmul.f32 %v2511_v60, %v4006_v6  ;;  %v2233_v5 = vmul.f32 %v2511_v60, %v4009_v2  ;;  %v2234_v29 = vmul.f32 %v2511_v60, %v4029_v53  ;;  %v2235_v24 = vmul.f32 %v2511_v60, %v4032_v26  ;;  %p2596_p0 = pnand %p2595_p13, %p2764_p3  ;;  %p2603_p5 = por %p2602_p4, %p2601_p2 }
 0x1a1   : > { %v2236_v30 = vmul.f32 %v2511_v60, %v4054_v45  ;;  %v2237_v25 = vmul.f32 %v2511_v60, %v4057_v18  ;;  %v2238_v48 = vmul.f32 %v2511_v60, %v4079_v33  ;;  %v2239_v59 = vmul.f32 %v2511_v60, %v4082_v14 }
 0x1a2   : > { %v2240_v11 = vmul.f32 %v2511_v60, %v1997_v7  ;;  %v2241_v56 = vmul.f32 %v2511_v60, %v1998_v9  ;;  %v2242_v3 = vmul.f32 %v2511_v60, %v1999_v28  ;;  %v2243_v46 = vmul.f32 %v2511_v60, %v2000_v27  ;;  %p2597_p1 = pneg %p2596_p0 }
 0x1a3   : > { %v2244_v6 = vadd.f32 %v2228_v37, %v2207_v0  ;;  %v2245_v2 = vadd.f32 %v2229_v32, %v2208_v15  ;;  %v2246_v53 = vadd.f32 %v2230_v16, %v2209_v52  ;;  %v2247_v26 = vadd.f32 %v2231_v57, %v2210_v62 }
 0x1a4   : > { %v2248_v45 = vadd.f32 %v2232_v4, %v2211_v20  ;;  %v2249_v18 = vadd.f32 %v2233_v5, %v2212_v49  ;;  %v2250_v33 = vadd.f32 %v2234_v29, %v2213_v23  ;;  %v2251_v14 = vadd.f32 %v2235_v24, %v2214_v8  ;;  %p2604_p6 = pnand %p2603_p5, %p2597_p1 }
 0x1a5   : > { %v2252_v44 = vadd.f32 %v2236_v30, %v2215_v13  ;;  %v2253_v43 = vadd.f32 %v2237_v25, %v2216_v12  ;;  %v2254_v42 = vadd.f32 %v2238_v48, %v2217_v58  ;;  %v2255_v7 = vadd.f32 %v2239_v59, %v2218_v55  ;;  %2260 = vst [vmem:[%s4147_s28] sm:$0xff] %v2244_v6 }
 0x1a6   : > { %2261 = vst [vmem:[%s4147_s28 + $0x8] sm:$0xff] %v2245_v2  ;;  %2262 = vst [vmem:[%s4147_s28 + $0x10] sm:$0xff] %v2246_v53  ;;  %v2256_v9 = vadd.f32 %v2240_v11, %v2219_v63  ;;  %v2257_v35 = vadd.f32 %v2241_v56, %v2220_v36  ;;  %v2258_v1 = vadd.f32 %v2242_v3, %v2221_v21 }
 0x1a7   : > { %2263 = vst [vmem:[%s4147_s28 + $0x18] sm:$0xff] %v2247_v26  ;;  %v2259_v17 = vadd.f32 %v2243_v46, %v2222_v61  ;;  %2264 = vst [vmem:[%s4147_s28 + $0x20] sm:$0xff] %v2248_v45 }
 0x1a8   : > { %2265 = vst [vmem:[%s4147_s28 + $0x28] sm:$0xff] %v2249_v18  ;;  %2266 = vst [vmem:[%s4147_s28 + $0x30] sm:$0xff] %v2250_v33 }
 0x1a9   : > { %2267 = vst [vmem:[%s4147_s28 + $0x38] sm:$0xff] %v2251_v14  ;;  %2268 = vst [vmem:[%s4147_s28 + $0x40] sm:$0xff] %v2252_v44 }
 0x1aa   : > { %2269 = vst [vmem:[%s4147_s28 + $0x48] sm:$0xff] %v2253_v43  ;;  %2270 = vst [vmem:[%s4147_s28 + $0x50] sm:$0xff] %v2254_v42 }
 0x1ab   : > { %2271 = vst [vmem:[%s4147_s28 + $0x58] sm:$0xff] %v2255_v7  ;;  %2272 = vst [vmem:[%s4147_s28 + $0x60] sm:$0xff] %v2256_v9 }
 0x1ac   : > { %2273 = vst [vmem:[%s4147_s28 + $0x68] sm:$0xff] %v2257_v35  ;;  %2274 = vst [vmem:[%s4147_s28 + $0x70] sm:$0xff] %v2258_v1 }
 0x1ad   : > { %2275 = vst [vmem:[%s4147_s28 + $0x78] sm:$0xff] %v2259_v17 }
 0x1ae   : > { %2607 = shalt.err (!%p2604_p6)
}
 0x1af   : > { %s2608_s4 = scalar_lea.hbm %s4157_s21, 2048  ;;  %s2612_s9 = scalar_lea.hbm %s4230_s3, 8192 }
 0x1b0   : > { %p2609_p7 = scmp.ne.s32.totalorder %s4157_s21, %s2608_s4  ;;  %p2613_p11 = scmp.lt.u32.totalorder %s4157_s21, %s4230_s3 }
 0x1b1   : > { %p2614_p12 = scmp.lt.u32.totalorder %s2612_s9, %s2608_s4  ;;  %p2616_p0 = scmp.lt.u32.totalorder %s2608_s4, %s4157_s21 }
 0x1b2   : > { %p2610_p9 = pnand %p2609_p7, %p2764_p3 }
 0x1b3   : > { %p2615_p13 = por %p2614_p12, %p2613_p11 }
 0x1b4   : > { %p2611_p10 = pneg %p2610_p9 }
 0x1b5   : > { %p2617_p1 = por %p2616_p0, %p2615_p13 }
 0x1b7   : > { %p2618_p2 = pnand %p2617_p1, %p2611_p10 }
 0x1b9   : > { %2621 = shalt.err (!%p2618_p2)
}
 0x1ba   : > { %s2691_s28 = smov 128   ;;  %s2692_s11 = smov 8  }
 0x1bb   : > { %2521 = dma.vmem_to_hbm [thread:$0]  (%p2764_p3), %s4159_s10, 2048, %s4157_s21, %s4175_s24, %s2691_s28, %s2691_s28, %s2692_s11  }
 0x1bc PF: > { %p2527_p4 = scmp.ge.s32.totalorder %s2688_s19, 2  ;;  %s2309_s20 = sand.u32 1, %s2660_s12  }
 0x1bd   : > { %s2310_s27 = scalar_lea.sflag [#allocation3], %s2309_s20 }
 0x1be   : > { %p2524_p5 = pnand %p2527_p4, %p2773_p8 }
 0x1c0   : > { %2655 = dma.done.wait (!%p2524_p5), %s2310_s27, 2048  }
 0x1c1   : > { %2657 = vsyncadd (!%p2524_p5), %s2310_s27, 4294965248  ;;  %s16_s19 = sadd.s32 1, %s2688_s19   ;;  %s4233_s12 = smov %s2664_s13 }
 0x1c2   : > { %p13_p6 = scmp.ge.s32.totalorder %s16_s19, 6   ;;  %s4234_s13 = smov %s2668_s14 }
 0x1c3   : > { %s4235_s14 = smov %s2782_s30  ;;  %s4236_s15 = smov %s2680_s17 }
 0x1c4   : > { %s4237_s16 = smov %s2684_s18  ;;  %s4238_s17 = smov %s4241_s22 }
 0x1c5   : > { %s4239_s18 = smov %s4245_s23  ;;  %15 = sbr.rel (!%p13_p6) target bundleno = 5 (0x5), region = 80 }
 0x1cc   :  { %2315 = vsyncpa [#allocation3], 1 }
 0x1cd   :  { %2317 = vsyncpa [#allocation3 + $0x1], 1 }

</bundles_post_ra>
